<compile_context>
chip_gen: v7x
topology: tpu7x:2x2x1
jax: 0.10.0
libtpu: 0.0.40
codegen_flags: <defaults>
</compile_context>

<pallas_src>
import math
import functools

import jax
import jax.numpy as jnp
from jax.experimental import pallas as pl
from jax.experimental.pallas import tpu as pltpu  # noqa: F401  (TPU-specific tuning hooks)


# ----------------------------- config ---------------------------------------
class Config:
    vocab_size = 50
    emb_dim = 32          # TransformerEmbedding output dim
    hidden_dim = 32       # == emb_dim (reference forward never applies emb_fc)
    n_heads = 4
    n_layers = 2
    ffn_dim = 64
    output_dim = 50
    pad_idx = 0
    max_len = 64


CFG = Config()
LOGIT_PAD = 128  # lane-dense padded width for the output head (sliced to output_dim in JAX)

# ---- weight slab page indices (bf16, [N_W_PAGES, 64, 128], each weight stored top-left)
W_ENC_QKV, W_ENC_O, W_ENC_F1, W_ENC_F2 = 0, 1, 2, 3
W_DS_QKV, W_DS_O = 4, 5
W_DC_QKV, W_DC_O = 6, 7
W_D_F1, W_D_F2 = 8, 9
W_FC = 10
N_W_PAGES = 11

# ---- scalar slab page indices (f32, [N_S_PAGES, 8, 128]; biases row 0, LN gamma/beta rows 0/1)
S_ENC_QKV, S_ENC_O, S_ENC_LN1, S_ENC_F1, S_ENC_F2, S_ENC_LN2 = 0, 1, 2, 3, 4, 5
S_DS_QKV, S_DS_O, S_D_LN1 = 6, 7, 8
S_DC_QKV, S_DC_O, S_D_LN2 = 9, 10, 11
S_D_F1, S_D_F2, S_D_LN3 = 12, 13, 14
S_FC = 15
N_S_PAGES = 16


# ----------------------------- fused Pallas kernel ---------------------------
def _fused_forward_kernel(
    src_e_ref, trg_e_ref, src_pad_ref, trg_pad_ref,   # activations / pad flags
    w_ref, s_ref,                                     # coalesced weight / scalar slabs
    out_ref,                                          # [B*S_trg, LOGIT_PAD] f32
    *, n_layers, n_heads, batch, s_src, s_trg, ffn_dim, eps=1e-5,
):
    f32, bf16 = jnp.float32, jnp.bfloat16
    B = batch
    H = src_e_ref.shape[1]
    Dh = H // n_heads

    # ---- additive attention biases (0 keep / -1e10 drop), built ONCE from the tiny
    #      [1, B*S] pad flags, shared by every head and every weight-shared layer repeat.
    #      Attention is batch-folded ([B*Sq, B*Sk] scores), so the bias also carries the
    #      block-diagonal batch structure (div-free construction).
    src_keep = src_pad_ref[...] > 0.5          # [1, B*S_src]
    trg_keep = trg_pad_ref[...] > 0.5          # [1, B*S_trg]

    def attn_bias(Sq, Sk, key_keep, causal):
        Nq, Nk = B * Sq, B * Sk
        rows = jax.lax.broadcasted_iota(jnp.int32, (Nq, Nk), 0)
        cols = jax.lax.broadcasted_iota(jnp.int32, (Nq, Nk), 1)
        keep = jnp.zeros((Nq, Nk), jnp.bool_)
        for b in range(B):  # block-diagonal (same-batch) keep mask
            inb = jnp.logical_and(
                jnp.logical_and(rows >= b * Sq, rows < (b + 1) * Sq),
                jnp.logical_and(cols >= b * Sk, cols < (b + 1) * Sk))
            keep = jnp.logical_or(keep, inb)
        if causal:  # Sq == Sk, so per-block causality == global rows >= cols
            keep = jnp.logical_and(keep, rows >= cols)
        keep = jnp.logical_and(keep, jnp.broadcast_to(key_keep, (Nq, Nk)))
        return jnp.where(keep, 0.0, -1e10).astype(f32)

    enc_bias = attn_bias(s_src, s_src, src_keep, False)
    self_bias = attn_bias(s_trg, s_trg, trg_keep, True)
    cross_bias = attn_bias(s_trg, s_src, src_keep, False)

    def mha(x_q, x_kv, bias, w_qkv_i, w_o_i, s_qkv_i, s_o_i, is_self):
        # fused QKV: single [.,H] @ [H,3H] bf16 push (scale pre-folded into Wq/bq)
        wqkv = w_ref[w_qkv_i, 0:H, 0:3 * H]                      # [H, 3H] bf16
        bqkv = s_ref[s_qkv_i, 0:1, 0:3 * H]                      # [1, 3H] f32
        qkv_q = jnp.dot(x_q.astype(bf16), wqkv, preferred_element_type=f32) + bqkv
        if is_self:
            qkv_kv = qkv_q
        else:
            qkv_kv = jnp.dot(x_kv.astype(bf16), wqkv, preferred_element_type=f32) + bqkv

        ctx = []
        for h in range(n_heads):
            q_h = qkv_q[:, h * Dh:(h + 1) * Dh]                  # [B*Sq, Dh]
            k_h = qkv_kv[:, H + h * Dh:H + (h + 1) * Dh]         # [B*Sk, Dh]
            v_h = qkv_kv[:, 2 * H + h * Dh:2 * H + (h + 1) * Dh]
            # batch-folded scores: q @ k.T over all batches at once
            s = jax.lax.dot_general(q_h.astype(bf16), k_h.astype(bf16),
                                    (((1,), (1,)), ((), ())),
                                    preferred_element_type=f32)  # [B*Sq, B*Sk]
            s = s + bias                                         # masked_fill as vadd
            s = s - jnp.max(s, axis=-1, keepdims=True)
            p = jnp.exp(s)
            p = p * pl.reciprocal(jnp.sum(p, axis=-1, keepdims=True), approx=True)
            ctx.append(jnp.dot(p.astype(bf16), v_h.astype(bf16),
                               preferred_element_type=f32))      # [B*Sq, Dh]
        ctx_all = jnp.concatenate(ctx, axis=1)                   # [B*Sq, H]
        # fused output projection: single [.,H] @ [H,H] push
        wo = w_ref[w_o_i, 0:H, 0:H]
        bo = s_ref[s_o_i, 0:1, 0:H]
        return jnp.dot(ctx_all.astype(bf16), wo, preferred_element_type=f32) + bo

    def add_ln(x, res, ln_i):
        g = s_ref[ln_i, 0:1, 0:H]
        b = s_ref[ln_i, 1:2, 0:H]
        y = x + res
        mu = jnp.mean(y, axis=-1, keepdims=True)
        var = jnp.mean((y - mu) ** 2, axis=-1, keepdims=True)
        return (y - mu) * jax.lax.rsqrt(var + eps) * g + b

    def ffn(x, w1_i, b1_i, w2_i, b2_i):
        w1 = w_ref[w1_i, 0:H, 0:ffn_dim]
        b1 = s_ref[b1_i, 0:1, 0:ffn_dim]
        w2 = w_ref[w2_i, 0:ffn_dim, 0:H]
        b2 = s_ref[b2_i, 0:1, 0:H]
        hmid = jnp.maximum(jnp.dot(x.astype(bf16), w1, preferred_element_type=f32) + b1, 0.0)
        return jnp.dot(hmid.astype(bf16), w2, preferred_element_type=f32) + b2

    # ---------------- encoder: single shared layer applied n_layers times ----
    x = src_e_ref[...]                                  # [B*S_src, H] f32
    for _ in range(n_layers):
        x = add_ln(mha(x, x, enc_bias, W_ENC_QKV, W_ENC_O, S_ENC_QKV, S_ENC_O, True),
                   x, S_ENC_LN1)
        x = add_ln(ffn(x, W_ENC_F1, S_ENC_F1, W_ENC_F2, S_ENC_F2), x, S_ENC_LN2)
    memory = x

    # ---------------- decoder: single shared layer applied n_layers times ----
    # TODO(synk): the reference Decoder also returns the last attention-weight tensor;
    # it is not materialized here (the reference Light_Transformer forward discards it).
    y = trg_e_ref[...]                                  # [B*S_trg, H] f32
    for _ in range(n_layers):
        y = add_ln(mha(y, y, self_bias, W_DS_QKV, W_DS_O, S_DS_QKV, S_DS_O, True),
                   y, S_D_LN1)
        y = add_ln(mha(y, memory, cross_bias, W_DC_QKV, W_DC_O, S_DC_QKV, S_DC_O, False),
                   y, S_D_LN2)
        y = add_ln(ffn(y, W_D_F1, S_D_F1, W_D_F2, S_D_F2), y, S_D_LN3)

    # ---------------- lane-dense output head ---------------------------------
    out_ref[...] = (jnp.dot(y.astype(bf16), w_ref[W_FC, 0:H, 0:LOGIT_PAD],
                            preferred_element_type=f32)
                    + s_ref[S_FC, 0:1, 0:LOGIT_PAD]).astype(out_ref.dtype)


# ----------------------------- parameters -----------------------------------
def _linear_params(key, fan_in, fan_out):
    kw, kb = jax.random.split(key)
    bound = 1.0 / math.sqrt(fan_in)
    w = jax.random.uniform(kw, (fan_in, fan_out), jnp.float32, -bound, bound)
    b = jax.random.uniform(kb, (fan_out,), jnp.float32, -bound, bound)
    return {"w": w, "b": b}


def _mha_params(key, hidden):
    ks = jax.random.split(key, 4)
    return {
        "q": _linear_params(ks[0], hidden, hidden),
        "k": _linear_params(ks[1], hidden, hidden),
        "v": _linear_params(ks[2], hidden, hidden),
        "o": _linear_params(ks[3], hidden, hidden),
    }


def _ln_params(hidden):
    return {"g": jnp.ones((hidden,), jnp.float32), "b": jnp.zeros((hidden,), jnp.float32)}


def init_params(cfg, seed=0):
    key = jax.random.PRNGKey(seed)
    keys = jax.random.split(key, 12)
    H, F = cfg.hidden_dim, cfg.ffn_dim
    return {
        "tok_emb": 0.02 * jax.random.normal(keys[0], (cfg.vocab_size, cfg.emb_dim), jnp.float32),
        # TODO(synk): self.emb_fc exists in the reference __init__ but is never used in forward.
        "emb_fc": _linear_params(keys[1], cfg.emb_dim, cfg.hidden_dim),
        "enc": {
            "attn": _mha_params(keys[2], H),
            "ln1": _ln_params(H),
            "ff1": _linear_params(keys[3], H, F),
            "ff2": _linear_params(keys[4], F, H),
            "ln2": _ln_params(H),
        },
        "dec": {
            "self_attn": _mha_params(keys[5], H),
            "ln1": _ln_params(H),
            "cross_attn": _mha_params(keys[6], H),
            "ln2": _ln_params(H),
            "ff1": _linear_params(keys[7], H, F),
            "ff2": _linear_params(keys[8], F, H),
            "ln3": _ln_params(H),
        },
        "fc_out": _linear_params(keys[9], H, cfg.output_dim),
    }


# ------------------------ pack params for the fused kernel -------------------
def _page_w(w):
    r, c = w.shape
    return jnp.pad(w, ((0, 64 - r), (0, 128 - c))).astype(jnp.bfloat16)


def _page_s(rows):
    r, c = rows.shape
    return jnp.pad(rows, ((0, 8 - r), (0, 128 - c))).astype(jnp.float32)


def pack_params(params, cfg=CFG):
    H, nH = cfg.hidden_dim, cfg.n_heads
    Dh = H // nH
    scale = 1.0 / math.sqrt(Dh)
    enc, dec = params["enc"], params["dec"]

    def qkv_w(p):   # scale folded into Wq -> no per-score multiply in-kernel
        return jnp.concatenate([p["q"]["w"] * scale, p["k"]["w"], p["v"]["w"]], axis=1)

    def qkv_b(p):
        return jnp.concatenate([p["q"]["b"] * scale, p["k"]["b"], p["v"]["b"]])[None, :]

    def ln_rows(p):
        return jnp.stack([p["g"], p["b"]], axis=0)   # [2, H] (gamma row 0, beta row 1)

    w_pages = [
        qkv_w(enc["attn"]), enc["attn"]["o"]["w"], enc["ff1"]["w"], enc["ff2"]["w"],
        qkv_w(dec["self_attn"]), dec["self_attn"]["o"]["w"],
        qkv_w(dec["cross_attn"]), dec["cross_attn"]["o"]["w"],
        dec["ff1"]["w"], dec["ff2"]["w"],
        params["fc_out"]["w"],
    ]
    s_pages = [
        qkv_b(enc["attn"]), enc["attn"]["o"]["b"][None, :], ln_rows(enc["ln1"]),
        enc["ff1"]["b"][None, :], enc["ff2"]["b"][None, :], ln_rows(enc["ln2"]),
        qkv_b(dec["self_attn"]), dec["self_attn"]["o"]["b"][None, :], ln_rows(dec["ln1"]),
        qkv_b(dec["cross_attn"]), dec["cross_attn"]["o"]["b"][None, :], ln_rows(dec["ln2"]),
        dec["ff1"]["b"][None, :], dec["ff2"]["b"][None, :], ln_rows(dec["ln3"]),
        params["fc_out"]["b"][None, :],
    ]
    assert len(w_pages) == N_W_PAGES and len(s_pages) == N_S_PAGES
    w_slab = jnp.stack([_page_w(w) for w in w_pages], axis=0)   # [11, 64, 128] bf16
    s_slab = jnp.stack([_page_s(s) for s in s_pages], axis=0)   # [16, 8, 128] f32
    return {"tok_emb": params["tok_emb"], "w_slab": w_slab, "s_slab": s_slab}


# ----------------------------- model (glue + one fused call) -----------------
def sinusoidal_pos_encoding(max_len, dim):
    pos = jnp.arange(max_len, dtype=jnp.float32)[:, None]
    i = jnp.arange(dim, dtype=jnp.float32)[None, :]
    angle = pos / jnp.power(10000.0, (2.0 * jnp.floor(i / 2.0)) / dim)
    return jnp.where(jnp.mod(jnp.arange(dim), 2) == 0, jnp.sin(angle), jnp.cos(angle))


def light_transformer_forward(packed, src, trg, cfg=CFG):
    B, S_src = src.shape
    _, S_trg = trg.shape
    H = cfg.hidden_dim

    # glue: embedding gather + positional encoding + pad flags (tiny, stays in JAX)
    pe = sinusoidal_pos_encoding(cfg.max_len, cfg.emb_dim)
    src_e = (packed["tok_emb"][src] + pe[:S_src][None]).reshape(B * S_src, H).astype(jnp.float32)
    trg_e = (packed["tok_emb"][trg] + pe[:S_trg][None]).reshape(B * S_trg, H).astype(jnp.float32)
    src_pad = (src != cfg.pad_idx).astype(jnp.float32).reshape(1, B * S_src)
    trg_pad = (trg != cfg.pad_idx).astype(jnp.float32).reshape(1, B * S_trg)

    kernel = functools.partial(
        _fused_forward_kernel,
        n_layers=cfg.n_layers, n_heads=cfg.n_heads,
        batch=B, s_src=S_src, s_trg=S_trg, ffn_dim=cfg.ffn_dim)

    logits_pad = pl.pallas_call(
        kernel,
        out_shape=jax.ShapeDtypeStruct((B * S_trg, LOGIT_PAD), jnp.float32),
    )(src_e, trg_e, src_pad, trg_pad, packed["w_slab"], packed["s_slab"])

    return logits_pad.reshape(B, S_trg, LOGIT_PAD)[:, :, :cfg.output_dim]


# ----------------------------- main ------------------------------------------
if __name__ == "__main__":
    B, S = 2, 8
    key = jax.random.PRNGKey(0)
    k_src, k_trg = jax.random.split(key)
    # tokens in [1, vocab) so pad_idx=0 rows stay unmasked; semantics identical either way
    src = jax.random.randint(k_src, (B, S), 1, CFG.vocab_size, dtype=jnp.int32)
    trg = jax.random.randint(k_trg, (B, S), 1, CFG.vocab_size, dtype=jnp.int32)

    params = init_params(CFG, seed=0)
    packed = pack_params(params, CFG)

    fwd = jax.jit(light_transformer_forward)
    out = fwd(packed, src, trg)
    out = jax.block_until_ready(out)

    assert out.shape == (B, S, CFG.output_dim)
    assert bool(jnp.all(jnp.isfinite(out)))
    print("KERNEL_OK")
</pallas_src>

<mosaic_0001>
module attributes {stable_mosaic.version = 11 : i64} {
  func.func @_fused_forward_kernel(%arg0: memref<16x32xf32, #tpu.memory_space<vmem>>, %arg1: memref<16x32xf32, #tpu.memory_space<vmem>>, %arg2: memref<1x16xf32, #tpu.memory_space<vmem>>, %arg3: memref<1x16xf32, #tpu.memory_space<vmem>>, %arg4: memref<11x64x128xbf16, #tpu.memory_space<vmem>>, %arg5: memref<16x8x128xf32, #tpu.memory_space<vmem>>, %arg6: memref<16x128xf32, #tpu.memory_space<vmem>>) attributes {dimension_semantics = [], scalar_prefetch = 0 : i64, scratch_operands = 0 : i64, tpu.core_type = #tpu.core_type<tc>} {
    %c0 = arith.constant 0 : index
    %c0_0 = arith.constant 0 : index
    %0 = vector.load %arg2[%c0, %c0_0] : memref<1x16xf32, #tpu.memory_space<vmem>>, vector<1x16xf32>
    %cst = arith.constant 5.000000e-01 : f32
    %1 = vector.broadcast %cst : f32 to vector<1x16xf32>
    %2 = arith.cmpf ogt, %0, %1 : vector<1x16xf32>
    %c0_1 = arith.constant 0 : index
    %c0_2 = arith.constant 0 : index
    %3 = vector.load %arg3[%c0_1, %c0_2] : memref<1x16xf32, #tpu.memory_space<vmem>>, vector<1x16xf32>
    %cst_3 = arith.constant 5.000000e-01 : f32
    %4 = vector.broadcast %cst_3 : f32 to vector<1x16xf32>
    %5 = arith.cmpf ogt, %3, %4 : vector<1x16xf32>
    %6 = tpu.iota {dimensions = array<i32: 0>} : vector<16x16xi32>
    %7 = tpu.iota {dimensions = array<i32: 1>} : vector<16x16xi32>
    %false = arith.constant false
    %8 = vector.broadcast %false : i1 to vector<16x16xi1>
    %c0_i32 = arith.constant 0 : i32
    %9 = vector.broadcast %c0_i32 : i32 to vector<16x16xi32>
    %10 = arith.cmpi sge, %6, %9 : vector<16x16xi32>
    %c8_i32 = arith.constant 8 : i32
    %11 = vector.broadcast %c8_i32 : i32 to vector<16x16xi32>
    %12 = arith.cmpi slt, %6, %11 : vector<16x16xi32>
    %13 = arith.andi %10, %12 : vector<16x16xi1>
    %c0_i32_4 = arith.constant 0 : i32
    %14 = vector.broadcast %c0_i32_4 : i32 to vector<16x16xi32>
    %15 = arith.cmpi sge, %7, %14 : vector<16x16xi32>
    %c8_i32_5 = arith.constant 8 : i32
    %16 = vector.broadcast %c8_i32_5 : i32 to vector<16x16xi32>
    %17 = arith.cmpi slt, %7, %16 : vector<16x16xi32>
    %18 = arith.andi %15, %17 : vector<16x16xi1>
    %19 = arith.andi %13, %18 : vector<16x16xi1>
    %20 = arith.ori %8, %19 : vector<16x16xi1>
    %c8_i32_6 = arith.constant 8 : i32
    %21 = vector.broadcast %c8_i32_6 : i32 to vector<16x16xi32>
    %22 = arith.cmpi sge, %6, %21 : vector<16x16xi32>
    %c16_i32 = arith.constant 16 : i32
    %23 = vector.broadcast %c16_i32 : i32 to vector<16x16xi32>
    %24 = arith.cmpi slt, %6, %23 : vector<16x16xi32>
    %25 = arith.andi %22, %24 : vector<16x16xi1>
    %c8_i32_7 = arith.constant 8 : i32
    %26 = vector.broadcast %c8_i32_7 : i32 to vector<16x16xi32>
    %27 = arith.cmpi sge, %7, %26 : vector<16x16xi32>
    %c16_i32_8 = arith.constant 16 : i32
    %28 = vector.broadcast %c16_i32_8 : i32 to vector<16x16xi32>
    %29 = arith.cmpi slt, %7, %28 : vector<16x16xi32>
    %30 = arith.andi %27, %29 : vector<16x16xi1>
    %31 = arith.andi %25, %30 : vector<16x16xi1>
    %32 = arith.ori %20, %31 : vector<16x16xi1>
    %33 = vector.shape_cast %2 : vector<1x16xi1> to vector<1x16xi1>
    %34 = vector.broadcast %33 : vector<1x16xi1> to vector<16x16xi1>
    %35 = arith.andi %32, %34 : vector<16x16xi1>
    %cst_9 = arith.constant 0.000000e+00 : f32
    %cst_10 = arith.constant -1.000000e+10 : f32
    %36 = vector.broadcast %cst_9 : f32 to vector<16x16xf32>
    %37 = vector.broadcast %cst_10 : f32 to vector<16x16xf32>
    %38 = arith.select %35, %36, %37 : vector<16x16xi1>, vector<16x16xf32>
    %39 = tpu.iota {dimensions = array<i32: 0>} : vector<16x16xi32>
    %40 = tpu.iota {dimensions = array<i32: 1>} : vector<16x16xi32>
    %false_11 = arith.constant false
    %41 = vector.broadcast %false_11 : i1 to vector<16x16xi1>
    %c0_i32_12 = arith.constant 0 : i32
    %42 = vector.broadcast %c0_i32_12 : i32 to vector<16x16xi32>
    %43 = arith.cmpi sge, %39, %42 : vector<16x16xi32>
    %c8_i32_13 = arith.constant 8 : i32
    %44 = vector.broadcast %c8_i32_13 : i32 to vector<16x16xi32>
    %45 = arith.cmpi slt, %39, %44 : vector<16x16xi32>
    %46 = arith.andi %43, %45 : vector<16x16xi1>
    %c0_i32_14 = arith.constant 0 : i32
    %47 = vector.broadcast %c0_i32_14 : i32 to vector<16x16xi32>
    %48 = arith.cmpi sge, %40, %47 : vector<16x16xi32>
    %c8_i32_15 = arith.constant 8 : i32
    %49 = vector.broadcast %c8_i32_15 : i32 to vector<16x16xi32>
    %50 = arith.cmpi slt, %40, %49 : vector<16x16xi32>
    %51 = arith.andi %48, %50 : vector<16x16xi1>
    %52 = arith.andi %46, %51 : vector<16x16xi1>
    %53 = arith.ori %41, %52 : vector<16x16xi1>
    %c8_i32_16 = arith.constant 8 : i32
    %54 = vector.broadcast %c8_i32_16 : i32 to vector<16x16xi32>
    %55 = arith.cmpi sge, %39, %54 : vector<16x16xi32>
    %c16_i32_17 = arith.constant 16 : i32
    %56 = vector.broadcast %c16_i32_17 : i32 to vector<16x16xi32>
    %57 = arith.cmpi slt, %39, %56 : vector<16x16xi32>
    %58 = arith.andi %55, %57 : vector<16x16xi1>
    %c8_i32_18 = arith.constant 8 : i32
    %59 = vector.broadcast %c8_i32_18 : i32 to vector<16x16xi32>
    %60 = arith.cmpi sge, %40, %59 : vector<16x16xi32>
    %c16_i32_19 = arith.constant 16 : i32
    %61 = vector.broadcast %c16_i32_19 : i32 to vector<16x16xi32>
    %62 = arith.cmpi slt, %40, %61 : vector<16x16xi32>
    %63 = arith.andi %60, %62 : vector<16x16xi1>
    %64 = arith.andi %58, %63 : vector<16x16xi1>
    %65 = arith.ori %53, %64 : vector<16x16xi1>
    %66 = arith.cmpi sge, %39, %40 : vector<16x16xi32>
    %67 = arith.andi %65, %66 : vector<16x16xi1>
    %68 = vector.shape_cast %5 : vector<1x16xi1> to vector<1x16xi1>
    %69 = vector.broadcast %68 : vector<1x16xi1> to vector<16x16xi1>
    %70 = arith.andi %67, %69 : vector<16x16xi1>
    %cst_20 = arith.constant 0.000000e+00 : f32
    %cst_21 = arith.constant -1.000000e+10 : f32
    %71 = vector.broadcast %cst_20 : f32 to vector<16x16xf32>
    %72 = vector.broadcast %cst_21 : f32 to vector<16x16xf32>
    %73 = arith.select %70, %71, %72 : vector<16x16xi1>, vector<16x16xf32>
    %74 = tpu.iota {dimensions = array<i32: 0>} : vector<16x16xi32>
    %75 = tpu.iota {dimensions = array<i32: 1>} : vector<16x16xi32>
    %false_22 = arith.constant false
    %76 = vector.broadcast %false_22 : i1 to vector<16x16xi1>
    %c0_i32_23 = arith.constant 0 : i32
    %77 = vector.broadcast %c0_i32_23 : i32 to vector<16x16xi32>
    %78 = arith.cmpi sge, %74, %77 : vector<16x16xi32>
    %c8_i32_24 = arith.constant 8 : i32
    %79 = vector.broadcast %c8_i32_24 : i32 to vector<16x16xi32>
    %80 = arith.cmpi slt, %74, %79 : vector<16x16xi32>
    %81 = arith.andi %78, %80 : vector<16x16xi1>
    %c0_i32_25 = arith.constant 0 : i32
    %82 = vector.broadcast %c0_i32_25 : i32 to vector<16x16xi32>
    %83 = arith.cmpi sge, %75, %82 : vector<16x16xi32>
    %c8_i32_26 = arith.constant 8 : i32
    %84 = vector.broadcast %c8_i32_26 : i32 to vector<16x16xi32>
    %85 = arith.cmpi slt, %75, %84 : vector<16x16xi32>
    %86 = arith.andi %83, %85 : vector<16x16xi1>
    %87 = arith.andi %81, %86 : vector<16x16xi1>
    %88 = arith.ori %76, %87 : vector<16x16xi1>
    %c8_i32_27 = arith.constant 8 : i32
    %89 = vector.broadcast %c8_i32_27 : i32 to vector<16x16xi32>
    %90 = arith.cmpi sge, %74, %89 : vector<16x16xi32>
    %c16_i32_28 = arith.constant 16 : i32
    %91 = vector.broadcast %c16_i32_28 : i32 to vector<16x16xi32>
    %92 = arith.cmpi slt, %74, %91 : vector<16x16xi32>
    %93 = arith.andi %90, %92 : vector<16x16xi1>
    %c8_i32_29 = arith.constant 8 : i32
    %94 = vector.broadcast %c8_i32_29 : i32 to vector<16x16xi32>
    %95 = arith.cmpi sge, %75, %94 : vector<16x16xi32>
    %c16_i32_30 = arith.constant 16 : i32
    %96 = vector.broadcast %c16_i32_30 : i32 to vector<16x16xi32>
    %97 = arith.cmpi slt, %75, %96 : vector<16x16xi32>
    %98 = arith.andi %95, %97 : vector<16x16xi1>
    %99 = arith.andi %93, %98 : vector<16x16xi1>
    %100 = arith.ori %88, %99 : vector<16x16xi1>
    %101 = vector.shape_cast %2 : vector<1x16xi1> to vector<1x16xi1>
    %102 = vector.broadcast %101 : vector<1x16xi1> to vector<16x16xi1>
    %103 = arith.andi %100, %102 : vector<16x16xi1>
    %cst_31 = arith.constant 0.000000e+00 : f32
    %cst_32 = arith.constant -1.000000e+10 : f32
    %104 = vector.broadcast %cst_31 : f32 to vector<16x16xf32>
    %105 = vector.broadcast %cst_32 : f32 to vector<16x16xf32>
    %106 = arith.select %103, %104, %105 : vector<16x16xi1>, vector<16x16xf32>
    %c0_33 = arith.constant 0 : index
    %c0_34 = arith.constant 0 : index
    %107 = vector.load %arg0[%c0_33, %c0_34] : memref<16x32xf32, #tpu.memory_space<vmem>>, vector<16x32xf32>
    %c0_35 = arith.constant 0 : index
    %c0_36 = arith.constant 0 : index
    %c0_37 = arith.constant 0 : index
    %108 = vector.load %arg4[%c0_35, %c0_36, %c0_37] : memref<11x64x128xbf16, #tpu.memory_space<vmem>>, vector<1x32x96xbf16>
    %109 = vector.shape_cast %108 : vector<1x32x96xbf16> to vector<32x96xbf16>
    %c0_38 = arith.constant 0 : index
    %c0_39 = arith.constant 0 : index
    %c0_40 = arith.constant 0 : index
    %110 = vector.load %arg5[%c0_38, %c0_39, %c0_40] : memref<16x8x128xf32, #tpu.memory_space<vmem>>, vector<1x1x96xf32>
    %111 = vector.shape_cast %110 : vector<1x1x96xf32> to vector<1x96xf32>
    %112 = arith.truncf %107 : vector<16x32xf32> to vector<16x32xbf16>
    %cst_41 = arith.constant dense<0.000000e+00> : vector<16x96xf32>
    %113 = tpu.matmul %112, %109, %cst_41 {dimension_numbers = #tpu.dot_dimension_numbers<[1], [0], [0], [1], [0, 0, 1, 1], [], []>} : vector<16x32xbf16>, vector<32x96xbf16>, vector<16x96xf32> -> vector<16x96xf32>
    %114 = vector.broadcast %111 : vector<1x96xf32> to vector<16x96xf32>
    %115 = arith.addf %113, %114 : vector<16x96xf32>
    %116 = vector.extract_strided_slice %115 {offsets = [0, 0], sizes = [16, 8], strides = [1, 1]} : vector<16x96xf32> to vector<16x8xf32>
    %117 = vector.extract_strided_slice %115 {offsets = [0, 32], sizes = [16, 8], strides = [1, 1]} : vector<16x96xf32> to vector<16x8xf32>
    %118 = vector.extract_strided_slice %115 {offsets = [0, 64], sizes = [16, 8], strides = [1, 1]} : vector<16x96xf32> to vector<16x8xf32>
    %119 = arith.truncf %116 : vector<16x8xf32> to vector<16x8xbf16>
    %120 = arith.truncf %117 : vector<16x8xf32> to vector<16x8xbf16>
    %cst_42 = arith.constant dense<0.000000e+00> : vector<16x16xf32>
    %121 = tpu.matmul %119, %120, %cst_42 {dimension_numbers = #tpu.dot_dimension_numbers<[1], [1], [0], [0], [0, 0, 1, 0], [], []>} : vector<16x8xbf16>, vector<16x8xbf16>, vector<16x16xf32> -> vector<16x16xf32>
    %122 = arith.addf %121, %38 : vector<16x16xf32>
    %cst_43 = arith.constant dense<0xFF800000> : vector<16xf32>
    %123 = vector.multi_reduction <maximumf>, %122, %cst_43 [1] : vector<16x16xf32> to vector<16xf32>
    %124 = vector.shape_cast %123 : vector<16xf32> to vector<16x1xf32>
    %125 = vector.broadcast %124 : vector<16x1xf32> to vector<16x16xf32>
    %126 = arith.subf %122, %125 : vector<16x16xf32>
    %127 = math.exp %126 : vector<16x16xf32>
    %cst_44 = arith.constant dense<0.000000e+00> : vector<16xf32>
    %128 = vector.multi_reduction <add>, %127, %cst_44 [1] : vector<16x16xf32> to vector<16xf32>
    %129 = vector.shape_cast %128 : vector<16xf32> to vector<16x1xf32>
    %130 = tpu.reciprocal %129 {approx = true} : vector<16x1xf32> -> vector<16x1xf32>
    %131 = vector.broadcast %130 : vector<16x1xf32> to vector<16x16xf32>
    %132 = arith.mulf %127, %131 : vector<16x16xf32>
    %133 = arith.truncf %132 : vector<16x16xf32> to vector<16x16xbf16>
    %134 = arith.truncf %118 : vector<16x8xf32> to vector<16x8xbf16>
    %cst_45 = arith.constant dense<0.000000e+00> : vector<16x8xf32>
    %135 = tpu.matmul %133, %134, %cst_45 {dimension_numbers = #tpu.dot_dimension_numbers<[1], [0], [0], [1], [0, 0, 1, 1], [], []>} : vector<16x16xbf16>, vector<16x8xbf16>, vector<16x8xf32> -> vector<16x8xf32>
    %136 = vector.extract_strided_slice %115 {offsets = [0, 8], sizes = [16, 8], strides = [1, 1]} : vector<16x96xf32> to vector<16x8xf32>
    %137 = vector.extract_strided_slice %115 {offsets = [0, 40], sizes = [16, 8], strides = [1, 1]} : vector<16x96xf32> to vector<16x8xf32>
    %138 = vector.extract_strided_slice %115 {offsets = [0, 72], sizes = [16, 8], strides = [1, 1]} : vector<16x96xf32> to vector<16x8xf32>
    %139 = arith.truncf %136 : vector<16x8xf32> to vector<16x8xbf16>
    %140 = arith.truncf %137 : vector<16x8xf32> to vector<16x8xbf16>
    %cst_46 = arith.constant dense<0.000000e+00> : vector<16x16xf32>
    %141 = tpu.matmul %139, %140, %cst_46 {dimension_numbers = #tpu.dot_dimension_numbers<[1], [1], [0], [0], [0, 0, 1, 0], [], []>} : vector<16x8xbf16>, vector<16x8xbf16>, vector<16x16xf32> -> vector<16x16xf32>
    %142 = arith.addf %141, %38 : vector<16x16xf32>
    %cst_47 = arith.constant dense<0xFF800000> : vector<16xf32>
    %143 = vector.multi_reduction <maximumf>, %142, %cst_47 [1] : vector<16x16xf32> to vector<16xf32>
    %144 = vector.shape_cast %143 : vector<16xf32> to vector<16x1xf32>
    %145 = vector.broadcast %144 : vector<16x1xf32> to vector<16x16xf32>
    %146 = arith.subf %142, %145 : vector<16x16xf32>
    %147 = math.exp %146 : vector<16x16xf32>
    %cst_48 = arith.constant dense<0.000000e+00> : vector<16xf32>
    %148 = vector.multi_reduction <add>, %147, %cst_48 [1] : vector<16x16xf32> to vector<16xf32>
    %149 = vector.shape_cast %148 : vector<16xf32> to vector<16x1xf32>
    %150 = tpu.reciprocal %149 {approx = true} : vector<16x1xf32> -> vector<16x1xf32>
    %151 = vector.broadcast %150 : vector<16x1xf32> to vector<16x16xf32>
    %152 = arith.mulf %147, %151 : vector<16x16xf32>
    %153 = arith.truncf %152 : vector<16x16xf32> to vector<16x16xbf16>
    %154 = arith.truncf %138 : vector<16x8xf32> to vector<16x8xbf16>
    %cst_49 = arith.constant dense<0.000000e+00> : vector<16x8xf32>
    %155 = tpu.matmul %153, %154, %cst_49 {dimension_numbers = #tpu.dot_dimension_numbers<[1], [0], [0], [1], [0, 0, 1, 1], [], []>} : vector<16x16xbf16>, vector<16x8xbf16>, vector<16x8xf32> -> vector<16x8xf32>
    %156 = vector.extract_strided_slice %115 {offsets = [0, 16], sizes = [16, 8], strides = [1, 1]} : vector<16x96xf32> to vector<16x8xf32>
    %157 = vector.extract_strided_slice %115 {offsets = [0, 48], sizes = [16, 8], strides = [1, 1]} : vector<16x96xf32> to vector<16x8xf32>
    %158 = vector.extract_strided_slice %115 {offsets = [0, 80], sizes = [16, 8], strides = [1, 1]} : vector<16x96xf32> to vector<16x8xf32>
    %159 = arith.truncf %156 : vector<16x8xf32> to vector<16x8xbf16>
    %160 = arith.truncf %157 : vector<16x8xf32> to vector<16x8xbf16>
    %cst_50 = arith.constant dense<0.000000e+00> : vector<16x16xf32>
    %161 = tpu.matmul %159, %160, %cst_50 {dimension_numbers = #tpu.dot_dimension_numbers<[1], [1], [0], [0], [0, 0, 1, 0], [], []>} : vector<16x8xbf16>, vector<16x8xbf16>, vector<16x16xf32> -> vector<16x16xf32>
    %162 = arith.addf %161, %38 : vector<16x16xf32>
    %cst_51 = arith.constant dense<0xFF800000> : vector<16xf32>
    %163 = vector.multi_reduction <maximumf>, %162, %cst_51 [1] : vector<16x16xf32> to vector<16xf32>
    %164 = vector.shape_cast %163 : vector<16xf32> to vector<16x1xf32>
    %165 = vector.broadcast %164 : vector<16x1xf32> to vector<16x16xf32>
    %166 = arith.subf %162, %165 : vector<16x16xf32>
    %167 = math.exp %166 : vector<16x16xf32>
    %cst_52 = arith.constant dense<0.000000e+00> : vector<16xf32>
    %168 = vector.multi_reduction <add>, %167, %cst_52 [1] : vector<16x16xf32> to vector<16xf32>
    %169 = vector.shape_cast %168 : vector<16xf32> to vector<16x1xf32>
    %170 = tpu.reciprocal %169 {approx = true} : vector<16x1xf32> -> vector<16x1xf32>
    %171 = vector.broadcast %170 : vector<16x1xf32> to vector<16x16xf32>
    %172 = arith.mulf %167, %171 : vector<16x16xf32>
    %173 = arith.truncf %172 : vector<16x16xf32> to vector<16x16xbf16>
    %174 = arith.truncf %158 : vector<16x8xf32> to vector<16x8xbf16>
    %cst_53 = arith.constant dense<0.000000e+00> : vector<16x8xf32>
    %175 = tpu.matmul %173, %174, %cst_53 {dimension_numbers = #tpu.dot_dimension_numbers<[1], [0], [0], [1], [0, 0, 1, 1], [], []>} : vector<16x16xbf16>, vector<16x8xbf16>, vector<16x8xf32> -> vector<16x8xf32>
    %176 = vector.extract_strided_slice %115 {offsets = [0, 24], sizes = [16, 8], strides = [1, 1]} : vector<16x96xf32> to vector<16x8xf32>
    %177 = vector.extract_strided_slice %115 {offsets = [0, 56], sizes = [16, 8], strides = [1, 1]} : vector<16x96xf32> to vector<16x8xf32>
    %178 = vector.extract_strided_slice %115 {offsets = [0, 88], sizes = [16, 8], strides = [1, 1]} : vector<16x96xf32> to vector<16x8xf32>
    %179 = arith.truncf %176 : vector<16x8xf32> to vector<16x8xbf16>
    %180 = arith.truncf %177 : vector<16x8xf32> to vector<16x8xbf16>
    %cst_54 = arith.constant dense<0.000000e+00> : vector<16x16xf32>
    %181 = tpu.matmul %179, %180, %cst_54 {dimension_numbers = #tpu.dot_dimension_numbers<[1], [1], [0], [0], [0, 0, 1, 0], [], []>} : vector<16x8xbf16>, vector<16x8xbf16>, vector<16x16xf32> -> vector<16x16xf32>
    %182 = arith.addf %181, %38 : vector<16x16xf32>
    %cst_55 = arith.constant dense<0xFF800000> : vector<16xf32>
    %183 = vector.multi_reduction <maximumf>, %182, %cst_55 [1] : vector<16x16xf32> to vector<16xf32>
    %184 = vector.shape_cast %183 : vector<16xf32> to vector<16x1xf32>
    %185 = vector.broadcast %184 : vector<16x1xf32> to vector<16x16xf32>
    %186 = arith.subf %182, %185 : vector<16x16xf32>
    %187 = math.exp %186 : vector<16x16xf32>
    %cst_56 = arith.constant dense<0.000000e+00> : vector<16xf32>
    %188 = vector.multi_reduction <add>, %187, %cst_56 [1] : vector<16x16xf32> to vector<16xf32>
    %189 = vector.shape_cast %188 : vector<16xf32> to vector<16x1xf32>
    %190 = tpu.reciprocal %189 {approx = true} : vector<16x1xf32> -> vector<16x1xf32>
    %191 = vector.broadcast %190 : vector<16x1xf32> to vector<16x16xf32>
    %192 = arith.mulf %187, %191 : vector<16x16xf32>
    %193 = arith.truncf %192 : vector<16x16xf32> to vector<16x16xbf16>
    %194 = arith.truncf %178 : vector<16x8xf32> to vector<16x8xbf16>
    %cst_57 = arith.constant dense<0.000000e+00> : vector<16x8xf32>
    %195 = tpu.matmul %193, %194, %cst_57 {dimension_numbers = #tpu.dot_dimension_numbers<[1], [0], [0], [1], [0, 0, 1, 1], [], []>} : vector<16x16xbf16>, vector<16x8xbf16>, vector<16x8xf32> -> vector<16x8xf32>
    %196 = tpu.concatenate %135, %155, %175, %195 in 1 : vector<16x8xf32>, vector<16x8xf32>, vector<16x8xf32>, vector<16x8xf32> -> vector<16x32xf32>
    %c1 = arith.constant 1 : index
    %c0_58 = arith.constant 0 : index
    %c0_59 = arith.constant 0 : index
    %197 = vector.load %arg4[%c1, %c0_58, %c0_59] : memref<11x64x128xbf16, #tpu.memory_space<vmem>>, vector<1x32x32xbf16>
    %198 = vector.shape_cast %197 : vector<1x32x32xbf16> to vector<32x32xbf16>
    %c1_60 = arith.constant 1 : index
    %c0_61 = arith.constant 0 : index
    %c0_62 = arith.constant 0 : index
    %199 = vector.load %arg5[%c1_60, %c0_61, %c0_62] : memref<16x8x128xf32, #tpu.memory_space<vmem>>, vector<1x1x32xf32>
    %200 = vector.shape_cast %199 : vector<1x1x32xf32> to vector<1x32xf32>
    %201 = arith.truncf %196 : vector<16x32xf32> to vector<16x32xbf16>
    %cst_63 = arith.constant dense<0.000000e+00> : vector<16x32xf32>
    %202 = tpu.matmul %201, %198, %cst_63 {dimension_numbers = #tpu.dot_dimension_numbers<[1], [0], [0], [1], [0, 0, 1, 1], [], []>} : vector<16x32xbf16>, vector<32x32xbf16>, vector<16x32xf32> -> vector<16x32xf32>
    %203 = vector.broadcast %200 : vector<1x32xf32> to vector<16x32xf32>
    %204 = arith.addf %202, %203 : vector<16x32xf32>
    %c2 = arith.constant 2 : index
    %c0_64 = arith.constant 0 : index
    %c0_65 = arith.constant 0 : index
    %205 = vector.load %arg5[%c2, %c0_64, %c0_65] : memref<16x8x128xf32, #tpu.memory_space<vmem>>, vector<1x1x32xf32>
    %206 = vector.shape_cast %205 : vector<1x1x32xf32> to vector<1x32xf32>
    %c2_66 = arith.constant 2 : index
    %c1_67 = arith.constant 1 : index
    %c0_68 = arith.constant 0 : index
    %207 = vector.load %arg5[%c2_66, %c1_67, %c0_68] : memref<16x8x128xf32, #tpu.memory_space<vmem>>, vector<1x1x32xf32>
    %208 = vector.shape_cast %207 : vector<1x1x32xf32> to vector<1x32xf32>
    %209 = arith.addf %204, %107 : vector<16x32xf32>
    %cst_69 = arith.constant dense<0.000000e+00> : vector<16xf32>
    %210 = vector.multi_reduction <add>, %209, %cst_69 [1] : vector<16x32xf32> to vector<16xf32>
    %211 = vector.shape_cast %210 : vector<16xf32> to vector<16x1xf32>
    %cst_70 = arith.constant 3.200000e+01 : f32
    %212 = vector.broadcast %cst_70 : f32 to vector<16x1xf32>
    %213 = arith.divf %211, %212 : vector<16x1xf32>
    %214 = vector.broadcast %213 : vector<16x1xf32> to vector<16x32xf32>
    %215 = arith.subf %209, %214 : vector<16x32xf32>
    %216 = arith.mulf %215, %215 : vector<16x32xf32>
    %cst_71 = arith.constant dense<0.000000e+00> : vector<16xf32>
    %217 = vector.multi_reduction <add>, %216, %cst_71 [1] : vector<16x32xf32> to vector<16xf32>
    %218 = vector.shape_cast %217 : vector<16xf32> to vector<16x1xf32>
    %cst_72 = arith.constant 3.200000e+01 : f32
    %219 = vector.broadcast %cst_72 : f32 to vector<16x1xf32>
    %220 = arith.divf %218, %219 : vector<16x1xf32>
    %221 = vector.broadcast %213 : vector<16x1xf32> to vector<16x32xf32>
    %222 = arith.subf %209, %221 : vector<16x32xf32>
    %cst_73 = arith.constant 9.99999974E-6 : f32
    %223 = vector.broadcast %cst_73 : f32 to vector<16x1xf32>
    %224 = arith.addf %220, %223 : vector<16x1xf32>
    %225 = math.rsqrt %224 : vector<16x1xf32>
    %226 = vector.broadcast %225 : vector<16x1xf32> to vector<16x32xf32>
    %227 = arith.mulf %222, %226 : vector<16x32xf32>
    %228 = vector.broadcast %206 : vector<1x32xf32> to vector<16x32xf32>
    %229 = arith.mulf %227, %228 : vector<16x32xf32>
    %230 = vector.broadcast %208 : vector<1x32xf32> to vector<16x32xf32>
    %231 = arith.addf %229, %230 : vector<16x32xf32>
    %c2_74 = arith.constant 2 : index
    %c0_75 = arith.constant 0 : index
    %c0_76 = arith.constant 0 : index
    %232 = vector.load %arg4[%c2_74, %c0_75, %c0_76] : memref<11x64x128xbf16, #tpu.memory_space<vmem>>, vector<1x32x64xbf16>
    %233 = vector.shape_cast %232 : vector<1x32x64xbf16> to vector<32x64xbf16>
    %c3 = arith.constant 3 : index
    %c0_77 = arith.constant 0 : index
    %c0_78 = arith.constant 0 : index
    %234 = vector.load %arg5[%c3, %c0_77, %c0_78] : memref<16x8x128xf32, #tpu.memory_space<vmem>>, vector<1x1x64xf32>
    %235 = vector.shape_cast %234 : vector<1x1x64xf32> to vector<1x64xf32>
    %c3_79 = arith.constant 3 : index
    %c0_80 = arith.constant 0 : index
    %c0_81 = arith.constant 0 : index
    %236 = vector.load %arg4[%c3_79, %c0_80, %c0_81] : memref<11x64x128xbf16, #tpu.memory_space<vmem>>, vector<1x64x32xbf16>
    %237 = vector.shape_cast %236 : vector<1x64x32xbf16> to vector<64x32xbf16>
    %c4 = arith.constant 4 : index
    %c0_82 = arith.constant 0 : index
    %c0_83 = arith.constant 0 : index
    %238 = vector.load %arg5[%c4, %c0_82, %c0_83] : memref<16x8x128xf32, #tpu.memory_space<vmem>>, vector<1x1x32xf32>
    %239 = vector.shape_cast %238 : vector<1x1x32xf32> to vector<1x32xf32>
    %240 = arith.truncf %231 : vector<16x32xf32> to vector<16x32xbf16>
    %cst_84 = arith.constant dense<0.000000e+00> : vector<16x64xf32>
    %241 = tpu.matmul %240, %233, %cst_84 {dimension_numbers = #tpu.dot_dimension_numbers<[1], [0], [0], [1], [0, 0, 1, 1], [], []>} : vector<16x32xbf16>, vector<32x64xbf16>, vector<16x64xf32> -> vector<16x64xf32>
    %242 = vector.broadcast %235 : vector<1x64xf32> to vector<16x64xf32>
    %243 = arith.addf %241, %242 : vector<16x64xf32>
    %cst_85 = arith.constant 0.000000e+00 : f32
    %244 = vector.broadcast %cst_85 : f32 to vector<16x64xf32>
    %245 = arith.maximumf %243, %244 : vector<16x64xf32>
    %246 = arith.truncf %245 : vector<16x64xf32> to vector<16x64xbf16>
    %cst_86 = arith.constant dense<0.000000e+00> : vector<16x32xf32>
    %247 = tpu.matmul %246, %237, %cst_86 {dimension_numbers = #tpu.dot_dimension_numbers<[1], [0], [0], [1], [0, 0, 1, 1], [], []>} : vector<16x64xbf16>, vector<64x32xbf16>, vector<16x32xf32> -> vector<16x32xf32>
    %248 = vector.broadcast %239 : vector<1x32xf32> to vector<16x32xf32>
    %249 = arith.addf %247, %248 : vector<16x32xf32>
    %c5 = arith.constant 5 : index
    %c0_87 = arith.constant 0 : index
    %c0_88 = arith.constant 0 : index
    %250 = vector.load %arg5[%c5, %c0_87, %c0_88] : memref<16x8x128xf32, #tpu.memory_space<vmem>>, vector<1x1x32xf32>
    %251 = vector.shape_cast %250 : vector<1x1x32xf32> to vector<1x32xf32>
    %c5_89 = arith.constant 5 : index
    %c1_90 = arith.constant 1 : index
    %c0_91 = arith.constant 0 : index
    %252 = vector.load %arg5[%c5_89, %c1_90, %c0_91] : memref<16x8x128xf32, #tpu.memory_space<vmem>>, vector<1x1x32xf32>
    %253 = vector.shape_cast %252 : vector<1x1x32xf32> to vector<1x32xf32>
    %254 = arith.addf %249, %231 : vector<16x32xf32>
    %cst_92 = arith.constant dense<0.000000e+00> : vector<16xf32>
    %255 = vector.multi_reduction <add>, %254, %cst_92 [1] : vector<16x32xf32> to vector<16xf32>
    %256 = vector.shape_cast %255 : vector<16xf32> to vector<16x1xf32>
    %cst_93 = arith.constant 3.200000e+01 : f32
    %257 = vector.broadcast %cst_93 : f32 to vector<16x1xf32>
    %258 = arith.divf %256, %257 : vector<16x1xf32>
    %259 = vector.broadcast %258 : vector<16x1xf32> to vector<16x32xf32>
    %260 = arith.subf %254, %259 : vector<16x32xf32>
    %261 = arith.mulf %260, %260 : vector<16x32xf32>
    %cst_94 = arith.constant dense<0.000000e+00> : vector<16xf32>
    %262 = vector.multi_reduction <add>, %261, %cst_94 [1] : vector<16x32xf32> to vector<16xf32>
    %263 = vector.shape_cast %262 : vector<16xf32> to vector<16x1xf32>
    %cst_95 = arith.constant 3.200000e+01 : f32
    %264 = vector.broadcast %cst_95 : f32 to vector<16x1xf32>
    %265 = arith.divf %263, %264 : vector<16x1xf32>
    %266 = vector.broadcast %258 : vector<16x1xf32> to vector<16x32xf32>
    %267 = arith.subf %254, %266 : vector<16x32xf32>
    %cst_96 = arith.constant 9.99999974E-6 : f32
    %268 = vector.broadcast %cst_96 : f32 to vector<16x1xf32>
    %269 = arith.addf %265, %268 : vector<16x1xf32>
    %270 = math.rsqrt %269 : vector<16x1xf32>
    %271 = vector.broadcast %270 : vector<16x1xf32> to vector<16x32xf32>
    %272 = arith.mulf %267, %271 : vector<16x32xf32>
    %273 = vector.broadcast %251 : vector<1x32xf32> to vector<16x32xf32>
    %274 = arith.mulf %272, %273 : vector<16x32xf32>
    %275 = vector.broadcast %253 : vector<1x32xf32> to vector<16x32xf32>
    %276 = arith.addf %274, %275 : vector<16x32xf32>
    %c0_97 = arith.constant 0 : index
    %c0_98 = arith.constant 0 : index
    %c0_99 = arith.constant 0 : index
    %277 = vector.load %arg4[%c0_97, %c0_98, %c0_99] : memref<11x64x128xbf16, #tpu.memory_space<vmem>>, vector<1x32x96xbf16>
    %278 = vector.shape_cast %277 : vector<1x32x96xbf16> to vector<32x96xbf16>
    %c0_100 = arith.constant 0 : index
    %c0_101 = arith.constant 0 : index
    %c0_102 = arith.constant 0 : index
    %279 = vector.load %arg5[%c0_100, %c0_101, %c0_102] : memref<16x8x128xf32, #tpu.memory_space<vmem>>, vector<1x1x96xf32>
    %280 = vector.shape_cast %279 : vector<1x1x96xf32> to vector<1x96xf32>
    %281 = arith.truncf %276 : vector<16x32xf32> to vector<16x32xbf16>
    %cst_103 = arith.constant dense<0.000000e+00> : vector<16x96xf32>
    %282 = tpu.matmul %281, %278, %cst_103 {dimension_numbers = #tpu.dot_dimension_numbers<[1], [0], [0], [1], [0, 0, 1, 1], [], []>} : vector<16x32xbf16>, vector<32x96xbf16>, vector<16x96xf32> -> vector<16x96xf32>
    %283 = vector.broadcast %280 : vector<1x96xf32> to vector<16x96xf32>
    %284 = arith.addf %282, %283 : vector<16x96xf32>
    %285 = vector.extract_strided_slice %284 {offsets = [0, 0], sizes = [16, 8], strides = [1, 1]} : vector<16x96xf32> to vector<16x8xf32>
    %286 = vector.extract_strided_slice %284 {offsets = [0, 32], sizes = [16, 8], strides = [1, 1]} : vector<16x96xf32> to vector<16x8xf32>
    %287 = vector.extract_strided_slice %284 {offsets = [0, 64], sizes = [16, 8], strides = [1, 1]} : vector<16x96xf32> to vector<16x8xf32>
    %288 = arith.truncf %285 : vector<16x8xf32> to vector<16x8xbf16>
    %289 = arith.truncf %286 : vector<16x8xf32> to vector<16x8xbf16>
    %cst_104 = arith.constant dense<0.000000e+00> : vector<16x16xf32>
    %290 = tpu.matmul %288, %289, %cst_104 {dimension_numbers = #tpu.dot_dimension_numbers<[1], [1], [0], [0], [0, 0, 1, 0], [], []>} : vector<16x8xbf16>, vector<16x8xbf16>, vector<16x16xf32> -> vector<16x16xf32>
    %291 = arith.addf %290, %38 : vector<16x16xf32>
    %cst_105 = arith.constant dense<0xFF800000> : vector<16xf32>
    %292 = vector.multi_reduction <maximumf>, %291, %cst_105 [1] : vector<16x16xf32> to vector<16xf32>
    %293 = vector.shape_cast %292 : vector<16xf32> to vector<16x1xf32>
    %294 = vector.broadcast %293 : vector<16x1xf32> to vector<16x16xf32>
    %295 = arith.subf %291, %294 : vector<16x16xf32>
    %296 = math.exp %295 : vector<16x16xf32>
    %cst_106 = arith.constant dense<0.000000e+00> : vector<16xf32>
    %297 = vector.multi_reduction <add>, %296, %cst_106 [1] : vector<16x16xf32> to vector<16xf32>
    %298 = vector.shape_cast %297 : vector<16xf32> to vector<16x1xf32>
    %299 = tpu.reciprocal %298 {approx = true} : vector<16x1xf32> -> vector<16x1xf32>
    %300 = vector.broadcast %299 : vector<16x1xf32> to vector<16x16xf32>
    %301 = arith.mulf %296, %300 : vector<16x16xf32>
    %302 = arith.truncf %301 : vector<16x16xf32> to vector<16x16xbf16>
    %303 = arith.truncf %287 : vector<16x8xf32> to vector<16x8xbf16>
    %cst_107 = arith.constant dense<0.000000e+00> : vector<16x8xf32>
    %304 = tpu.matmul %302, %303, %cst_107 {dimension_numbers = #tpu.dot_dimension_numbers<[1], [0], [0], [1], [0, 0, 1, 1], [], []>} : vector<16x16xbf16>, vector<16x8xbf16>, vector<16x8xf32> -> vector<16x8xf32>
    %305 = vector.extract_strided_slice %284 {offsets = [0, 8], sizes = [16, 8], strides = [1, 1]} : vector<16x96xf32> to vector<16x8xf32>
    %306 = vector.extract_strided_slice %284 {offsets = [0, 40], sizes = [16, 8], strides = [1, 1]} : vector<16x96xf32> to vector<16x8xf32>
    %307 = vector.extract_strided_slice %284 {offsets = [0, 72], sizes = [16, 8], strides = [1, 1]} : vector<16x96xf32> to vector<16x8xf32>
    %308 = arith.truncf %305 : vector<16x8xf32> to vector<16x8xbf16>
    %309 = arith.truncf %306 : vector<16x8xf32> to vector<16x8xbf16>
    %cst_108 = arith.constant dense<0.000000e+00> : vector<16x16xf32>
    %310 = tpu.matmul %308, %309, %cst_108 {dimension_numbers = #tpu.dot_dimension_numbers<[1], [1], [0], [0], [0, 0, 1, 0], [], []>} : vector<16x8xbf16>, vector<16x8xbf16>, vector<16x16xf32> -> vector<16x16xf32>
    %311 = arith.addf %310, %38 : vector<16x16xf32>
    %cst_109 = arith.constant dense<0xFF800000> : vector<16xf32>
    %312 = vector.multi_reduction <maximumf>, %311, %cst_109 [1] : vector<16x16xf32> to vector<16xf32>
    %313 = vector.shape_cast %312 : vector<16xf32> to vector<16x1xf32>
    %314 = vector.broadcast %313 : vector<16x1xf32> to vector<16x16xf32>
    %315 = arith.subf %311, %314 : vector<16x16xf32>
    %316 = math.exp %315 : vector<16x16xf32>
    %cst_110 = arith.constant dense<0.000000e+00> : vector<16xf32>
    %317 = vector.multi_reduction <add>, %316, %cst_110 [1] : vector<16x16xf32> to vector<16xf32>
    %318 = vector.shape_cast %317 : vector<16xf32> to vector<16x1xf32>
    %319 = tpu.reciprocal %318 {approx = true} : vector<16x1xf32> -> vector<16x1xf32>
    %320 = vector.broadcast %319 : vector<16x1xf32> to vector<16x16xf32>
    %321 = arith.mulf %316, %320 : vector<16x16xf32>
    %322 = arith.truncf %321 : vector<16x16xf32> to vector<16x16xbf16>
    %323 = arith.truncf %307 : vector<16x8xf32> to vector<16x8xbf16>
    %cst_111 = arith.constant dense<0.000000e+00> : vector<16x8xf32>
    %324 = tpu.matmul %322, %323, %cst_111 {dimension_numbers = #tpu.dot_dimension_numbers<[1], [0], [0], [1], [0, 0, 1, 1], [], []>} : vector<16x16xbf16>, vector<16x8xbf16>, vector<16x8xf32> -> vector<16x8xf32>
    %325 = vector.extract_strided_slice %284 {offsets = [0, 16], sizes = [16, 8], strides = [1, 1]} : vector<16x96xf32> to vector<16x8xf32>
    %326 = vector.extract_strided_slice %284 {offsets = [0, 48], sizes = [16, 8], strides = [1, 1]} : vector<16x96xf32> to vector<16x8xf32>
    %327 = vector.extract_strided_slice %284 {offsets = [0, 80], sizes = [16, 8], strides = [1, 1]} : vector<16x96xf32> to vector<16x8xf32>
    %328 = arith.truncf %325 : vector<16x8xf32> to vector<16x8xbf16>
    %329 = arith.truncf %326 : vector<16x8xf32> to vector<16x8xbf16>
    %cst_112 = arith.constant dense<0.000000e+00> : vector<16x16xf32>
    %330 = tpu.matmul %328, %329, %cst_112 {dimension_numbers = #tpu.dot_dimension_numbers<[1], [1], [0], [0], [0, 0, 1, 0], [], []>} : vector<16x8xbf16>, vector<16x8xbf16>, vector<16x16xf32> -> vector<16x16xf32>
    %331 = arith.addf %330, %38 : vector<16x16xf32>
    %cst_113 = arith.constant dense<0xFF800000> : vector<16xf32>
    %332 = vector.multi_reduction <maximumf>, %331, %cst_113 [1] : vector<16x16xf32> to vector<16xf32>
    %333 = vector.shape_cast %332 : vector<16xf32> to vector<16x1xf32>
    %334 = vector.broadcast %333 : vector<16x1xf32> to vector<16x16xf32>
    %335 = arith.subf %331, %334 : vector<16x16xf32>
    %336 = math.exp %335 : vector<16x16xf32>
    %cst_114 = arith.constant dense<0.000000e+00> : vector<16xf32>
    %337 = vector.multi_reduction <add>, %336, %cst_114 [1] : vector<16x16xf32> to vector<16xf32>
    %338 = vector.shape_cast %337 : vector<16xf32> to vector<16x1xf32>
    %339 = tpu.reciprocal %338 {approx = true} : vector<16x1xf32> -> vector<16x1xf32>
    %340 = vector.broadcast %339 : vector<16x1xf32> to vector<16x16xf32>
    %341 = arith.mulf %336, %340 : vector<16x16xf32>
    %342 = arith.truncf %341 : vector<16x16xf32> to vector<16x16xbf16>
    %343 = arith.truncf %327 : vector<16x8xf32> to vector<16x8xbf16>
    %cst_115 = arith.constant dense<0.000000e+00> : vector<16x8xf32>
    %344 = tpu.matmul %342, %343, %cst_115 {dimension_numbers = #tpu.dot_dimension_numbers<[1], [0], [0], [1], [0, 0, 1, 1], [], []>} : vector<16x16xbf16>, vector<16x8xbf16>, vector<16x8xf32> -> vector<16x8xf32>
    %345 = vector.extract_strided_slice %284 {offsets = [0, 24], sizes = [16, 8], strides = [1, 1]} : vector<16x96xf32> to vector<16x8xf32>
    %346 = vector.extract_strided_slice %284 {offsets = [0, 56], sizes = [16, 8], strides = [1, 1]} : vector<16x96xf32> to vector<16x8xf32>
    %347 = vector.extract_strided_slice %284 {offsets = [0, 88], sizes = [16, 8], strides = [1, 1]} : vector<16x96xf32> to vector<16x8xf32>
    %348 = arith.truncf %345 : vector<16x8xf32> to vector<16x8xbf16>
    %349 = arith.truncf %346 : vector<16x8xf32> to vector<16x8xbf16>
    %cst_116 = arith.constant dense<0.000000e+00> : vector<16x16xf32>
    %350 = tpu.matmul %348, %349, %cst_116 {dimension_numbers = #tpu.dot_dimension_numbers<[1], [1], [0], [0], [0, 0, 1, 0], [], []>} : vector<16x8xbf16>, vector<16x8xbf16>, vector<16x16xf32> -> vector<16x16xf32>
    %351 = arith.addf %350, %38 : vector<16x16xf32>
    %cst_117 = arith.constant dense<0xFF800000> : vector<16xf32>
    %352 = vector.multi_reduction <maximumf>, %351, %cst_117 [1] : vector<16x16xf32> to vector<16xf32>
    %353 = vector.shape_cast %352 : vector<16xf32> to vector<16x1xf32>
    %354 = vector.broadcast %353 : vector<16x1xf32> to vector<16x16xf32>
    %355 = arith.subf %351, %354 : vector<16x16xf32>
    %356 = math.exp %355 : vector<16x16xf32>
    %cst_118 = arith.constant dense<0.000000e+00> : vector<16xf32>
    %357 = vector.multi_reduction <add>, %356, %cst_118 [1] : vector<16x16xf32> to vector<16xf32>
    %358 = vector.shape_cast %357 : vector<16xf32> to vector<16x1xf32>
    %359 = tpu.reciprocal %358 {approx = true} : vector<16x1xf32> -> vector<16x1xf32>
    %360 = vector.broadcast %359 : vector<16x1xf32> to vector<16x16xf32>
    %361 = arith.mulf %356, %360 : vector<16x16xf32>
    %362 = arith.truncf %361 : vector<16x16xf32> to vector<16x16xbf16>
    %363 = arith.truncf %347 : vector<16x8xf32> to vector<16x8xbf16>
    %cst_119 = arith.constant dense<0.000000e+00> : vector<16x8xf32>
    %364 = tpu.matmul %362, %363, %cst_119 {dimension_numbers = #tpu.dot_dimension_numbers<[1], [0], [0], [1], [0, 0, 1, 1], [], []>} : vector<16x16xbf16>, vector<16x8xbf16>, vector<16x8xf32> -> vector<16x8xf32>
    %365 = tpu.concatenate %304, %324, %344, %364 in 1 : vector<16x8xf32>, vector<16x8xf32>, vector<16x8xf32>, vector<16x8xf32> -> vector<16x32xf32>
    %c1_120 = arith.constant 1 : index
    %c0_121 = arith.constant 0 : index
    %c0_122 = arith.constant 0 : index
    %366 = vector.load %arg4[%c1_120, %c0_121, %c0_122] : memref<11x64x128xbf16, #tpu.memory_space<vmem>>, vector<1x32x32xbf16>
    %367 = vector.shape_cast %366 : vector<1x32x32xbf16> to vector<32x32xbf16>
    %c1_123 = arith.constant 1 : index
    %c0_124 = arith.constant 0 : index
    %c0_125 = arith.constant 0 : index
    %368 = vector.load %arg5[%c1_123, %c0_124, %c0_125] : memref<16x8x128xf32, #tpu.memory_space<vmem>>, vector<1x1x32xf32>
    %369 = vector.shape_cast %368 : vector<1x1x32xf32> to vector<1x32xf32>
    %370 = arith.truncf %365 : vector<16x32xf32> to vector<16x32xbf16>
    %cst_126 = arith.constant dense<0.000000e+00> : vector<16x32xf32>
    %371 = tpu.matmul %370, %367, %cst_126 {dimension_numbers = #tpu.dot_dimension_numbers<[1], [0], [0], [1], [0, 0, 1, 1], [], []>} : vector<16x32xbf16>, vector<32x32xbf16>, vector<16x32xf32> -> vector<16x32xf32>
    %372 = vector.broadcast %369 : vector<1x32xf32> to vector<16x32xf32>
    %373 = arith.addf %371, %372 : vector<16x32xf32>
    %c2_127 = arith.constant 2 : index
    %c0_128 = arith.constant 0 : index
    %c0_129 = arith.constant 0 : index
    %374 = vector.load %arg5[%c2_127, %c0_128, %c0_129] : memref<16x8x128xf32, #tpu.memory_space<vmem>>, vector<1x1x32xf32>
    %375 = vector.shape_cast %374 : vector<1x1x32xf32> to vector<1x32xf32>
    %c2_130 = arith.constant 2 : index
    %c1_131 = arith.constant 1 : index
    %c0_132 = arith.constant 0 : index
    %376 = vector.load %arg5[%c2_130, %c1_131, %c0_132] : memref<16x8x128xf32, #tpu.memory_space<vmem>>, vector<1x1x32xf32>
    %377 = vector.shape_cast %376 : vector<1x1x32xf32> to vector<1x32xf32>
    %378 = arith.addf %373, %276 : vector<16x32xf32>
    %cst_133 = arith.constant dense<0.000000e+00> : vector<16xf32>
    %379 = vector.multi_reduction <add>, %378, %cst_133 [1] : vector<16x32xf32> to vector<16xf32>
    %380 = vector.shape_cast %379 : vector<16xf32> to vector<16x1xf32>
    %cst_134 = arith.constant 3.200000e+01 : f32
    %381 = vector.broadcast %cst_134 : f32 to vector<16x1xf32>
    %382 = arith.divf %380, %381 : vector<16x1xf32>
    %383 = vector.broadcast %382 : vector<16x1xf32> to vector<16x32xf32>
    %384 = arith.subf %378, %383 : vector<16x32xf32>
    %385 = arith.mulf %384, %384 : vector<16x32xf32>
    %cst_135 = arith.constant dense<0.000000e+00> : vector<16xf32>
    %386 = vector.multi_reduction <add>, %385, %cst_135 [1] : vector<16x32xf32> to vector<16xf32>
    %387 = vector.shape_cast %386 : vector<16xf32> to vector<16x1xf32>
    %cst_136 = arith.constant 3.200000e+01 : f32
    %388 = vector.broadcast %cst_136 : f32 to vector<16x1xf32>
    %389 = arith.divf %387, %388 : vector<16x1xf32>
    %390 = vector.broadcast %382 : vector<16x1xf32> to vector<16x32xf32>
    %391 = arith.subf %378, %390 : vector<16x32xf32>
    %cst_137 = arith.constant 9.99999974E-6 : f32
    %392 = vector.broadcast %cst_137 : f32 to vector<16x1xf32>
    %393 = arith.addf %389, %392 : vector<16x1xf32>
    %394 = math.rsqrt %393 : vector<16x1xf32>
    %395 = vector.broadcast %394 : vector<16x1xf32> to vector<16x32xf32>
    %396 = arith.mulf %391, %395 : vector<16x32xf32>
    %397 = vector.broadcast %375 : vector<1x32xf32> to vector<16x32xf32>
    %398 = arith.mulf %396, %397 : vector<16x32xf32>
    %399 = vector.broadcast %377 : vector<1x32xf32> to vector<16x32xf32>
    %400 = arith.addf %398, %399 : vector<16x32xf32>
    %c2_138 = arith.constant 2 : index
    %c0_139 = arith.constant 0 : index
    %c0_140 = arith.constant 0 : index
    %401 = vector.load %arg4[%c2_138, %c0_139, %c0_140] : memref<11x64x128xbf16, #tpu.memory_space<vmem>>, vector<1x32x64xbf16>
    %402 = vector.shape_cast %401 : vector<1x32x64xbf16> to vector<32x64xbf16>
    %c3_141 = arith.constant 3 : index
    %c0_142 = arith.constant 0 : index
    %c0_143 = arith.constant 0 : index
    %403 = vector.load %arg5[%c3_141, %c0_142, %c0_143] : memref<16x8x128xf32, #tpu.memory_space<vmem>>, vector<1x1x64xf32>
    %404 = vector.shape_cast %403 : vector<1x1x64xf32> to vector<1x64xf32>
    %c3_144 = arith.constant 3 : index
    %c0_145 = arith.constant 0 : index
    %c0_146 = arith.constant 0 : index
    %405 = vector.load %arg4[%c3_144, %c0_145, %c0_146] : memref<11x64x128xbf16, #tpu.memory_space<vmem>>, vector<1x64x32xbf16>
    %406 = vector.shape_cast %405 : vector<1x64x32xbf16> to vector<64x32xbf16>
    %c4_147 = arith.constant 4 : index
    %c0_148 = arith.constant 0 : index
    %c0_149 = arith.constant 0 : index
    %407 = vector.load %arg5[%c4_147, %c0_148, %c0_149] : memref<16x8x128xf32, #tpu.memory_space<vmem>>, vector<1x1x32xf32>
    %408 = vector.shape_cast %407 : vector<1x1x32xf32> to vector<1x32xf32>
    %409 = arith.truncf %400 : vector<16x32xf32> to vector<16x32xbf16>
    %cst_150 = arith.constant dense<0.000000e+00> : vector<16x64xf32>
    %410 = tpu.matmul %409, %402, %cst_150 {dimension_numbers = #tpu.dot_dimension_numbers<[1], [0], [0], [1], [0, 0, 1, 1], [], []>} : vector<16x32xbf16>, vector<32x64xbf16>, vector<16x64xf32> -> vector<16x64xf32>
    %411 = vector.broadcast %404 : vector<1x64xf32> to vector<16x64xf32>
    %412 = arith.addf %410, %411 : vector<16x64xf32>
    %cst_151 = arith.constant 0.000000e+00 : f32
    %413 = vector.broadcast %cst_151 : f32 to vector<16x64xf32>
    %414 = arith.maximumf %412, %413 : vector<16x64xf32>
    %415 = arith.truncf %414 : vector<16x64xf32> to vector<16x64xbf16>
    %cst_152 = arith.constant dense<0.000000e+00> : vector<16x32xf32>
    %416 = tpu.matmul %415, %406, %cst_152 {dimension_numbers = #tpu.dot_dimension_numbers<[1], [0], [0], [1], [0, 0, 1, 1], [], []>} : vector<16x64xbf16>, vector<64x32xbf16>, vector<16x32xf32> -> vector<16x32xf32>
    %417 = vector.broadcast %408 : vector<1x32xf32> to vector<16x32xf32>
    %418 = arith.addf %416, %417 : vector<16x32xf32>
    %c5_153 = arith.constant 5 : index
    %c0_154 = arith.constant 0 : index
    %c0_155 = arith.constant 0 : index
    %419 = vector.load %arg5[%c5_153, %c0_154, %c0_155] : memref<16x8x128xf32, #tpu.memory_space<vmem>>, vector<1x1x32xf32>
    %420 = vector.shape_cast %419 : vector<1x1x32xf32> to vector<1x32xf32>
    %c5_156 = arith.constant 5 : index
    %c1_157 = arith.constant 1 : index
    %c0_158 = arith.constant 0 : index
    %421 = vector.load %arg5[%c5_156, %c1_157, %c0_158] : memref<16x8x128xf32, #tpu.memory_space<vmem>>, vector<1x1x32xf32>
    %422 = vector.shape_cast %421 : vector<1x1x32xf32> to vector<1x32xf32>
    %423 = arith.addf %418, %400 : vector<16x32xf32>
    %cst_159 = arith.constant dense<0.000000e+00> : vector<16xf32>
    %424 = vector.multi_reduction <add>, %423, %cst_159 [1] : vector<16x32xf32> to vector<16xf32>
    %425 = vector.shape_cast %424 : vector<16xf32> to vector<16x1xf32>
    %cst_160 = arith.constant 3.200000e+01 : f32
    %426 = vector.broadcast %cst_160 : f32 to vector<16x1xf32>
    %427 = arith.divf %425, %426 : vector<16x1xf32>
    %428 = vector.broadcast %427 : vector<16x1xf32> to vector<16x32xf32>
    %429 = arith.subf %423, %428 : vector<16x32xf32>
    %430 = arith.mulf %429, %429 : vector<16x32xf32>
    %cst_161 = arith.constant dense<0.000000e+00> : vector<16xf32>
    %431 = vector.multi_reduction <add>, %430, %cst_161 [1] : vector<16x32xf32> to vector<16xf32>
    %432 = vector.shape_cast %431 : vector<16xf32> to vector<16x1xf32>
    %cst_162 = arith.constant 3.200000e+01 : f32
    %433 = vector.broadcast %cst_162 : f32 to vector<16x1xf32>
    %434 = arith.divf %432, %433 : vector<16x1xf32>
    %435 = vector.broadcast %427 : vector<16x1xf32> to vector<16x32xf32>
    %436 = arith.subf %423, %435 : vector<16x32xf32>
    %cst_163 = arith.constant 9.99999974E-6 : f32
    %437 = vector.broadcast %cst_163 : f32 to vector<16x1xf32>
    %438 = arith.addf %434, %437 : vector<16x1xf32>
    %439 = math.rsqrt %438 : vector<16x1xf32>
    %440 = vector.broadcast %439 : vector<16x1xf32> to vector<16x32xf32>
    %441 = arith.mulf %436, %440 : vector<16x32xf32>
    %442 = vector.broadcast %420 : vector<1x32xf32> to vector<16x32xf32>
    %443 = arith.mulf %441, %442 : vector<16x32xf32>
    %444 = vector.broadcast %422 : vector<1x32xf32> to vector<16x32xf32>
    %445 = arith.addf %443, %444 : vector<16x32xf32>
    %c0_164 = arith.constant 0 : index
    %c0_165 = arith.constant 0 : index
    %446 = vector.load %arg1[%c0_164, %c0_165] : memref<16x32xf32, #tpu.memory_space<vmem>>, vector<16x32xf32>
    %c4_166 = arith.constant 4 : index
    %c0_167 = arith.constant 0 : index
    %c0_168 = arith.constant 0 : index
    %447 = vector.load %arg4[%c4_166, %c0_167, %c0_168] : memref<11x64x128xbf16, #tpu.memory_space<vmem>>, vector<1x32x96xbf16>
    %448 = vector.shape_cast %447 : vector<1x32x96xbf16> to vector<32x96xbf16>
    %c6 = arith.constant 6 : index
    %c0_169 = arith.constant 0 : index
    %c0_170 = arith.constant 0 : index
    %449 = vector.load %arg5[%c6, %c0_169, %c0_170] : memref<16x8x128xf32, #tpu.memory_space<vmem>>, vector<1x1x96xf32>
    %450 = vector.shape_cast %449 : vector<1x1x96xf32> to vector<1x96xf32>
    %451 = arith.truncf %446 : vector<16x32xf32> to vector<16x32xbf16>
    %cst_171 = arith.constant dense<0.000000e+00> : vector<16x96xf32>
    %452 = tpu.matmul %451, %448, %cst_171 {dimension_numbers = #tpu.dot_dimension_numbers<[1], [0], [0], [1], [0, 0, 1, 1], [], []>} : vector<16x32xbf16>, vector<32x96xbf16>, vector<16x96xf32> -> vector<16x96xf32>
    %453 = vector.broadcast %450 : vector<1x96xf32> to vector<16x96xf32>
    %454 = arith.addf %452, %453 : vector<16x96xf32>
    %455 = vector.extract_strided_slice %454 {offsets = [0, 0], sizes = [16, 8], strides = [1, 1]} : vector<16x96xf32> to vector<16x8xf32>
    %456 = vector.extract_strided_slice %454 {offsets = [0, 32], sizes = [16, 8], strides = [1, 1]} : vector<16x96xf32> to vector<16x8xf32>
    %457 = vector.extract_strided_slice %454 {offsets = [0, 64], sizes = [16, 8], strides = [1, 1]} : vector<16x96xf32> to vector<16x8xf32>
    %458 = arith.truncf %455 : vector<16x8xf32> to vector<16x8xbf16>
    %459 = arith.truncf %456 : vector<16x8xf32> to vector<16x8xbf16>
    %cst_172 = arith.constant dense<0.000000e+00> : vector<16x16xf32>
    %460 = tpu.matmul %458, %459, %cst_172 {dimension_numbers = #tpu.dot_dimension_numbers<[1], [1], [0], [0], [0, 0, 1, 0], [], []>} : vector<16x8xbf16>, vector<16x8xbf16>, vector<16x16xf32> -> vector<16x16xf32>
    %461 = arith.addf %460, %73 : vector<16x16xf32>
    %cst_173 = arith.constant dense<0xFF800000> : vector<16xf32>
    %462 = vector.multi_reduction <maximumf>, %461, %cst_173 [1] : vector<16x16xf32> to vector<16xf32>
    %463 = vector.shape_cast %462 : vector<16xf32> to vector<16x1xf32>
    %464 = vector.broadcast %463 : vector<16x1xf32> to vector<16x16xf32>
    %465 = arith.subf %461, %464 : vector<16x16xf32>
    %466 = math.exp %465 : vector<16x16xf32>
    %cst_174 = arith.constant dense<0.000000e+00> : vector<16xf32>
    %467 = vector.multi_reduction <add>, %466, %cst_174 [1] : vector<16x16xf32> to vector<16xf32>
    %468 = vector.shape_cast %467 : vector<16xf32> to vector<16x1xf32>
    %469 = tpu.reciprocal %468 {approx = true} : vector<16x1xf32> -> vector<16x1xf32>
    %470 = vector.broadcast %469 : vector<16x1xf32> to vector<16x16xf32>
    %471 = arith.mulf %466, %470 : vector<16x16xf32>
    %472 = arith.truncf %471 : vector<16x16xf32> to vector<16x16xbf16>
    %473 = arith.truncf %457 : vector<16x8xf32> to vector<16x8xbf16>
    %cst_175 = arith.constant dense<0.000000e+00> : vector<16x8xf32>
    %474 = tpu.matmul %472, %473, %cst_175 {dimension_numbers = #tpu.dot_dimension_numbers<[1], [0], [0], [1], [0, 0, 1, 1], [], []>} : vector<16x16xbf16>, vector<16x8xbf16>, vector<16x8xf32> -> vector<16x8xf32>
    %475 = vector.extract_strided_slice %454 {offsets = [0, 8], sizes = [16, 8], strides = [1, 1]} : vector<16x96xf32> to vector<16x8xf32>
    %476 = vector.extract_strided_slice %454 {offsets = [0, 40], sizes = [16, 8], strides = [1, 1]} : vector<16x96xf32> to vector<16x8xf32>
    %477 = vector.extract_strided_slice %454 {offsets = [0, 72], sizes = [16, 8], strides = [1, 1]} : vector<16x96xf32> to vector<16x8xf32>
    %478 = arith.truncf %475 : vector<16x8xf32> to vector<16x8xbf16>
    %479 = arith.truncf %476 : vector<16x8xf32> to vector<16x8xbf16>
    %cst_176 = arith.constant dense<0.000000e+00> : vector<16x16xf32>
    %480 = tpu.matmul %478, %479, %cst_176 {dimension_numbers = #tpu.dot_dimension_numbers<[1], [1], [0], [0], [0, 0, 1, 0], [], []>} : vector<16x8xbf16>, vector<16x8xbf16>, vector<16x16xf32> -> vector<16x16xf32>
    %481 = arith.addf %480, %73 : vector<16x16xf32>
    %cst_177 = arith.constant dense<0xFF800000> : vector<16xf32>
    %482 = vector.multi_reduction <maximumf>, %481, %cst_177 [1] : vector<16x16xf32> to vector<16xf32>
    %483 = vector.shape_cast %482 : vector<16xf32> to vector<16x1xf32>
    %484 = vector.broadcast %483 : vector<16x1xf32> to vector<16x16xf32>
    %485 = arith.subf %481, %484 : vector<16x16xf32>
    %486 = math.exp %485 : vector<16x16xf32>
    %cst_178 = arith.constant dense<0.000000e+00> : vector<16xf32>
    %487 = vector.multi_reduction <add>, %486, %cst_178 [1] : vector<16x16xf32> to vector<16xf32>
    %488 = vector.shape_cast %487 : vector<16xf32> to vector<16x1xf32>
    %489 = tpu.reciprocal %488 {approx = true} : vector<16x1xf32> -> vector<16x1xf32>
    %490 = vector.broadcast %489 : vector<16x1xf32> to vector<16x16xf32>
    %491 = arith.mulf %486, %490 : vector<16x16xf32>
    %492 = arith.truncf %491 : vector<16x16xf32> to vector<16x16xbf16>
    %493 = arith.truncf %477 : vector<16x8xf32> to vector<16x8xbf16>
    %cst_179 = arith.constant dense<0.000000e+00> : vector<16x8xf32>
    %494 = tpu.matmul %492, %493, %cst_179 {dimension_numbers = #tpu.dot_dimension_numbers<[1], [0], [0], [1], [0, 0, 1, 1], [], []>} : vector<16x16xbf16>, vector<16x8xbf16>, vector<16x8xf32> -> vector<16x8xf32>
    %495 = vector.extract_strided_slice %454 {offsets = [0, 16], sizes = [16, 8], strides = [1, 1]} : vector<16x96xf32> to vector<16x8xf32>
    %496 = vector.extract_strided_slice %454 {offsets = [0, 48], sizes = [16, 8], strides = [1, 1]} : vector<16x96xf32> to vector<16x8xf32>
    %497 = vector.extract_strided_slice %454 {offsets = [0, 80], sizes = [16, 8], strides = [1, 1]} : vector<16x96xf32> to vector<16x8xf32>
    %498 = arith.truncf %495 : vector<16x8xf32> to vector<16x8xbf16>
    %499 = arith.truncf %496 : vector<16x8xf32> to vector<16x8xbf16>
    %cst_180 = arith.constant dense<0.000000e+00> : vector<16x16xf32>
    %500 = tpu.matmul %498, %499, %cst_180 {dimension_numbers = #tpu.dot_dimension_numbers<[1], [1], [0], [0], [0, 0, 1, 0], [], []>} : vector<16x8xbf16>, vector<16x8xbf16>, vector<16x16xf32> -> vector<16x16xf32>
    %501 = arith.addf %500, %73 : vector<16x16xf32>
    %cst_181 = arith.constant dense<0xFF800000> : vector<16xf32>
    %502 = vector.multi_reduction <maximumf>, %501, %cst_181 [1] : vector<16x16xf32> to vector<16xf32>
    %503 = vector.shape_cast %502 : vector<16xf32> to vector<16x1xf32>
    %504 = vector.broadcast %503 : vector<16x1xf32> to vector<16x16xf32>
    %505 = arith.subf %501, %504 : vector<16x16xf32>
    %506 = math.exp %505 : vector<16x16xf32>
    %cst_182 = arith.constant dense<0.000000e+00> : vector<16xf32>
    %507 = vector.multi_reduction <add>, %506, %cst_182 [1] : vector<16x16xf32> to vector<16xf32>
    %508 = vector.shape_cast %507 : vector<16xf32> to vector<16x1xf32>
    %509 = tpu.reciprocal %508 {approx = true} : vector<16x1xf32> -> vector<16x1xf32>
    %510 = vector.broadcast %509 : vector<16x1xf32> to vector<16x16xf32>
    %511 = arith.mulf %506, %510 : vector<16x16xf32>
    %512 = arith.truncf %511 : vector<16x16xf32> to vector<16x16xbf16>
    %513 = arith.truncf %497 : vector<16x8xf32> to vector<16x8xbf16>
    %cst_183 = arith.constant dense<0.000000e+00> : vector<16x8xf32>
    %514 = tpu.matmul %512, %513, %cst_183 {dimension_numbers = #tpu.dot_dimension_numbers<[1], [0], [0], [1], [0, 0, 1, 1], [], []>} : vector<16x16xbf16>, vector<16x8xbf16>, vector<16x8xf32> -> vector<16x8xf32>
    %515 = vector.extract_strided_slice %454 {offsets = [0, 24], sizes = [16, 8], strides = [1, 1]} : vector<16x96xf32> to vector<16x8xf32>
    %516 = vector.extract_strided_slice %454 {offsets = [0, 56], sizes = [16, 8], strides = [1, 1]} : vector<16x96xf32> to vector<16x8xf32>
    %517 = vector.extract_strided_slice %454 {offsets = [0, 88], sizes = [16, 8], strides = [1, 1]} : vector<16x96xf32> to vector<16x8xf32>
    %518 = arith.truncf %515 : vector<16x8xf32> to vector<16x8xbf16>
    %519 = arith.truncf %516 : vector<16x8xf32> to vector<16x8xbf16>
    %cst_184 = arith.constant dense<0.000000e+00> : vector<16x16xf32>
    %520 = tpu.matmul %518, %519, %cst_184 {dimension_numbers = #tpu.dot_dimension_numbers<[1], [1], [0], [0], [0, 0, 1, 0], [], []>} : vector<16x8xbf16>, vector<16x8xbf16>, vector<16x16xf32> -> vector<16x16xf32>
    %521 = arith.addf %520, %73 : vector<16x16xf32>
    %cst_185 = arith.constant dense<0xFF800000> : vector<16xf32>
    %522 = vector.multi_reduction <maximumf>, %521, %cst_185 [1] : vector<16x16xf32> to vector<16xf32>
    %523 = vector.shape_cast %522 : vector<16xf32> to vector<16x1xf32>
    %524 = vector.broadcast %523 : vector<16x1xf32> to vector<16x16xf32>
    %525 = arith.subf %521, %524 : vector<16x16xf32>
    %526 = math.exp %525 : vector<16x16xf32>
    %cst_186 = arith.constant dense<0.000000e+00> : vector<16xf32>
    %527 = vector.multi_reduction <add>, %526, %cst_186 [1] : vector<16x16xf32> to vector<16xf32>
    %528 = vector.shape_cast %527 : vector<16xf32> to vector<16x1xf32>
    %529 = tpu.reciprocal %528 {approx = true} : vector<16x1xf32> -> vector<16x1xf32>
    %530 = vector.broadcast %529 : vector<16x1xf32> to vector<16x16xf32>
    %531 = arith.mulf %526, %530 : vector<16x16xf32>
    %532 = arith.truncf %531 : vector<16x16xf32> to vector<16x16xbf16>
    %533 = arith.truncf %517 : vector<16x8xf32> to vector<16x8xbf16>
    %cst_187 = arith.constant dense<0.000000e+00> : vector<16x8xf32>
    %534 = tpu.matmul %532, %533, %cst_187 {dimension_numbers = #tpu.dot_dimension_numbers<[1], [0], [0], [1], [0, 0, 1, 1], [], []>} : vector<16x16xbf16>, vector<16x8xbf16>, vector<16x8xf32> -> vector<16x8xf32>
    %535 = tpu.concatenate %474, %494, %514, %534 in 1 : vector<16x8xf32>, vector<16x8xf32>, vector<16x8xf32>, vector<16x8xf32> -> vector<16x32xf32>
    %c5_188 = arith.constant 5 : index
    %c0_189 = arith.constant 0 : index
    %c0_190 = arith.constant 0 : index
    %536 = vector.load %arg4[%c5_188, %c0_189, %c0_190] : memref<11x64x128xbf16, #tpu.memory_space<vmem>>, vector<1x32x32xbf16>
    %537 = vector.shape_cast %536 : vector<1x32x32xbf16> to vector<32x32xbf16>
    %c7 = arith.constant 7 : index
    %c0_191 = arith.constant 0 : index
    %c0_192 = arith.constant 0 : index
    %538 = vector.load %arg5[%c7, %c0_191, %c0_192] : memref<16x8x128xf32, #tpu.memory_space<vmem>>, vector<1x1x32xf32>
    %539 = vector.shape_cast %538 : vector<1x1x32xf32> to vector<1x32xf32>
    %540 = arith.truncf %535 : vector<16x32xf32> to vector<16x32xbf16>
    %cst_193 = arith.constant dense<0.000000e+00> : vector<16x32xf32>
    %541 = tpu.matmul %540, %537, %cst_193 {dimension_numbers = #tpu.dot_dimension_numbers<[1], [0], [0], [1], [0, 0, 1, 1], [], []>} : vector<16x32xbf16>, vector<32x32xbf16>, vector<16x32xf32> -> vector<16x32xf32>
    %542 = vector.broadcast %539 : vector<1x32xf32> to vector<16x32xf32>
    %543 = arith.addf %541, %542 : vector<16x32xf32>
    %c8 = arith.constant 8 : index
    %c0_194 = arith.constant 0 : index
    %c0_195 = arith.constant 0 : index
    %544 = vector.load %arg5[%c8, %c0_194, %c0_195] : memref<16x8x128xf32, #tpu.memory_space<vmem>>, vector<1x1x32xf32>
    %545 = vector.shape_cast %544 : vector<1x1x32xf32> to vector<1x32xf32>
    %c8_196 = arith.constant 8 : index
    %c1_197 = arith.constant 1 : index
    %c0_198 = arith.constant 0 : index
    %546 = vector.load %arg5[%c8_196, %c1_197, %c0_198] : memref<16x8x128xf32, #tpu.memory_space<vmem>>, vector<1x1x32xf32>
    %547 = vector.shape_cast %546 : vector<1x1x32xf32> to vector<1x32xf32>
    %548 = arith.addf %543, %446 : vector<16x32xf32>
    %cst_199 = arith.constant dense<0.000000e+00> : vector<16xf32>
    %549 = vector.multi_reduction <add>, %548, %cst_199 [1] : vector<16x32xf32> to vector<16xf32>
    %550 = vector.shape_cast %549 : vector<16xf32> to vector<16x1xf32>
    %cst_200 = arith.constant 3.200000e+01 : f32
    %551 = vector.broadcast %cst_200 : f32 to vector<16x1xf32>
    %552 = arith.divf %550, %551 : vector<16x1xf32>
    %553 = vector.broadcast %552 : vector<16x1xf32> to vector<16x32xf32>
    %554 = arith.subf %548, %553 : vector<16x32xf32>
    %555 = arith.mulf %554, %554 : vector<16x32xf32>
    %cst_201 = arith.constant dense<0.000000e+00> : vector<16xf32>
    %556 = vector.multi_reduction <add>, %555, %cst_201 [1] : vector<16x32xf32> to vector<16xf32>
    %557 = vector.shape_cast %556 : vector<16xf32> to vector<16x1xf32>
    %cst_202 = arith.constant 3.200000e+01 : f32
    %558 = vector.broadcast %cst_202 : f32 to vector<16x1xf32>
    %559 = arith.divf %557, %558 : vector<16x1xf32>
    %560 = vector.broadcast %552 : vector<16x1xf32> to vector<16x32xf32>
    %561 = arith.subf %548, %560 : vector<16x32xf32>
    %cst_203 = arith.constant 9.99999974E-6 : f32
    %562 = vector.broadcast %cst_203 : f32 to vector<16x1xf32>
    %563 = arith.addf %559, %562 : vector<16x1xf32>
    %564 = math.rsqrt %563 : vector<16x1xf32>
    %565 = vector.broadcast %564 : vector<16x1xf32> to vector<16x32xf32>
    %566 = arith.mulf %561, %565 : vector<16x32xf32>
    %567 = vector.broadcast %545 : vector<1x32xf32> to vector<16x32xf32>
    %568 = arith.mulf %566, %567 : vector<16x32xf32>
    %569 = vector.broadcast %547 : vector<1x32xf32> to vector<16x32xf32>
    %570 = arith.addf %568, %569 : vector<16x32xf32>
    %c6_204 = arith.constant 6 : index
    %c0_205 = arith.constant 0 : index
    %c0_206 = arith.constant 0 : index
    %571 = vector.load %arg4[%c6_204, %c0_205, %c0_206] : memref<11x64x128xbf16, #tpu.memory_space<vmem>>, vector<1x32x96xbf16>
    %572 = vector.shape_cast %571 : vector<1x32x96xbf16> to vector<32x96xbf16>
    %c9 = arith.constant 9 : index
    %c0_207 = arith.constant 0 : index
    %c0_208 = arith.constant 0 : index
    %573 = vector.load %arg5[%c9, %c0_207, %c0_208] : memref<16x8x128xf32, #tpu.memory_space<vmem>>, vector<1x1x96xf32>
    %574 = vector.shape_cast %573 : vector<1x1x96xf32> to vector<1x96xf32>
    %575 = arith.truncf %570 : vector<16x32xf32> to vector<16x32xbf16>
    %cst_209 = arith.constant dense<0.000000e+00> : vector<16x96xf32>
    %576 = tpu.matmul %575, %572, %cst_209 {dimension_numbers = #tpu.dot_dimension_numbers<[1], [0], [0], [1], [0, 0, 1, 1], [], []>} : vector<16x32xbf16>, vector<32x96xbf16>, vector<16x96xf32> -> vector<16x96xf32>
    %577 = vector.broadcast %574 : vector<1x96xf32> to vector<16x96xf32>
    %578 = arith.addf %576, %577 : vector<16x96xf32>
    %579 = arith.truncf %445 : vector<16x32xf32> to vector<16x32xbf16>
    %cst_210 = arith.constant dense<0.000000e+00> : vector<16x96xf32>
    %580 = tpu.matmul %579, %572, %cst_210 {dimension_numbers = #tpu.dot_dimension_numbers<[1], [0], [0], [1], [0, 0, 1, 1], [], []>} : vector<16x32xbf16>, vector<32x96xbf16>, vector<16x96xf32> -> vector<16x96xf32>
    %581 = vector.broadcast %574 : vector<1x96xf32> to vector<16x96xf32>
    %582 = arith.addf %580, %581 : vector<16x96xf32>
    %583 = vector.extract_strided_slice %578 {offsets = [0, 0], sizes = [16, 8], strides = [1, 1]} : vector<16x96xf32> to vector<16x8xf32>
    %584 = vector.extract_strided_slice %582 {offsets = [0, 32], sizes = [16, 8], strides = [1, 1]} : vector<16x96xf32> to vector<16x8xf32>
    %585 = vector.extract_strided_slice %582 {offsets = [0, 64], sizes = [16, 8], strides = [1, 1]} : vector<16x96xf32> to vector<16x8xf32>
    %586 = arith.truncf %583 : vector<16x8xf32> to vector<16x8xbf16>
    %587 = arith.truncf %584 : vector<16x8xf32> to vector<16x8xbf16>
    %cst_211 = arith.constant dense<0.000000e+00> : vector<16x16xf32>
    %588 = tpu.matmul %586, %587, %cst_211 {dimension_numbers = #tpu.dot_dimension_numbers<[1], [1], [0], [0], [0, 0, 1, 0], [], []>} : vector<16x8xbf16>, vector<16x8xbf16>, vector<16x16xf32> -> vector<16x16xf32>
    %589 = arith.addf %588, %106 : vector<16x16xf32>
    %cst_212 = arith.constant dense<0xFF800000> : vector<16xf32>
    %590 = vector.multi_reduction <maximumf>, %589, %cst_212 [1] : vector<16x16xf32> to vector<16xf32>
    %591 = vector.shape_cast %590 : vector<16xf32> to vector<16x1xf32>
    %592 = vector.broadcast %591 : vector<16x1xf32> to vector<16x16xf32>
    %593 = arith.subf %589, %592 : vector<16x16xf32>
    %594 = math.exp %593 : vector<16x16xf32>
    %cst_213 = arith.constant dense<0.000000e+00> : vector<16xf32>
    %595 = vector.multi_reduction <add>, %594, %cst_213 [1] : vector<16x16xf32> to vector<16xf32>
    %596 = vector.shape_cast %595 : vector<16xf32> to vector<16x1xf32>
    %597 = tpu.reciprocal %596 {approx = true} : vector<16x1xf32> -> vector<16x1xf32>
    %598 = vector.broadcast %597 : vector<16x1xf32> to vector<16x16xf32>
    %599 = arith.mulf %594, %598 : vector<16x16xf32>
    %600 = arith.truncf %599 : vector<16x16xf32> to vector<16x16xbf16>
    %601 = arith.truncf %585 : vector<16x8xf32> to vector<16x8xbf16>
    %cst_214 = arith.constant dense<0.000000e+00> : vector<16x8xf32>
    %602 = tpu.matmul %600, %601, %cst_214 {dimension_numbers = #tpu.dot_dimension_numbers<[1], [0], [0], [1], [0, 0, 1, 1], [], []>} : vector<16x16xbf16>, vector<16x8xbf16>, vector<16x8xf32> -> vector<16x8xf32>
    %603 = vector.extract_strided_slice %578 {offsets = [0, 8], sizes = [16, 8], strides = [1, 1]} : vector<16x96xf32> to vector<16x8xf32>
    %604 = vector.extract_strided_slice %582 {offsets = [0, 40], sizes = [16, 8], strides = [1, 1]} : vector<16x96xf32> to vector<16x8xf32>
    %605 = vector.extract_strided_slice %582 {offsets = [0, 72], sizes = [16, 8], strides = [1, 1]} : vector<16x96xf32> to vector<16x8xf32>
    %606 = arith.truncf %603 : vector<16x8xf32> to vector<16x8xbf16>
    %607 = arith.truncf %604 : vector<16x8xf32> to vector<16x8xbf16>
    %cst_215 = arith.constant dense<0.000000e+00> : vector<16x16xf32>
    %608 = tpu.matmul %606, %607, %cst_215 {dimension_numbers = #tpu.dot_dimension_numbers<[1], [1], [0], [0], [0, 0, 1, 0], [], []>} : vector<16x8xbf16>, vector<16x8xbf16>, vector<16x16xf32> -> vector<16x16xf32>
    %609 = arith.addf %608, %106 : vector<16x16xf32>
    %cst_216 = arith.constant dense<0xFF800000> : vector<16xf32>
    %610 = vector.multi_reduction <maximumf>, %609, %cst_216 [1] : vector<16x16xf32> to vector<16xf32>
    %611 = vector.shape_cast %610 : vector<16xf32> to vector<16x1xf32>
    %612 = vector.broadcast %611 : vector<16x1xf32> to vector<16x16xf32>
    %613 = arith.subf %609, %612 : vector<16x16xf32>
    %614 = math.exp %613 : vector<16x16xf32>
    %cst_217 = arith.constant dense<0.000000e+00> : vector<16xf32>
    %615 = vector.multi_reduction <add>, %614, %cst_217 [1] : vector<16x16xf32> to vector<16xf32>
    %616 = vector.shape_cast %615 : vector<16xf32> to vector<16x1xf32>
    %617 = tpu.reciprocal %616 {approx = true} : vector<16x1xf32> -> vector<16x1xf32>
    %618 = vector.broadcast %617 : vector<16x1xf32> to vector<16x16xf32>
    %619 = arith.mulf %614, %618 : vector<16x16xf32>
    %620 = arith.truncf %619 : vector<16x16xf32> to vector<16x16xbf16>
    %621 = arith.truncf %605 : vector<16x8xf32> to vector<16x8xbf16>
    %cst_218 = arith.constant dense<0.000000e+00> : vector<16x8xf32>
    %622 = tpu.matmul %620, %621, %cst_218 {dimension_numbers = #tpu.dot_dimension_numbers<[1], [0], [0], [1], [0, 0, 1, 1], [], []>} : vector<16x16xbf16>, vector<16x8xbf16>, vector<16x8xf32> -> vector<16x8xf32>
    %623 = vector.extract_strided_slice %578 {offsets = [0, 16], sizes = [16, 8], strides = [1, 1]} : vector<16x96xf32> to vector<16x8xf32>
    %624 = vector.extract_strided_slice %582 {offsets = [0, 48], sizes = [16, 8], strides = [1, 1]} : vector<16x96xf32> to vector<16x8xf32>
    %625 = vector.extract_strided_slice %582 {offsets = [0, 80], sizes = [16, 8], strides = [1, 1]} : vector<16x96xf32> to vector<16x8xf32>
    %626 = arith.truncf %623 : vector<16x8xf32> to vector<16x8xbf16>
    %627 = arith.truncf %624 : vector<16x8xf32> to vector<16x8xbf16>
    %cst_219 = arith.constant dense<0.000000e+00> : vector<16x16xf32>
    %628 = tpu.matmul %626, %627, %cst_219 {dimension_numbers = #tpu.dot_dimension_numbers<[1], [1], [0], [0], [0, 0, 1, 0], [], []>} : vector<16x8xbf16>, vector<16x8xbf16>, vector<16x16xf32> -> vector<16x16xf32>
    %629 = arith.addf %628, %106 : vector<16x16xf32>
    %cst_220 = arith.constant dense<0xFF800000> : vector<16xf32>
    %630 = vector.multi_reduction <maximumf>, %629, %cst_220 [1] : vector<16x16xf32> to vector<16xf32>
    %631 = vector.shape_cast %630 : vector<16xf32> to vector<16x1xf32>
    %632 = vector.broadcast %631 : vector<16x1xf32> to vector<16x16xf32>
    %633 = arith.subf %629, %632 : vector<16x16xf32>
    %634 = math.exp %633 : vector<16x16xf32>
    %cst_221 = arith.constant dense<0.000000e+00> : vector<16xf32>
    %635 = vector.multi_reduction <add>, %634, %cst_221 [1] : vector<16x16xf32> to vector<16xf32>
    %636 = vector.shape_cast %635 : vector<16xf32> to vector<16x1xf32>
    %637 = tpu.reciprocal %636 {approx = true} : vector<16x1xf32> -> vector<16x1xf32>
    %638 = vector.broadcast %637 : vector<16x1xf32> to vector<16x16xf32>
    %639 = arith.mulf %634, %638 : vector<16x16xf32>
    %640 = arith.truncf %639 : vector<16x16xf32> to vector<16x16xbf16>
    %641 = arith.truncf %625 : vector<16x8xf32> to vector<16x8xbf16>
    %cst_222 = arith.constant dense<0.000000e+00> : vector<16x8xf32>
    %642 = tpu.matmul %640, %641, %cst_222 {dimension_numbers = #tpu.dot_dimension_numbers<[1], [0], [0], [1], [0, 0, 1, 1], [], []>} : vector<16x16xbf16>, vector<16x8xbf16>, vector<16x8xf32> -> vector<16x8xf32>
    %643 = vector.extract_strided_slice %578 {offsets = [0, 24], sizes = [16, 8], strides = [1, 1]} : vector<16x96xf32> to vector<16x8xf32>
    %644 = vector.extract_strided_slice %582 {offsets = [0, 56], sizes = [16, 8], strides = [1, 1]} : vector<16x96xf32> to vector<16x8xf32>
    %645 = vector.extract_strided_slice %582 {offsets = [0, 88], sizes = [16, 8], strides = [1, 1]} : vector<16x96xf32> to vector<16x8xf32>
    %646 = arith.truncf %643 : vector<16x8xf32> to vector<16x8xbf16>
    %647 = arith.truncf %644 : vector<16x8xf32> to vector<16x8xbf16>
    %cst_223 = arith.constant dense<0.000000e+00> : vector<16x16xf32>
    %648 = tpu.matmul %646, %647, %cst_223 {dimension_numbers = #tpu.dot_dimension_numbers<[1], [1], [0], [0], [0, 0, 1, 0], [], []>} : vector<16x8xbf16>, vector<16x8xbf16>, vector<16x16xf32> -> vector<16x16xf32>
    %649 = arith.addf %648, %106 : vector<16x16xf32>
    %cst_224 = arith.constant dense<0xFF800000> : vector<16xf32>
    %650 = vector.multi_reduction <maximumf>, %649, %cst_224 [1] : vector<16x16xf32> to vector<16xf32>
    %651 = vector.shape_cast %650 : vector<16xf32> to vector<16x1xf32>
    %652 = vector.broadcast %651 : vector<16x1xf32> to vector<16x16xf32>
    %653 = arith.subf %649, %652 : vector<16x16xf32>
    %654 = math.exp %653 : vector<16x16xf32>
    %cst_225 = arith.constant dense<0.000000e+00> : vector<16xf32>
    %655 = vector.multi_reduction <add>, %654, %cst_225 [1] : vector<16x16xf32> to vector<16xf32>
    %656 = vector.shape_cast %655 : vector<16xf32> to vector<16x1xf32>
    %657 = tpu.reciprocal %656 {approx = true} : vector<16x1xf32> -> vector<16x1xf32>
    %658 = vector.broadcast %657 : vector<16x1xf32> to vector<16x16xf32>
    %659 = arith.mulf %654, %658 : vector<16x16xf32>
    %660 = arith.truncf %659 : vector<16x16xf32> to vector<16x16xbf16>
    %661 = arith.truncf %645 : vector<16x8xf32> to vector<16x8xbf16>
    %cst_226 = arith.constant dense<0.000000e+00> : vector<16x8xf32>
    %662 = tpu.matmul %660, %661, %cst_226 {dimension_numbers = #tpu.dot_dimension_numbers<[1], [0], [0], [1], [0, 0, 1, 1], [], []>} : vector<16x16xbf16>, vector<16x8xbf16>, vector<16x8xf32> -> vector<16x8xf32>
    %663 = tpu.concatenate %602, %622, %642, %662 in 1 : vector<16x8xf32>, vector<16x8xf32>, vector<16x8xf32>, vector<16x8xf32> -> vector<16x32xf32>
    %c7_227 = arith.constant 7 : index
    %c0_228 = arith.constant 0 : index
    %c0_229 = arith.constant 0 : index
    %664 = vector.load %arg4[%c7_227, %c0_228, %c0_229] : memref<11x64x128xbf16, #tpu.memory_space<vmem>>, vector<1x32x32xbf16>
    %665 = vector.shape_cast %664 : vector<1x32x32xbf16> to vector<32x32xbf16>
    %c10 = arith.constant 10 : index
    %c0_230 = arith.constant 0 : index
    %c0_231 = arith.constant 0 : index
    %666 = vector.load %arg5[%c10, %c0_230, %c0_231] : memref<16x8x128xf32, #tpu.memory_space<vmem>>, vector<1x1x32xf32>
    %667 = vector.shape_cast %666 : vector<1x1x32xf32> to vector<1x32xf32>
    %668 = arith.truncf %663 : vector<16x32xf32> to vector<16x32xbf16>
    %cst_232 = arith.constant dense<0.000000e+00> : vector<16x32xf32>
    %669 = tpu.matmul %668, %665, %cst_232 {dimension_numbers = #tpu.dot_dimension_numbers<[1], [0], [0], [1], [0, 0, 1, 1], [], []>} : vector<16x32xbf16>, vector<32x32xbf16>, vector<16x32xf32> -> vector<16x32xf32>
    %670 = vector.broadcast %667 : vector<1x32xf32> to vector<16x32xf32>
    %671 = arith.addf %669, %670 : vector<16x32xf32>
    %c11 = arith.constant 11 : index
    %c0_233 = arith.constant 0 : index
    %c0_234 = arith.constant 0 : index
    %672 = vector.load %arg5[%c11, %c0_233, %c0_234] : memref<16x8x128xf32, #tpu.memory_space<vmem>>, vector<1x1x32xf32>
    %673 = vector.shape_cast %672 : vector<1x1x32xf32> to vector<1x32xf32>
    %c11_235 = arith.constant 11 : index
    %c1_236 = arith.constant 1 : index
    %c0_237 = arith.constant 0 : index
    %674 = vector.load %arg5[%c11_235, %c1_236, %c0_237] : memref<16x8x128xf32, #tpu.memory_space<vmem>>, vector<1x1x32xf32>
    %675 = vector.shape_cast %674 : vector<1x1x32xf32> to vector<1x32xf32>
    %676 = arith.addf %671, %570 : vector<16x32xf32>
    %cst_238 = arith.constant dense<0.000000e+00> : vector<16xf32>
    %677 = vector.multi_reduction <add>, %676, %cst_238 [1] : vector<16x32xf32> to vector<16xf32>
    %678 = vector.shape_cast %677 : vector<16xf32> to vector<16x1xf32>
    %cst_239 = arith.constant 3.200000e+01 : f32
    %679 = vector.broadcast %cst_239 : f32 to vector<16x1xf32>
    %680 = arith.divf %678, %679 : vector<16x1xf32>
    %681 = vector.broadcast %680 : vector<16x1xf32> to vector<16x32xf32>
    %682 = arith.subf %676, %681 : vector<16x32xf32>
    %683 = arith.mulf %682, %682 : vector<16x32xf32>
    %cst_240 = arith.constant dense<0.000000e+00> : vector<16xf32>
    %684 = vector.multi_reduction <add>, %683, %cst_240 [1] : vector<16x32xf32> to vector<16xf32>
    %685 = vector.shape_cast %684 : vector<16xf32> to vector<16x1xf32>
    %cst_241 = arith.constant 3.200000e+01 : f32
    %686 = vector.broadcast %cst_241 : f32 to vector<16x1xf32>
    %687 = arith.divf %685, %686 : vector<16x1xf32>
    %688 = vector.broadcast %680 : vector<16x1xf32> to vector<16x32xf32>
    %689 = arith.subf %676, %688 : vector<16x32xf32>
    %cst_242 = arith.constant 9.99999974E-6 : f32
    %690 = vector.broadcast %cst_242 : f32 to vector<16x1xf32>
    %691 = arith.addf %687, %690 : vector<16x1xf32>
    %692 = math.rsqrt %691 : vector<16x1xf32>
    %693 = vector.broadcast %692 : vector<16x1xf32> to vector<16x32xf32>
    %694 = arith.mulf %689, %693 : vector<16x32xf32>
    %695 = vector.broadcast %673 : vector<1x32xf32> to vector<16x32xf32>
    %696 = arith.mulf %694, %695 : vector<16x32xf32>
    %697 = vector.broadcast %675 : vector<1x32xf32> to vector<16x32xf32>
    %698 = arith.addf %696, %697 : vector<16x32xf32>
    %c8_243 = arith.constant 8 : index
    %c0_244 = arith.constant 0 : index
    %c0_245 = arith.constant 0 : index
    %699 = vector.load %arg4[%c8_243, %c0_244, %c0_245] : memref<11x64x128xbf16, #tpu.memory_space<vmem>>, vector<1x32x64xbf16>
    %700 = vector.shape_cast %699 : vector<1x32x64xbf16> to vector<32x64xbf16>
    %c12 = arith.constant 12 : index
    %c0_246 = arith.constant 0 : index
    %c0_247 = arith.constant 0 : index
    %701 = vector.load %arg5[%c12, %c0_246, %c0_247] : memref<16x8x128xf32, #tpu.memory_space<vmem>>, vector<1x1x64xf32>
    %702 = vector.shape_cast %701 : vector<1x1x64xf32> to vector<1x64xf32>
    %c9_248 = arith.constant 9 : index
    %c0_249 = arith.constant 0 : index
    %c0_250 = arith.constant 0 : index
    %703 = vector.load %arg4[%c9_248, %c0_249, %c0_250] : memref<11x64x128xbf16, #tpu.memory_space<vmem>>, vector<1x64x32xbf16>
    %704 = vector.shape_cast %703 : vector<1x64x32xbf16> to vector<64x32xbf16>
    %c13 = arith.constant 13 : index
    %c0_251 = arith.constant 0 : index
    %c0_252 = arith.constant 0 : index
    %705 = vector.load %arg5[%c13, %c0_251, %c0_252] : memref<16x8x128xf32, #tpu.memory_space<vmem>>, vector<1x1x32xf32>
    %706 = vector.shape_cast %705 : vector<1x1x32xf32> to vector<1x32xf32>
    %707 = arith.truncf %698 : vector<16x32xf32> to vector<16x32xbf16>
    %cst_253 = arith.constant dense<0.000000e+00> : vector<16x64xf32>
    %708 = tpu.matmul %707, %700, %cst_253 {dimension_numbers = #tpu.dot_dimension_numbers<[1], [0], [0], [1], [0, 0, 1, 1], [], []>} : vector<16x32xbf16>, vector<32x64xbf16>, vector<16x64xf32> -> vector<16x64xf32>
    %709 = vector.broadcast %702 : vector<1x64xf32> to vector<16x64xf32>
    %710 = arith.addf %708, %709 : vector<16x64xf32>
    %cst_254 = arith.constant 0.000000e+00 : f32
    %711 = vector.broadcast %cst_254 : f32 to vector<16x64xf32>
    %712 = arith.maximumf %710, %711 : vector<16x64xf32>
    %713 = arith.truncf %712 : vector<16x64xf32> to vector<16x64xbf16>
    %cst_255 = arith.constant dense<0.000000e+00> : vector<16x32xf32>
    %714 = tpu.matmul %713, %704, %cst_255 {dimension_numbers = #tpu.dot_dimension_numbers<[1], [0], [0], [1], [0, 0, 1, 1], [], []>} : vector<16x64xbf16>, vector<64x32xbf16>, vector<16x32xf32> -> vector<16x32xf32>
    %715 = vector.broadcast %706 : vector<1x32xf32> to vector<16x32xf32>
    %716 = arith.addf %714, %715 : vector<16x32xf32>
    %c14 = arith.constant 14 : index
    %c0_256 = arith.constant 0 : index
    %c0_257 = arith.constant 0 : index
    %717 = vector.load %arg5[%c14, %c0_256, %c0_257] : memref<16x8x128xf32, #tpu.memory_space<vmem>>, vector<1x1x32xf32>
    %718 = vector.shape_cast %717 : vector<1x1x32xf32> to vector<1x32xf32>
    %c14_258 = arith.constant 14 : index
    %c1_259 = arith.constant 1 : index
    %c0_260 = arith.constant 0 : index
    %719 = vector.load %arg5[%c14_258, %c1_259, %c0_260] : memref<16x8x128xf32, #tpu.memory_space<vmem>>, vector<1x1x32xf32>
    %720 = vector.shape_cast %719 : vector<1x1x32xf32> to vector<1x32xf32>
    %721 = arith.addf %716, %698 : vector<16x32xf32>
    %cst_261 = arith.constant dense<0.000000e+00> : vector<16xf32>
    %722 = vector.multi_reduction <add>, %721, %cst_261 [1] : vector<16x32xf32> to vector<16xf32>
    %723 = vector.shape_cast %722 : vector<16xf32> to vector<16x1xf32>
    %cst_262 = arith.constant 3.200000e+01 : f32
    %724 = vector.broadcast %cst_262 : f32 to vector<16x1xf32>
    %725 = arith.divf %723, %724 : vector<16x1xf32>
    %726 = vector.broadcast %725 : vector<16x1xf32> to vector<16x32xf32>
    %727 = arith.subf %721, %726 : vector<16x32xf32>
    %728 = arith.mulf %727, %727 : vector<16x32xf32>
    %cst_263 = arith.constant dense<0.000000e+00> : vector<16xf32>
    %729 = vector.multi_reduction <add>, %728, %cst_263 [1] : vector<16x32xf32> to vector<16xf32>
    %730 = vector.shape_cast %729 : vector<16xf32> to vector<16x1xf32>
    %cst_264 = arith.constant 3.200000e+01 : f32
    %731 = vector.broadcast %cst_264 : f32 to vector<16x1xf32>
    %732 = arith.divf %730, %731 : vector<16x1xf32>
    %733 = vector.broadcast %725 : vector<16x1xf32> to vector<16x32xf32>
    %734 = arith.subf %721, %733 : vector<16x32xf32>
    %cst_265 = arith.constant 9.99999974E-6 : f32
    %735 = vector.broadcast %cst_265 : f32 to vector<16x1xf32>
    %736 = arith.addf %732, %735 : vector<16x1xf32>
    %737 = math.rsqrt %736 : vector<16x1xf32>
    %738 = vector.broadcast %737 : vector<16x1xf32> to vector<16x32xf32>
    %739 = arith.mulf %734, %738 : vector<16x32xf32>
    %740 = vector.broadcast %718 : vector<1x32xf32> to vector<16x32xf32>
    %741 = arith.mulf %739, %740 : vector<16x32xf32>
    %742 = vector.broadcast %720 : vector<1x32xf32> to vector<16x32xf32>
    %743 = arith.addf %741, %742 : vector<16x32xf32>
    %c4_266 = arith.constant 4 : index
    %c0_267 = arith.constant 0 : index
    %c0_268 = arith.constant 0 : index
    %744 = vector.load %arg4[%c4_266, %c0_267, %c0_268] : memref<11x64x128xbf16, #tpu.memory_space<vmem>>, vector<1x32x96xbf16>
    %745 = vector.shape_cast %744 : vector<1x32x96xbf16> to vector<32x96xbf16>
    %c6_269 = arith.constant 6 : index
    %c0_270 = arith.constant 0 : index
    %c0_271 = arith.constant 0 : index
    %746 = vector.load %arg5[%c6_269, %c0_270, %c0_271] : memref<16x8x128xf32, #tpu.memory_space<vmem>>, vector<1x1x96xf32>
    %747 = vector.shape_cast %746 : vector<1x1x96xf32> to vector<1x96xf32>
    %748 = arith.truncf %743 : vector<16x32xf32> to vector<16x32xbf16>
    %cst_272 = arith.constant dense<0.000000e+00> : vector<16x96xf32>
    %749 = tpu.matmul %748, %745, %cst_272 {dimension_numbers = #tpu.dot_dimension_numbers<[1], [0], [0], [1], [0, 0, 1, 1], [], []>} : vector<16x32xbf16>, vector<32x96xbf16>, vector<16x96xf32> -> vector<16x96xf32>
    %750 = vector.broadcast %747 : vector<1x96xf32> to vector<16x96xf32>
    %751 = arith.addf %749, %750 : vector<16x96xf32>
    %752 = vector.extract_strided_slice %751 {offsets = [0, 0], sizes = [16, 8], strides = [1, 1]} : vector<16x96xf32> to vector<16x8xf32>
    %753 = vector.extract_strided_slice %751 {offsets = [0, 32], sizes = [16, 8], strides = [1, 1]} : vector<16x96xf32> to vector<16x8xf32>
    %754 = vector.extract_strided_slice %751 {offsets = [0, 64], sizes = [16, 8], strides = [1, 1]} : vector<16x96xf32> to vector<16x8xf32>
    %755 = arith.truncf %752 : vector<16x8xf32> to vector<16x8xbf16>
    %756 = arith.truncf %753 : vector<16x8xf32> to vector<16x8xbf16>
    %cst_273 = arith.constant dense<0.000000e+00> : vector<16x16xf32>
    %757 = tpu.matmul %755, %756, %cst_273 {dimension_numbers = #tpu.dot_dimension_numbers<[1], [1], [0], [0], [0, 0, 1, 0], [], []>} : vector<16x8xbf16>, vector<16x8xbf16>, vector<16x16xf32> -> vector<16x16xf32>
    %758 = arith.addf %757, %73 : vector<16x16xf32>
    %cst_274 = arith.constant dense<0xFF800000> : vector<16xf32>
    %759 = vector.multi_reduction <maximumf>, %758, %cst_274 [1] : vector<16x16xf32> to vector<16xf32>
    %760 = vector.shape_cast %759 : vector<16xf32> to vector<16x1xf32>
    %761 = vector.broadcast %760 : vector<16x1xf32> to vector<16x16xf32>
    %762 = arith.subf %758, %761 : vector<16x16xf32>
    %763 = math.exp %762 : vector<16x16xf32>
    %cst_275 = arith.constant dense<0.000000e+00> : vector<16xf32>
    %764 = vector.multi_reduction <add>, %763, %cst_275 [1] : vector<16x16xf32> to vector<16xf32>
    %765 = vector.shape_cast %764 : vector<16xf32> to vector<16x1xf32>
    %766 = tpu.reciprocal %765 {approx = true} : vector<16x1xf32> -> vector<16x1xf32>
    %767 = vector.broadcast %766 : vector<16x1xf32> to vector<16x16xf32>
    %768 = arith.mulf %763, %767 : vector<16x16xf32>
    %769 = arith.truncf %768 : vector<16x16xf32> to vector<16x16xbf16>
    %770 = arith.truncf %754 : vector<16x8xf32> to vector<16x8xbf16>
    %cst_276 = arith.constant dense<0.000000e+00> : vector<16x8xf32>
    %771 = tpu.matmul %769, %770, %cst_276 {dimension_numbers = #tpu.dot_dimension_numbers<[1], [0], [0], [1], [0, 0, 1, 1], [], []>} : vector<16x16xbf16>, vector<16x8xbf16>, vector<16x8xf32> -> vector<16x8xf32>
    %772 = vector.extract_strided_slice %751 {offsets = [0, 8], sizes = [16, 8], strides = [1, 1]} : vector<16x96xf32> to vector<16x8xf32>
    %773 = vector.extract_strided_slice %751 {offsets = [0, 40], sizes = [16, 8], strides = [1, 1]} : vector<16x96xf32> to vector<16x8xf32>
    %774 = vector.extract_strided_slice %751 {offsets = [0, 72], sizes = [16, 8], strides = [1, 1]} : vector<16x96xf32> to vector<16x8xf32>
    %775 = arith.truncf %772 : vector<16x8xf32> to vector<16x8xbf16>
    %776 = arith.truncf %773 : vector<16x8xf32> to vector<16x8xbf16>
    %cst_277 = arith.constant dense<0.000000e+00> : vector<16x16xf32>
    %777 = tpu.matmul %775, %776, %cst_277 {dimension_numbers = #tpu.dot_dimension_numbers<[1], [1], [0], [0], [0, 0, 1, 0], [], []>} : vector<16x8xbf16>, vector<16x8xbf16>, vector<16x16xf32> -> vector<16x16xf32>
    %778 = arith.addf %777, %73 : vector<16x16xf32>
    %cst_278 = arith.constant dense<0xFF800000> : vector<16xf32>
    %779 = vector.multi_reduction <maximumf>, %778, %cst_278 [1] : vector<16x16xf32> to vector<16xf32>
    %780 = vector.shape_cast %779 : vector<16xf32> to vector<16x1xf32>
    %781 = vector.broadcast %780 : vector<16x1xf32> to vector<16x16xf32>
    %782 = arith.subf %778, %781 : vector<16x16xf32>
    %783 = math.exp %782 : vector<16x16xf32>
    %cst_279 = arith.constant dense<0.000000e+00> : vector<16xf32>
    %784 = vector.multi_reduction <add>, %783, %cst_279 [1] : vector<16x16xf32> to vector<16xf32>
    %785 = vector.shape_cast %784 : vector<16xf32> to vector<16x1xf32>
    %786 = tpu.reciprocal %785 {approx = true} : vector<16x1xf32> -> vector<16x1xf32>
    %787 = vector.broadcast %786 : vector<16x1xf32> to vector<16x16xf32>
    %788 = arith.mulf %783, %787 : vector<16x16xf32>
    %789 = arith.truncf %788 : vector<16x16xf32> to vector<16x16xbf16>
    %790 = arith.truncf %774 : vector<16x8xf32> to vector<16x8xbf16>
    %cst_280 = arith.constant dense<0.000000e+00> : vector<16x8xf32>
    %791 = tpu.matmul %789, %790, %cst_280 {dimension_numbers = #tpu.dot_dimension_numbers<[1], [0], [0], [1], [0, 0, 1, 1], [], []>} : vector<16x16xbf16>, vector<16x8xbf16>, vector<16x8xf32> -> vector<16x8xf32>
    %792 = vector.extract_strided_slice %751 {offsets = [0, 16], sizes = [16, 8], strides = [1, 1]} : vector<16x96xf32> to vector<16x8xf32>
    %793 = vector.extract_strided_slice %751 {offsets = [0, 48], sizes = [16, 8], strides = [1, 1]} : vector<16x96xf32> to vector<16x8xf32>
    %794 = vector.extract_strided_slice %751 {offsets = [0, 80], sizes = [16, 8], strides = [1, 1]} : vector<16x96xf32> to vector<16x8xf32>
    %795 = arith.truncf %792 : vector<16x8xf32> to vector<16x8xbf16>
    %796 = arith.truncf %793 : vector<16x8xf32> to vector<16x8xbf16>
    %cst_281 = arith.constant dense<0.000000e+00> : vector<16x16xf32>
    %797 = tpu.matmul %795, %796, %cst_281 {dimension_numbers = #tpu.dot_dimension_numbers<[1], [1], [0], [0], [0, 0, 1, 0], [], []>} : vector<16x8xbf16>, vector<16x8xbf16>, vector<16x16xf32> -> vector<16x16xf32>
    %798 = arith.addf %797, %73 : vector<16x16xf32>
    %cst_282 = arith.constant dense<0xFF800000> : vector<16xf32>
    %799 = vector.multi_reduction <maximumf>, %798, %cst_282 [1] : vector<16x16xf32> to vector<16xf32>
    %800 = vector.shape_cast %799 : vector<16xf32> to vector<16x1xf32>
    %801 = vector.broadcast %800 : vector<16x1xf32> to vector<16x16xf32>
    %802 = arith.subf %798, %801 : vector<16x16xf32>
    %803 = math.exp %802 : vector<16x16xf32>
    %cst_283 = arith.constant dense<0.000000e+00> : vector<16xf32>
    %804 = vector.multi_reduction <add>, %803, %cst_283 [1] : vector<16x16xf32> to vector<16xf32>
    %805 = vector.shape_cast %804 : vector<16xf32> to vector<16x1xf32>
    %806 = tpu.reciprocal %805 {approx = true} : vector<16x1xf32> -> vector<16x1xf32>
    %807 = vector.broadcast %806 : vector<16x1xf32> to vector<16x16xf32>
    %808 = arith.mulf %803, %807 : vector<16x16xf32>
    %809 = arith.truncf %808 : vector<16x16xf32> to vector<16x16xbf16>
    %810 = arith.truncf %794 : vector<16x8xf32> to vector<16x8xbf16>
    %cst_284 = arith.constant dense<0.000000e+00> : vector<16x8xf32>
    %811 = tpu.matmul %809, %810, %cst_284 {dimension_numbers = #tpu.dot_dimension_numbers<[1], [0], [0], [1], [0, 0, 1, 1], [], []>} : vector<16x16xbf16>, vector<16x8xbf16>, vector<16x8xf32> -> vector<16x8xf32>
    %812 = vector.extract_strided_slice %751 {offsets = [0, 24], sizes = [16, 8], strides = [1, 1]} : vector<16x96xf32> to vector<16x8xf32>
    %813 = vector.extract_strided_slice %751 {offsets = [0, 56], sizes = [16, 8], strides = [1, 1]} : vector<16x96xf32> to vector<16x8xf32>
    %814 = vector.extract_strided_slice %751 {offsets = [0, 88], sizes = [16, 8], strides = [1, 1]} : vector<16x96xf32> to vector<16x8xf32>
    %815 = arith.truncf %812 : vector<16x8xf32> to vector<16x8xbf16>
    %816 = arith.truncf %813 : vector<16x8xf32> to vector<16x8xbf16>
    %cst_285 = arith.constant dense<0.000000e+00> : vector<16x16xf32>
    %817 = tpu.matmul %815, %816, %cst_285 {dimension_numbers = #tpu.dot_dimension_numbers<[1], [1], [0], [0], [0, 0, 1, 0], [], []>} : vector<16x8xbf16>, vector<16x8xbf16>, vector<16x16xf32> -> vector<16x16xf32>
    %818 = arith.addf %817, %73 : vector<16x16xf32>
    %cst_286 = arith.constant dense<0xFF800000> : vector<16xf32>
    %819 = vector.multi_reduction <maximumf>, %818, %cst_286 [1] : vector<16x16xf32> to vector<16xf32>
    %820 = vector.shape_cast %819 : vector<16xf32> to vector<16x1xf32>
    %821 = vector.broadcast %820 : vector<16x1xf32> to vector<16x16xf32>
    %822 = arith.subf %818, %821 : vector<16x16xf32>
    %823 = math.exp %822 : vector<16x16xf32>
    %cst_287 = arith.constant dense<0.000000e+00> : vector<16xf32>
    %824 = vector.multi_reduction <add>, %823, %cst_287 [1] : vector<16x16xf32> to vector<16xf32>
    %825 = vector.shape_cast %824 : vector<16xf32> to vector<16x1xf32>
    %826 = tpu.reciprocal %825 {approx = true} : vector<16x1xf32> -> vector<16x1xf32>
    %827 = vector.broadcast %826 : vector<16x1xf32> to vector<16x16xf32>
    %828 = arith.mulf %823, %827 : vector<16x16xf32>
    %829 = arith.truncf %828 : vector<16x16xf32> to vector<16x16xbf16>
    %830 = arith.truncf %814 : vector<16x8xf32> to vector<16x8xbf16>
    %cst_288 = arith.constant dense<0.000000e+00> : vector<16x8xf32>
    %831 = tpu.matmul %829, %830, %cst_288 {dimension_numbers = #tpu.dot_dimension_numbers<[1], [0], [0], [1], [0, 0, 1, 1], [], []>} : vector<16x16xbf16>, vector<16x8xbf16>, vector<16x8xf32> -> vector<16x8xf32>
    %832 = tpu.concatenate %771, %791, %811, %831 in 1 : vector<16x8xf32>, vector<16x8xf32>, vector<16x8xf32>, vector<16x8xf32> -> vector<16x32xf32>
    %c5_289 = arith.constant 5 : index
    %c0_290 = arith.constant 0 : index
    %c0_291 = arith.constant 0 : index
    %833 = vector.load %arg4[%c5_289, %c0_290, %c0_291] : memref<11x64x128xbf16, #tpu.memory_space<vmem>>, vector<1x32x32xbf16>
    %834 = vector.shape_cast %833 : vector<1x32x32xbf16> to vector<32x32xbf16>
    %c7_292 = arith.constant 7 : index
    %c0_293 = arith.constant 0 : index
    %c0_294 = arith.constant 0 : index
    %835 = vector.load %arg5[%c7_292, %c0_293, %c0_294] : memref<16x8x128xf32, #tpu.memory_space<vmem>>, vector<1x1x32xf32>
    %836 = vector.shape_cast %835 : vector<1x1x32xf32> to vector<1x32xf32>
    %837 = arith.truncf %832 : vector<16x32xf32> to vector<16x32xbf16>
    %cst_295 = arith.constant dense<0.000000e+00> : vector<16x32xf32>
    %838 = tpu.matmul %837, %834, %cst_295 {dimension_numbers = #tpu.dot_dimension_numbers<[1], [0], [0], [1], [0, 0, 1, 1], [], []>} : vector<16x32xbf16>, vector<32x32xbf16>, vector<16x32xf32> -> vector<16x32xf32>
    %839 = vector.broadcast %836 : vector<1x32xf32> to vector<16x32xf32>
    %840 = arith.addf %838, %839 : vector<16x32xf32>
    %c8_296 = arith.constant 8 : index
    %c0_297 = arith.constant 0 : index
    %c0_298 = arith.constant 0 : index
    %841 = vector.load %arg5[%c8_296, %c0_297, %c0_298] : memref<16x8x128xf32, #tpu.memory_space<vmem>>, vector<1x1x32xf32>
    %842 = vector.shape_cast %841 : vector<1x1x32xf32> to vector<1x32xf32>
    %c8_299 = arith.constant 8 : index
    %c1_300 = arith.constant 1 : index
    %c0_301 = arith.constant 0 : index
    %843 = vector.load %arg5[%c8_299, %c1_300, %c0_301] : memref<16x8x128xf32, #tpu.memory_space<vmem>>, vector<1x1x32xf32>
    %844 = vector.shape_cast %843 : vector<1x1x32xf32> to vector<1x32xf32>
    %845 = arith.addf %840, %743 : vector<16x32xf32>
    %cst_302 = arith.constant dense<0.000000e+00> : vector<16xf32>
    %846 = vector.multi_reduction <add>, %845, %cst_302 [1] : vector<16x32xf32> to vector<16xf32>
    %847 = vector.shape_cast %846 : vector<16xf32> to vector<16x1xf32>
    %cst_303 = arith.constant 3.200000e+01 : f32
    %848 = vector.broadcast %cst_303 : f32 to vector<16x1xf32>
    %849 = arith.divf %847, %848 : vector<16x1xf32>
    %850 = vector.broadcast %849 : vector<16x1xf32> to vector<16x32xf32>
    %851 = arith.subf %845, %850 : vector<16x32xf32>
    %852 = arith.mulf %851, %851 : vector<16x32xf32>
    %cst_304 = arith.constant dense<0.000000e+00> : vector<16xf32>
    %853 = vector.multi_reduction <add>, %852, %cst_304 [1] : vector<16x32xf32> to vector<16xf32>
    %854 = vector.shape_cast %853 : vector<16xf32> to vector<16x1xf32>
    %cst_305 = arith.constant 3.200000e+01 : f32
    %855 = vector.broadcast %cst_305 : f32 to vector<16x1xf32>
    %856 = arith.divf %854, %855 : vector<16x1xf32>
    %857 = vector.broadcast %849 : vector<16x1xf32> to vector<16x32xf32>
    %858 = arith.subf %845, %857 : vector<16x32xf32>
    %cst_306 = arith.constant 9.99999974E-6 : f32
    %859 = vector.broadcast %cst_306 : f32 to vector<16x1xf32>
    %860 = arith.addf %856, %859 : vector<16x1xf32>
    %861 = math.rsqrt %860 : vector<16x1xf32>
    %862 = vector.broadcast %861 : vector<16x1xf32> to vector<16x32xf32>
    %863 = arith.mulf %858, %862 : vector<16x32xf32>
    %864 = vector.broadcast %842 : vector<1x32xf32> to vector<16x32xf32>
    %865 = arith.mulf %863, %864 : vector<16x32xf32>
    %866 = vector.broadcast %844 : vector<1x32xf32> to vector<16x32xf32>
    %867 = arith.addf %865, %866 : vector<16x32xf32>
    %c6_307 = arith.constant 6 : index
    %c0_308 = arith.constant 0 : index
    %c0_309 = arith.constant 0 : index
    %868 = vector.load %arg4[%c6_307, %c0_308, %c0_309] : memref<11x64x128xbf16, #tpu.memory_space<vmem>>, vector<1x32x96xbf16>
    %869 = vector.shape_cast %868 : vector<1x32x96xbf16> to vector<32x96xbf16>
    %c9_310 = arith.constant 9 : index
    %c0_311 = arith.constant 0 : index
    %c0_312 = arith.constant 0 : index
    %870 = vector.load %arg5[%c9_310, %c0_311, %c0_312] : memref<16x8x128xf32, #tpu.memory_space<vmem>>, vector<1x1x96xf32>
    %871 = vector.shape_cast %870 : vector<1x1x96xf32> to vector<1x96xf32>
    %872 = arith.truncf %867 : vector<16x32xf32> to vector<16x32xbf16>
    %cst_313 = arith.constant dense<0.000000e+00> : vector<16x96xf32>
    %873 = tpu.matmul %872, %869, %cst_313 {dimension_numbers = #tpu.dot_dimension_numbers<[1], [0], [0], [1], [0, 0, 1, 1], [], []>} : vector<16x32xbf16>, vector<32x96xbf16>, vector<16x96xf32> -> vector<16x96xf32>
    %874 = vector.broadcast %871 : vector<1x96xf32> to vector<16x96xf32>
    %875 = arith.addf %873, %874 : vector<16x96xf32>
    %876 = arith.truncf %445 : vector<16x32xf32> to vector<16x32xbf16>
    %cst_314 = arith.constant dense<0.000000e+00> : vector<16x96xf32>
    %877 = tpu.matmul %876, %869, %cst_314 {dimension_numbers = #tpu.dot_dimension_numbers<[1], [0], [0], [1], [0, 0, 1, 1], [], []>} : vector<16x32xbf16>, vector<32x96xbf16>, vector<16x96xf32> -> vector<16x96xf32>
    %878 = vector.broadcast %871 : vector<1x96xf32> to vector<16x96xf32>
    %879 = arith.addf %877, %878 : vector<16x96xf32>
    %880 = vector.extract_strided_slice %875 {offsets = [0, 0], sizes = [16, 8], strides = [1, 1]} : vector<16x96xf32> to vector<16x8xf32>
    %881 = vector.extract_strided_slice %879 {offsets = [0, 32], sizes = [16, 8], strides = [1, 1]} : vector<16x96xf32> to vector<16x8xf32>
    %882 = vector.extract_strided_slice %879 {offsets = [0, 64], sizes = [16, 8], strides = [1, 1]} : vector<16x96xf32> to vector<16x8xf32>
    %883 = arith.truncf %880 : vector<16x8xf32> to vector<16x8xbf16>
    %884 = arith.truncf %881 : vector<16x8xf32> to vector<16x8xbf16>
    %cst_315 = arith.constant dense<0.000000e+00> : vector<16x16xf32>
    %885 = tpu.matmul %883, %884, %cst_315 {dimension_numbers = #tpu.dot_dimension_numbers<[1], [1], [0], [0], [0, 0, 1, 0], [], []>} : vector<16x8xbf16>, vector<16x8xbf16>, vector<16x16xf32> -> vector<16x16xf32>
    %886 = arith.addf %885, %106 : vector<16x16xf32>
    %cst_316 = arith.constant dense<0xFF800000> : vector<16xf32>
    %887 = vector.multi_reduction <maximumf>, %886, %cst_316 [1] : vector<16x16xf32> to vector<16xf32>
    %888 = vector.shape_cast %887 : vector<16xf32> to vector<16x1xf32>
    %889 = vector.broadcast %888 : vector<16x1xf32> to vector<16x16xf32>
    %890 = arith.subf %886, %889 : vector<16x16xf32>
    %891 = math.exp %890 : vector<16x16xf32>
    %cst_317 = arith.constant dense<0.000000e+00> : vector<16xf32>
    %892 = vector.multi_reduction <add>, %891, %cst_317 [1] : vector<16x16xf32> to vector<16xf32>
    %893 = vector.shape_cast %892 : vector<16xf32> to vector<16x1xf32>
    %894 = tpu.reciprocal %893 {approx = true} : vector<16x1xf32> -> vector<16x1xf32>
    %895 = vector.broadcast %894 : vector<16x1xf32> to vector<16x16xf32>
    %896 = arith.mulf %891, %895 : vector<16x16xf32>
    %897 = arith.truncf %896 : vector<16x16xf32> to vector<16x16xbf16>
    %898 = arith.truncf %882 : vector<16x8xf32> to vector<16x8xbf16>
    %cst_318 = arith.constant dense<0.000000e+00> : vector<16x8xf32>
    %899 = tpu.matmul %897, %898, %cst_318 {dimension_numbers = #tpu.dot_dimension_numbers<[1], [0], [0], [1], [0, 0, 1, 1], [], []>} : vector<16x16xbf16>, vector<16x8xbf16>, vector<16x8xf32> -> vector<16x8xf32>
    %900 = vector.extract_strided_slice %875 {offsets = [0, 8], sizes = [16, 8], strides = [1, 1]} : vector<16x96xf32> to vector<16x8xf32>
    %901 = vector.extract_strided_slice %879 {offsets = [0, 40], sizes = [16, 8], strides = [1, 1]} : vector<16x96xf32> to vector<16x8xf32>
    %902 = vector.extract_strided_slice %879 {offsets = [0, 72], sizes = [16, 8], strides = [1, 1]} : vector<16x96xf32> to vector<16x8xf32>
    %903 = arith.truncf %900 : vector<16x8xf32> to vector<16x8xbf16>
    %904 = arith.truncf %901 : vector<16x8xf32> to vector<16x8xbf16>
    %cst_319 = arith.constant dense<0.000000e+00> : vector<16x16xf32>
    %905 = tpu.matmul %903, %904, %cst_319 {dimension_numbers = #tpu.dot_dimension_numbers<[1], [1], [0], [0], [0, 0, 1, 0], [], []>} : vector<16x8xbf16>, vector<16x8xbf16>, vector<16x16xf32> -> vector<16x16xf32>
    %906 = arith.addf %905, %106 : vector<16x16xf32>
    %cst_320 = arith.constant dense<0xFF800000> : vector<16xf32>
    %907 = vector.multi_reduction <maximumf>, %906, %cst_320 [1] : vector<16x16xf32> to vector<16xf32>
    %908 = vector.shape_cast %907 : vector<16xf32> to vector<16x1xf32>
    %909 = vector.broadcast %908 : vector<16x1xf32> to vector<16x16xf32>
    %910 = arith.subf %906, %909 : vector<16x16xf32>
    %911 = math.exp %910 : vector<16x16xf32>
    %cst_321 = arith.constant dense<0.000000e+00> : vector<16xf32>
    %912 = vector.multi_reduction <add>, %911, %cst_321 [1] : vector<16x16xf32> to vector<16xf32>
    %913 = vector.shape_cast %912 : vector<16xf32> to vector<16x1xf32>
    %914 = tpu.reciprocal %913 {approx = true} : vector<16x1xf32> -> vector<16x1xf32>
    %915 = vector.broadcast %914 : vector<16x1xf32> to vector<16x16xf32>
    %916 = arith.mulf %911, %915 : vector<16x16xf32>
    %917 = arith.truncf %916 : vector<16x16xf32> to vector<16x16xbf16>
    %918 = arith.truncf %902 : vector<16x8xf32> to vector<16x8xbf16>
    %cst_322 = arith.constant dense<0.000000e+00> : vector<16x8xf32>
    %919 = tpu.matmul %917, %918, %cst_322 {dimension_numbers = #tpu.dot_dimension_numbers<[1], [0], [0], [1], [0, 0, 1, 1], [], []>} : vector<16x16xbf16>, vector<16x8xbf16>, vector<16x8xf32> -> vector<16x8xf32>
    %920 = vector.extract_strided_slice %875 {offsets = [0, 16], sizes = [16, 8], strides = [1, 1]} : vector<16x96xf32> to vector<16x8xf32>
    %921 = vector.extract_strided_slice %879 {offsets = [0, 48], sizes = [16, 8], strides = [1, 1]} : vector<16x96xf32> to vector<16x8xf32>
    %922 = vector.extract_strided_slice %879 {offsets = [0, 80], sizes = [16, 8], strides = [1, 1]} : vector<16x96xf32> to vector<16x8xf32>
    %923 = arith.truncf %920 : vector<16x8xf32> to vector<16x8xbf16>
    %924 = arith.truncf %921 : vector<16x8xf32> to vector<16x8xbf16>
    %cst_323 = arith.constant dense<0.000000e+00> : vector<16x16xf32>
    %925 = tpu.matmul %923, %924, %cst_323 {dimension_numbers = #tpu.dot_dimension_numbers<[1], [1], [0], [0], [0, 0, 1, 0], [], []>} : vector<16x8xbf16>, vector<16x8xbf16>, vector<16x16xf32> -> vector<16x16xf32>
    %926 = arith.addf %925, %106 : vector<16x16xf32>
    %cst_324 = arith.constant dense<0xFF800000> : vector<16xf32>
    %927 = vector.multi_reduction <maximumf>, %926, %cst_324 [1] : vector<16x16xf32> to vector<16xf32>
    %928 = vector.shape_cast %927 : vector<16xf32> to vector<16x1xf32>
    %929 = vector.broadcast %928 : vector<16x1xf32> to vector<16x16xf32>
    %930 = arith.subf %926, %929 : vector<16x16xf32>
    %931 = math.exp %930 : vector<16x16xf32>
    %cst_325 = arith.constant dense<0.000000e+00> : vector<16xf32>
    %932 = vector.multi_reduction <add>, %931, %cst_325 [1] : vector<16x16xf32> to vector<16xf32>
    %933 = vector.shape_cast %932 : vector<16xf32> to vector<16x1xf32>
    %934 = tpu.reciprocal %933 {approx = true} : vector<16x1xf32> -> vector<16x1xf32>
    %935 = vector.broadcast %934 : vector<16x1xf32> to vector<16x16xf32>
    %936 = arith.mulf %931, %935 : vector<16x16xf32>
    %937 = arith.truncf %936 : vector<16x16xf32> to vector<16x16xbf16>
    %938 = arith.truncf %922 : vector<16x8xf32> to vector<16x8xbf16>
    %cst_326 = arith.constant dense<0.000000e+00> : vector<16x8xf32>
    %939 = tpu.matmul %937, %938, %cst_326 {dimension_numbers = #tpu.dot_dimension_numbers<[1], [0], [0], [1], [0, 0, 1, 1], [], []>} : vector<16x16xbf16>, vector<16x8xbf16>, vector<16x8xf32> -> vector<16x8xf32>
    %940 = vector.extract_strided_slice %875 {offsets = [0, 24], sizes = [16, 8], strides = [1, 1]} : vector<16x96xf32> to vector<16x8xf32>
    %941 = vector.extract_strided_slice %879 {offsets = [0, 56], sizes = [16, 8], strides = [1, 1]} : vector<16x96xf32> to vector<16x8xf32>
    %942 = vector.extract_strided_slice %879 {offsets = [0, 88], sizes = [16, 8], strides = [1, 1]} : vector<16x96xf32> to vector<16x8xf32>
    %943 = arith.truncf %940 : vector<16x8xf32> to vector<16x8xbf16>
    %944 = arith.truncf %941 : vector<16x8xf32> to vector<16x8xbf16>
    %cst_327 = arith.constant dense<0.000000e+00> : vector<16x16xf32>
    %945 = tpu.matmul %943, %944, %cst_327 {dimension_numbers = #tpu.dot_dimension_numbers<[1], [1], [0], [0], [0, 0, 1, 0], [], []>} : vector<16x8xbf16>, vector<16x8xbf16>, vector<16x16xf32> -> vector<16x16xf32>
    %946 = arith.addf %945, %106 : vector<16x16xf32>
    %cst_328 = arith.constant dense<0xFF800000> : vector<16xf32>
    %947 = vector.multi_reduction <maximumf>, %946, %cst_328 [1] : vector<16x16xf32> to vector<16xf32>
    %948 = vector.shape_cast %947 : vector<16xf32> to vector<16x1xf32>
    %949 = vector.broadcast %948 : vector<16x1xf32> to vector<16x16xf32>
    %950 = arith.subf %946, %949 : vector<16x16xf32>
    %951 = math.exp %950 : vector<16x16xf32>
    %cst_329 = arith.constant dense<0.000000e+00> : vector<16xf32>
    %952 = vector.multi_reduction <add>, %951, %cst_329 [1] : vector<16x16xf32> to vector<16xf32>
    %953 = vector.shape_cast %952 : vector<16xf32> to vector<16x1xf32>
    %954 = tpu.reciprocal %953 {approx = true} : vector<16x1xf32> -> vector<16x1xf32>
    %955 = vector.broadcast %954 : vector<16x1xf32> to vector<16x16xf32>
    %956 = arith.mulf %951, %955 : vector<16x16xf32>
    %957 = arith.truncf %956 : vector<16x16xf32> to vector<16x16xbf16>
    %958 = arith.truncf %942 : vector<16x8xf32> to vector<16x8xbf16>
    %cst_330 = arith.constant dense<0.000000e+00> : vector<16x8xf32>
    %959 = tpu.matmul %957, %958, %cst_330 {dimension_numbers = #tpu.dot_dimension_numbers<[1], [0], [0], [1], [0, 0, 1, 1], [], []>} : vector<16x16xbf16>, vector<16x8xbf16>, vector<16x8xf32> -> vector<16x8xf32>
    %960 = tpu.concatenate %899, %919, %939, %959 in 1 : vector<16x8xf32>, vector<16x8xf32>, vector<16x8xf32>, vector<16x8xf32> -> vector<16x32xf32>
    %c7_331 = arith.constant 7 : index
    %c0_332 = arith.constant 0 : index
    %c0_333 = arith.constant 0 : index
    %961 = vector.load %arg4[%c7_331, %c0_332, %c0_333] : memref<11x64x128xbf16, #tpu.memory_space<vmem>>, vector<1x32x32xbf16>
    %962 = vector.shape_cast %961 : vector<1x32x32xbf16> to vector<32x32xbf16>
    %c10_334 = arith.constant 10 : index
    %c0_335 = arith.constant 0 : index
    %c0_336 = arith.constant 0 : index
    %963 = vector.load %arg5[%c10_334, %c0_335, %c0_336] : memref<16x8x128xf32, #tpu.memory_space<vmem>>, vector<1x1x32xf32>
    %964 = vector.shape_cast %963 : vector<1x1x32xf32> to vector<1x32xf32>
    %965 = arith.truncf %960 : vector<16x32xf32> to vector<16x32xbf16>
    %cst_337 = arith.constant dense<0.000000e+00> : vector<16x32xf32>
    %966 = tpu.matmul %965, %962, %cst_337 {dimension_numbers = #tpu.dot_dimension_numbers<[1], [0], [0], [1], [0, 0, 1, 1], [], []>} : vector<16x32xbf16>, vector<32x32xbf16>, vector<16x32xf32> -> vector<16x32xf32>
    %967 = vector.broadcast %964 : vector<1x32xf32> to vector<16x32xf32>
    %968 = arith.addf %966, %967 : vector<16x32xf32>
    %c11_338 = arith.constant 11 : index
    %c0_339 = arith.constant 0 : index
    %c0_340 = arith.constant 0 : index
    %969 = vector.load %arg5[%c11_338, %c0_339, %c0_340] : memref<16x8x128xf32, #tpu.memory_space<vmem>>, vector<1x1x32xf32>
    %970 = vector.shape_cast %969 : vector<1x1x32xf32> to vector<1x32xf32>
    %c11_341 = arith.constant 11 : index
    %c1_342 = arith.constant 1 : index
    %c0_343 = arith.constant 0 : index
    %971 = vector.load %arg5[%c11_341, %c1_342, %c0_343] : memref<16x8x128xf32, #tpu.memory_space<vmem>>, vector<1x1x32xf32>
    %972 = vector.shape_cast %971 : vector<1x1x32xf32> to vector<1x32xf32>
    %973 = arith.addf %968, %867 : vector<16x32xf32>
    %cst_344 = arith.constant dense<0.000000e+00> : vector<16xf32>
    %974 = vector.multi_reduction <add>, %973, %cst_344 [1] : vector<16x32xf32> to vector<16xf32>
    %975 = vector.shape_cast %974 : vector<16xf32> to vector<16x1xf32>
    %cst_345 = arith.constant 3.200000e+01 : f32
    %976 = vector.broadcast %cst_345 : f32 to vector<16x1xf32>
    %977 = arith.divf %975, %976 : vector<16x1xf32>
    %978 = vector.broadcast %977 : vector<16x1xf32> to vector<16x32xf32>
    %979 = arith.subf %973, %978 : vector<16x32xf32>
    %980 = arith.mulf %979, %979 : vector<16x32xf32>
    %cst_346 = arith.constant dense<0.000000e+00> : vector<16xf32>
    %981 = vector.multi_reduction <add>, %980, %cst_346 [1] : vector<16x32xf32> to vector<16xf32>
    %982 = vector.shape_cast %981 : vector<16xf32> to vector<16x1xf32>
    %cst_347 = arith.constant 3.200000e+01 : f32
    %983 = vector.broadcast %cst_347 : f32 to vector<16x1xf32>
    %984 = arith.divf %982, %983 : vector<16x1xf32>
    %985 = vector.broadcast %977 : vector<16x1xf32> to vector<16x32xf32>
    %986 = arith.subf %973, %985 : vector<16x32xf32>
    %cst_348 = arith.constant 9.99999974E-6 : f32
    %987 = vector.broadcast %cst_348 : f32 to vector<16x1xf32>
    %988 = arith.addf %984, %987 : vector<16x1xf32>
    %989 = math.rsqrt %988 : vector<16x1xf32>
    %990 = vector.broadcast %989 : vector<16x1xf32> to vector<16x32xf32>
    %991 = arith.mulf %986, %990 : vector<16x32xf32>
    %992 = vector.broadcast %970 : vector<1x32xf32> to vector<16x32xf32>
    %993 = arith.mulf %991, %992 : vector<16x32xf32>
    %994 = vector.broadcast %972 : vector<1x32xf32> to vector<16x32xf32>
    %995 = arith.addf %993, %994 : vector<16x32xf32>
    %c8_349 = arith.constant 8 : index
    %c0_350 = arith.constant 0 : index
    %c0_351 = arith.constant 0 : index
    %996 = vector.load %arg4[%c8_349, %c0_350, %c0_351] : memref<11x64x128xbf16, #tpu.memory_space<vmem>>, vector<1x32x64xbf16>
    %997 = vector.shape_cast %996 : vector<1x32x64xbf16> to vector<32x64xbf16>
    %c12_352 = arith.constant 12 : index
    %c0_353 = arith.constant 0 : index
    %c0_354 = arith.constant 0 : index
    %998 = vector.load %arg5[%c12_352, %c0_353, %c0_354] : memref<16x8x128xf32, #tpu.memory_space<vmem>>, vector<1x1x64xf32>
    %999 = vector.shape_cast %998 : vector<1x1x64xf32> to vector<1x64xf32>
    %c9_355 = arith.constant 9 : index
    %c0_356 = arith.constant 0 : index
    %c0_357 = arith.constant 0 : index
    %1000 = vector.load %arg4[%c9_355, %c0_356, %c0_357] : memref<11x64x128xbf16, #tpu.memory_space<vmem>>, vector<1x64x32xbf16>
    %1001 = vector.shape_cast %1000 : vector<1x64x32xbf16> to vector<64x32xbf16>
    %c13_358 = arith.constant 13 : index
    %c0_359 = arith.constant 0 : index
    %c0_360 = arith.constant 0 : index
    %1002 = vector.load %arg5[%c13_358, %c0_359, %c0_360] : memref<16x8x128xf32, #tpu.memory_space<vmem>>, vector<1x1x32xf32>
    %1003 = vector.shape_cast %1002 : vector<1x1x32xf32> to vector<1x32xf32>
    %1004 = arith.truncf %995 : vector<16x32xf32> to vector<16x32xbf16>
    %cst_361 = arith.constant dense<0.000000e+00> : vector<16x64xf32>
    %1005 = tpu.matmul %1004, %997, %cst_361 {dimension_numbers = #tpu.dot_dimension_numbers<[1], [0], [0], [1], [0, 0, 1, 1], [], []>} : vector<16x32xbf16>, vector<32x64xbf16>, vector<16x64xf32> -> vector<16x64xf32>
    %1006 = vector.broadcast %999 : vector<1x64xf32> to vector<16x64xf32>
    %1007 = arith.addf %1005, %1006 : vector<16x64xf32>
    %cst_362 = arith.constant 0.000000e+00 : f32
    %1008 = vector.broadcast %cst_362 : f32 to vector<16x64xf32>
    %1009 = arith.maximumf %1007, %1008 : vector<16x64xf32>
    %1010 = arith.truncf %1009 : vector<16x64xf32> to vector<16x64xbf16>
    %cst_363 = arith.constant dense<0.000000e+00> : vector<16x32xf32>
    %1011 = tpu.matmul %1010, %1001, %cst_363 {dimension_numbers = #tpu.dot_dimension_numbers<[1], [0], [0], [1], [0, 0, 1, 1], [], []>} : vector<16x64xbf16>, vector<64x32xbf16>, vector<16x32xf32> -> vector<16x32xf32>
    %1012 = vector.broadcast %1003 : vector<1x32xf32> to vector<16x32xf32>
    %1013 = arith.addf %1011, %1012 : vector<16x32xf32>
    %c14_364 = arith.constant 14 : index
    %c0_365 = arith.constant 0 : index
    %c0_366 = arith.constant 0 : index
    %1014 = vector.load %arg5[%c14_364, %c0_365, %c0_366] : memref<16x8x128xf32, #tpu.memory_space<vmem>>, vector<1x1x32xf32>
    %1015 = vector.shape_cast %1014 : vector<1x1x32xf32> to vector<1x32xf32>
    %c14_367 = arith.constant 14 : index
    %c1_368 = arith.constant 1 : index
    %c0_369 = arith.constant 0 : index
    %1016 = vector.load %arg5[%c14_367, %c1_368, %c0_369] : memref<16x8x128xf32, #tpu.memory_space<vmem>>, vector<1x1x32xf32>
    %1017 = vector.shape_cast %1016 : vector<1x1x32xf32> to vector<1x32xf32>
    %1018 = arith.addf %1013, %995 : vector<16x32xf32>
    %cst_370 = arith.constant dense<0.000000e+00> : vector<16xf32>
    %1019 = vector.multi_reduction <add>, %1018, %cst_370 [1] : vector<16x32xf32> to vector<16xf32>
    %1020 = vector.shape_cast %1019 : vector<16xf32> to vector<16x1xf32>
    %cst_371 = arith.constant 3.200000e+01 : f32
    %1021 = vector.broadcast %cst_371 : f32 to vector<16x1xf32>
    %1022 = arith.divf %1020, %1021 : vector<16x1xf32>
    %1023 = vector.broadcast %1022 : vector<16x1xf32> to vector<16x32xf32>
    %1024 = arith.subf %1018, %1023 : vector<16x32xf32>
    %1025 = arith.mulf %1024, %1024 : vector<16x32xf32>
    %cst_372 = arith.constant dense<0.000000e+00> : vector<16xf32>
    %1026 = vector.multi_reduction <add>, %1025, %cst_372 [1] : vector<16x32xf32> to vector<16xf32>
    %1027 = vector.shape_cast %1026 : vector<16xf32> to vector<16x1xf32>
    %cst_373 = arith.constant 3.200000e+01 : f32
    %1028 = vector.broadcast %cst_373 : f32 to vector<16x1xf32>
    %1029 = arith.divf %1027, %1028 : vector<16x1xf32>
    %1030 = vector.broadcast %1022 : vector<16x1xf32> to vector<16x32xf32>
    %1031 = arith.subf %1018, %1030 : vector<16x32xf32>
    %cst_374 = arith.constant 9.99999974E-6 : f32
    %1032 = vector.broadcast %cst_374 : f32 to vector<16x1xf32>
    %1033 = arith.addf %1029, %1032 : vector<16x1xf32>
    %1034 = math.rsqrt %1033 : vector<16x1xf32>
    %1035 = vector.broadcast %1034 : vector<16x1xf32> to vector<16x32xf32>
    %1036 = arith.mulf %1031, %1035 : vector<16x32xf32>
    %1037 = vector.broadcast %1015 : vector<1x32xf32> to vector<16x32xf32>
    %1038 = arith.mulf %1036, %1037 : vector<16x32xf32>
    %1039 = vector.broadcast %1017 : vector<1x32xf32> to vector<16x32xf32>
    %1040 = arith.addf %1038, %1039 : vector<16x32xf32>
    %1041 = arith.truncf %1040 : vector<16x32xf32> to vector<16x32xbf16>
    %c10_375 = arith.constant 10 : index
    %c0_376 = arith.constant 0 : index
    %c0_377 = arith.constant 0 : index
    %1042 = vector.load %arg4[%c10_375, %c0_376, %c0_377] : memref<11x64x128xbf16, #tpu.memory_space<vmem>>, vector<1x32x128xbf16>
    %1043 = vector.shape_cast %1042 : vector<1x32x128xbf16> to vector<32x128xbf16>
    %cst_378 = arith.constant dense<0.000000e+00> : vector<16x128xf32>
    %1044 = tpu.matmul %1041, %1043, %cst_378 {dimension_numbers = #tpu.dot_dimension_numbers<[1], [0], [0], [1], [0, 0, 1, 1], [], []>} : vector<16x32xbf16>, vector<32x128xbf16>, vector<16x128xf32> -> vector<16x128xf32>
    %c15 = arith.constant 15 : index
    %c0_379 = arith.constant 0 : index
    %c0_380 = arith.constant 0 : index
    %1045 = vector.load %arg5[%c15, %c0_379, %c0_380] : memref<16x8x128xf32, #tpu.memory_space<vmem>>, vector<1x1x128xf32>
    %1046 = vector.shape_cast %1045 : vector<1x1x128xf32> to vector<1x128xf32>
    %1047 = vector.broadcast %1046 : vector<1x128xf32> to vector<16x128xf32>
    %1048 = arith.addf %1044, %1047 : vector<16x128xf32>
    %c0_381 = arith.constant 0 : index
    %c0_382 = arith.constant 0 : index
    %1049 = vector.load %arg6[%c0_381, %c0_382] : memref<16x128xf32, #tpu.memory_space<vmem>>, vector<16x128xf32>
    tpu.vector_store %arg6[%c0_381, %c0_382], %1048 {strides = array<i32>} : memref<16x128xf32, #tpu.memory_space<vmem>>, vector<16x128xf32>,
    return
  }
}

</mosaic_0001>

<bundles_post_ra>
// kernel: light_transformer_forward.1
= control target key start
LH: loop header
LB: loop body
LE: loop exit
PB: predicated region body
PF: predicated region fallthrough
CT: control target
= control target key end

     0   :  { %v6074_v1 = vmov 0.0   ;;  %vm6075_vm0 = vmmov 0   ;;  %vm106_vm1 = vcmask 261120   ;;  %s7336_s0 = inlined_call_operand.vmem [shape: f32[16,32], index: 0, kind: input, shape index: {}]   ;;  %s7337_s1 = inlined_call_operand.vmem [shape: f32[16,32], index: 1, kind: input, shape index: {}]   ;;  %s7338_s2 = inlined_call_operand.vmem [shape: f32[1,16], index: 2, kind: input, shape index: {}]   ;;  %s7339_s3 = inlined_call_operand.vmem [shape: f32[1,16], index: 3, kind: input, shape index: {}]   ;;  %s7340_s4 = inlined_call_operand.vmem [shape: bf16[11,64,128], index: 4, kind: input, shape index: {}]   ;;  %s7341_s5 = inlined_call_operand.vmem [shape: f32[16,8,128], index: 5, kind: input, shape index: {}]   ;;  %s7342_s6 = inlined_call_operand.hbm [shape: f32[16,128], index: 6, kind: output, shape index: {}]  }
   0x1   :  { %v6132_v0 = vld [vmem:[%s7340_s4] sm:$0xff]   ;;  %5175 = vmatprep.subr.bf16.mxu0 %v6074_v1  ;;  %5183 = vmatprep.subr.bf16.mxu1 %v6074_v1  ;;  %v6140_v2 = vld [vmem:[%s7340_s4 + $0x8] sm:$0xff]  }
   0x2   :  { %5176 = vmatpush3.bf16.msra.mxu0 %v6132_v0  ;;  %5179 = vmatprep.mubr.msk.bf16.mxu0 %vm6075_vm0, %v6074_v1  ;;  %v6147_v3 = vld [vmem:[%s7336_s0] sm:$0xff]  ;;  %v6152_v4 = vld [vmem:[%s7336_s0 + $0x8] sm:$0xff] }
   0x3   :  { %5177 = vmatprep.subr.bf16.mxu0 %v6074_v1  ;;  %5185 = vmatprep.mubr.msk.bf16.mxu1 %vm6075_vm0, %v6074_v1  ;;  %v89_v5 = vpack.c.bf16 %v6152_v4, %v6147_v3 }
   0x6   :  { %5178 = vmatpush3.bf16.msra.mxu0 %v6140_v2 }
   0x7   :  { %5189 = vmatprep.subr.bf16.mxu0 %v6074_v1 }
   0x9   :  { %5180 = vmatmul.mubr.msk.bf16.vlgmr.msra.gmra.mrb[0].mxu0 %vm106_vm1, %v89_v5 }
   0xa   :  { %5191 = vmatprep.mubr.msk.bf16.mxu0 %vm6075_vm0, %v6074_v1 }
   0xb   :  { %11 = vsyncpa [#allocation3], 0  ;;  %v6167_v6 = vld [vmem:[%s7341_s5] ss:$0 sm:$0xff]  ;;  %s6076_s30 = smov 120   ;;  %s6077_s7 = smov 96   ;;  %v29_v25 = vlaneseq }
   0xc   :  { %s6078_s8 = smov 80   ;;  %s6079_s9 = smov 88   ;;  %vm155_vm2 = vcmask 64512   ;;  %v25_v26 = vld [vmem:[%s7338_s2] sm:$0x1]  ;;  %v6083_v29 = vmov 0  }
   0xd   :  { %s6080_s10 = smov 72   ;;  %s6081_s11 = smov 112   ;;  %v6211_v27 = vshrl.u32 %v29_v25, 7  ;;  %vm26_vm3 = vcmp.gt.f32.partialorder %v25_v26, 0.5  ;;  %v6215_v31 = vand.u32 127, %v29_v25  ;;  %vm203_vm11 = vcmask 130048  }
   0xe   :  { %s6082_s12 = smov 104   ;;  %v58_v30 = vsel %vm26_vm3, 1, %v6083_v29  ;;  %v6084_v34 = vmov -1e+10   ;;  %s6085_s2 = smov 56   ;;  %vm665_vm12 = vcmask 195584  }
   0xf   :  { %v61_v28 = vsub.s32 0, %v6211_v27  ;;  %vm51_vm4 = vcmp.ge.s32.totalorder %v6215_v31, 8  ;;  %vm52_vm5 = vcmp.lt.s32.totalorder %v6215_v31, 16  ;;  %vm41_vm6 = vcmp.lt.s32.totalorder %v6215_v31, 8  ;;  %s6086_s15 = smov 64   ;;  %s6087_s16 = smov 48  }
  0x10   :  { %vm6222_vm8 = vmand %vm51_vm4, %vm52_vm5  ;;  %s6088_s17 = smov 40   ;;  %s6089_s20 = smov 8   ;;  %vm890_vm13 = vcmask 523264   ;;  %vm68_vm15 = vcmp.ge.s32.totalorder %v6211_v27, %v6215_v31 }
  0x11   :  { %v62_v32 = vrot.slane %v58_v30, %v61_v28  ;;  %s6090_s23 = smov 16   ;;  %s6091_s24 = smov 24   ;;  %vm70_vm4 = vmand %vm41_vm6, %vm68_vm15 }
  0x13   :  { %vm63_vm7 = vcmp.eq.s32.totalorder %v62_v32, 1 }
  0x14   :  { %vm64_vm9 = vmand %vm41_vm6, %vm63_vm7 }
  0x15   :  { %vm65_vm10 = vmand %vm6222_vm8, %vm63_vm7  ;;  %v6231_v35 = vsel %vm64_vm9, 0.0, %v6084_v34 }
  0x16   :  { %v6234_v37 = vsel %vm65_vm10, 0.0, %v6084_v34 }
  0xdc   :  { %v144_v7 = vpop.f32.mrb[0].mxu0 }
  0xdd   :  { %v5181_v8 = vpop.f32.mrb[1].mxu0  ;;  %v145_v10 = vadd.f32 %v6167_v6, %v144_v7 }
  0xde   :  { %v147_v9 = vpop.f32.mrb[2].mxu0 }
  0xdf   :  { %v148_v11 = vadd.f32 %v6167_v6, %v147_v9  ;;  %v5182_v12 = vpop.f32.mrb[3].mxu0 }
  0xe1   :  { %v6171_v13 = vpack.c.bf16 %v148_v11, %v145_v10 }
  0xe3   :  { %274 = vrot.lane.b32.xlu1 %v6171_v13, %s6076_s30  ;;  %153 = vrot.lane.b32.xlu0 %v6171_v13, %s6077_s7 }
  0xe7   :  { %397 = vrot.lane.b32.xlu1 %v6171_v13, %s6078_s8  ;;  %276 = vrot.lane.b32.xlu0 %v6171_v13, %s6079_s9 }
  0xeb   :  { %518 = vrot.lane.b32.xlu1 %v6171_v13, %s6080_s10  ;;  %395 = vrot.lane.b32.xlu0 %v6171_v13, %s6081_s11 }
  0xef   :  { %516 = vrot.lane.b32.xlu0 %v6171_v13, %s6082_s12 }
 0x155   :  { %v154_v14 = vpop.permute.xlu0 %153  ;;  %v275_v17 = vpop.permute.xlu1 %274 }
 0x156   :  { %v160_v15 = vsel %vm155_vm2, %v154_v14, 0 }
 0x157   :  { %5184 = vmatpush3.bf16.xpose.msra.mxu1 %v160_v15 }
 0x158   :  { %5195 = vmatprep.subr.bf16.mxu1 %v6074_v1 }
 0x159   :  { %v277_v16 = vpop.permute.xlu0 %276  ;;  %v398_v19 = vpop.permute.xlu1 %397 }
 0x15a   :  { %v282_v18 = vsel %vm155_vm2, %v277_v16, 0  ;;  %v403_v20 = vsel %vm155_vm2, %v398_v19, 0 }
 0x15d   :  { %v519_v21 = vpop.permute.xlu1 %518  ;;  %v396_v22 = vpop.permute.xlu0 %395 }
 0x15e   :  { %5186 = vmatmul.mubr.msk.bf16.vlgmr.msra.gmra.mrb[0].mxu1 %vm155_vm2, %v6171_v13  ;;  %v524_v23 = vsel %vm155_vm2, %v519_v21, 0 }
 0x15f   :  { %5196 = vmatpush3.bf16.xpose.msra.mxu1 %v282_v18  ;;  %5197 = vmatprep.mubr.msk.bf16.mxu1 %vm6075_vm0, %v6074_v1 }
 0x160   :  { %5207 = vmatprep.subr.bf16.mxu1 %v6074_v1 }
 0x161   :  { %v517_v24 = vpop.permute.xlu0 %516 }
 0x166   :  { %5198 = vmatmul.mubr.msk.bf16.vlgmr.msra.gmra.mrb[4].mxu1 %vm155_vm2, %v275_v17 }
 0x167   :  { %5208 = vmatpush3.bf16.xpose.msra.mxu1 %v403_v20  ;;  %5209 = vmatprep.mubr.msk.bf16.mxu1 %vm6075_vm0, %v6074_v1 }
 0x168   :  { %5219 = vmatprep.subr.bf16.mxu1 %v6074_v1 }
 0x16e   :  { %5210 = vmatmul.mubr.msk.bf16.vlgmr.msra.gmra.mrb[8].mxu1 %vm155_vm2, %v396_v22 }
 0x16f   :  { %5220 = vmatpush3.bf16.xpose.msra.mxu1 %v524_v23  ;;  %5221 = vmatprep.mubr.msk.bf16.mxu1 %vm6075_vm0, %v6074_v1 }
 0x170   :  { %5231 = vmatprep.subr.bf16.mxu1 %v6074_v1 }
 0x176   :  { %5222 = vmatmul.mubr.msk.bf16.vlgmr.msra.gmra.mrb[12].mxu1 %vm155_vm2, %v517_v24 }
 0x177   :  { %5235 = vmatprep.mubr.msk.bf16.mxu1 %vm6075_vm0, %v6074_v1 }
 0x231   :  { %v196_v36 = vpop.f32.mrb[0].mxu1 }
 0x232   :  { %v197_v38 = vadd.f32 %v196_v36, %v6231_v35  ;;  %v5187_v39 = vpop.f32.mrb[1].mxu1 }
 0x233   :  { %v199_v40 = vpop.f32.mrb[2].mxu1 }
 0x234   :  { %v200_v41 = vadd.f32 %v199_v40, %v6234_v37  ;;  %v5188_v42 = vpop.f32.mrb[3].mxu1  ;;  %v204_v43 = vsel %vm203_vm11, %v197_v38, -inf }
 0x235   :  { %205 = vmax.xlane.f32.xlu1 %v204_v43 }
 0x236   :  { %v207_v44 = vsel %vm203_vm11, %v200_v41, -inf }
 0x237   :  { %208 = vmax.xlane.f32.xlu0 %v207_v44 }
 0x239   :  { %v318_v45 = vpop.f32.mrb[4].mxu1 }
 0x23a   :  { %v319_v46 = vadd.f32 %v318_v45, %v6231_v35  ;;  %v5199_v47 = vpop.f32.mrb[5].mxu1 }
 0x23b   :  { %v321_v48 = vpop.f32.mrb[6].mxu1 }
 0x23c   :  { %v322_v49 = vadd.f32 %v321_v48, %v6234_v37  ;;  %v5200_v50 = vpop.f32.mrb[7].mxu1  ;;  %v325_v51 = vsel %vm203_vm11, %v319_v46, -inf }
 0x23d   :  { %326 = vmax.xlane.f32.xlu0 %v325_v51 }
 0x23e   :  { %v328_v52 = vsel %vm203_vm11, %v322_v49, -inf }
 0x23f   :  { %329 = vmax.xlane.f32.xlu1 %v328_v52 }
 0x241   :  { %v439_v53 = vpop.f32.mrb[8].mxu1 }
 0x242   :  { %v440_v54 = vadd.f32 %v439_v53, %v6231_v35  ;;  %v5211_v55 = vpop.f32.mrb[9].mxu1 }
 0x243   :  { %v442_v56 = vpop.f32.mrb[10].mxu1 }
 0x244   :  { %v443_v57 = vadd.f32 %v442_v56, %v6234_v37  ;;  %v5212_v58 = vpop.f32.mrb[11].mxu1  ;;  %v446_v59 = vsel %vm203_vm11, %v440_v54, -inf }
 0x245   :  { %447 = vmax.xlane.f32.xlu0 %v446_v59 }
 0x246   :  { %v449_v60 = vsel %vm203_vm11, %v443_v57, -inf }
 0x247   :  { %450 = vmax.xlane.f32.xlu1 %v449_v60 }
 0x249   :  { %v560_v61 = vpop.f32.mrb[12].mxu1 }
 0x24a   :  { %v561_v62 = vadd.f32 %v560_v61, %v6231_v35  ;;  %v5223_v63 = vpop.f32.mrb[13].mxu1 }
 0x24b   :  { %v563_v5 = vpop.f32.mrb[14].mxu1 }
 0x24c   :  { %v564_v7 = vadd.f32 %v563_v5, %v6234_v37  ;;  %v5224_v8 = vpop.f32.mrb[15].mxu1  ;;  %v567_v9 = vsel %vm203_vm11, %v561_v62, -inf }
 0x24d   :  { %568 = vmax.xlane.f32.xlu0 %v567_v9 }
 0x24e   :  { %v570_v10 = vsel %vm203_vm11, %v564_v7, -inf }
 0x24f   :  { %571 = vmax.xlane.f32.xlu1 %v570_v10 }
 0x2c2   :  { %v206_v11 = vpop.xlane.xlu1 %205 }
 0x2c3   :  { %v210_v12 = vsub.f32 %v197_v38, %v206_v11 }
 0x2c4   :  { %v209_v14 = vpop.xlane.xlu0 %208 }
 0x2c5   :  { %v212_v15 = vmul.f32 1.442695, %v210_v12  ;;  %v211_v16 = vsub.f32 %v200_v41, %v209_v14 }
 0x2c7   :  { %5791 = vpow2.f32 %v212_v15  ;;  %v214_v17 = vmul.f32 1.442695, %v211_v16 }
 0x2c9   :  { %5793 = vpow2.f32 %v214_v17 }
 0x2ca   :  { %v327_v18 = vpop.xlane.xlu0 %326 }
 0x2cb   :  { %v331_v19 = vsub.f32 %v319_v46, %v327_v18 }
 0x2cc   :  { %v330_v30 = vpop.xlane.xlu1 %329 }
 0x2cd   :  { %v333_v20 = vmul.f32 1.442695, %v331_v19  ;;  %v332_v32 = vsub.f32 %v322_v49, %v330_v30 }
 0x2cf   :  { %5795 = vpow2.f32 %v333_v20  ;;  %v335_v39 = vmul.f32 1.442695, %v332_v32 }
 0x2d1   :  { %v5792_v21 = vpop.eup %5791  ;;  %5797 = vpow2.f32 %v335_v39 }
 0x2d2   :  { %v216_v22 = vsel %vm203_vm11, %v5792_v21, 0.0  ;;  %v448_v38 = vpop.xlane.xlu0 %447 }
 0x2d3   :  { %v5794_v23 = vpop.eup %5793  ;;  %217 = vadd.xlane.f32.xlu0 %v216_v22  ;;  %v452_v42 = vsub.f32 %v440_v54, %v448_v38 }
 0x2d4   :  { %v219_v24 = vsel %vm203_vm11, %v5794_v23, 0.0  ;;  %v451_v36 = vpop.xlane.xlu1 %450 }
 0x2d5   :  { %220 = vadd.xlane.f32.xlu1 %v219_v24  ;;  %v453_v40 = vsub.f32 %v443_v57, %v451_v36  ;;  %v454_v46 = vmul.f32 1.442695, %v452_v42 }
 0x2d7   :  { %v456_v44 = vmul.f32 1.442695, %v453_v40 }
 0x2d9   :  { %v6254_v25 = vpop.eup %5795  ;;  %5799 = vpow2.f32 %v456_v44 }
 0x2da   :  { %v337_v26 = vsel %vm203_vm11, %v6254_v25, 0.0  ;;  %v569_v43 = vpop.xlane.xlu0 %568  ;;  %5801 = vpow2.f32 %v454_v46 }
 0x2db   :  { %338 = vadd.xlane.f32.xlu0 %v337_v26  ;;  %v573_v47 = vsub.f32 %v561_v62, %v569_v43  ;;  %v5798_v51 = vpop.eup %5797 }
 0x2dc   :  { %v572_v41 = vpop.xlane.xlu1 %571  ;;  %v340_v49 = vsel %vm203_vm11, %v5798_v51, 0.0 }
 0x2dd   :  { %v574_v45 = vsub.f32 %v564_v7, %v572_v41  ;;  %v575_v50 = vmul.f32 1.442695, %v573_v47 }
 0x2df   :  { %v577_v48 = vmul.f32 1.442695, %v574_v45 }
 0x2e1   :  { %5803 = vpow2.f32 %v577_v48 }
 0x2e2   :  { %5805 = vpow2.f32 %v575_v50  ;;  %v6295_v50 = vld [vmem:[%s7340_s4 + $0x20] sm:$0xff]  }
 0x2e3   :  { %v5800_v52 = vpop.eup %5799  ;;  %5232 = vmatpush3.bf16.msra.mxu1 %v6295_v50 }
 0x2e4   :  { %v5802_v53 = vpop.eup %5801  ;;  %v461_v54 = vsel %vm203_vm11, %v5800_v52, 0.0  ;;  %5233 = vmatprep.subr.bf16.mxu1 %v6074_v1 }
 0x2e5   :  { %v458_v56 = vsel %vm203_vm11, %v5802_v53, 0.0 }
 0x2e6   :  { %348 = vrot.lane.b32.xlu1 %v6171_v13, %s6085_s2 }
 0x2eb   :  { %v6264_v55 = vpop.eup %5803 }
 0x2ec   :  { %v5806_v57 = vpop.eup %5805  ;;  %v582_v58 = vsel %vm203_vm11, %v6264_v55, 0.0 }
 0x2ed   :  { %v579_v59 = vsel %vm203_vm11, %v5806_v57, 0.0 }
 0x2f1   :  { %227 = vrot.lane.b32.xlu0 %v6171_v13, %s6086_s15 }
 0x30a   :  { %341 = vadd.xlane.f32.xlu1 %v340_v49 }
 0x30e   :  { %462 = vadd.xlane.f32.xlu1 %v461_v54  ;;  %v6303_v54 = vld [vmem:[%s7340_s4 + $0x28] sm:$0xff]  }
 0x30f   :  { %5234 = vmatpush3.bf16.msra.mxu1 %v6303_v54 }
 0x310   :  { %459 = vadd.xlane.f32.xlu0 %v458_v56  ;;  %5247 = vmatprep.subr.bf16.mxu1 %v6074_v1 }
 0x312   :  { %583 = vadd.xlane.f32.xlu1 %v582_v58 }
 0x314   :  { %580 = vadd.xlane.f32.xlu0 %v579_v59 }
 0x323   :  { %469 = vrot.lane.b32.xlu1 %v6171_v13, %s6087_s16 }
 0x32a   :  { %590 = vrot.lane.b32.xlu0 %v6171_v13, %s6088_s17 }
 0x360   :  { %v218_v60 = vpop.xlane.xlu0 %217 }
 0x361   :  { %5807 = vrcp.f32 %v218_v60 }
 0x362   :  { %v221_v61 = vpop.xlane.xlu1 %220 }
 0x363   :  { %5809 = vrcp.f32 %v221_v61 }
 0x366   :  { %v349_v11 = vpop.permute.xlu1 %348 }
 0x368   :  { %v339_v62 = vpop.xlane.xlu0 %338 }
 0x369   :  { %5811 = vrcp.f32 %v339_v62 }
 0x36b   :  { %v5808_v63 = vpop.eup %5807 }
 0x36c   :  { %v228_v5 = vpop.permute.xlu0 %227  ;;  %v224_v8 = vmul.f32 %v5808_v63, %v5792_v21 }
 0x36d   :  { %v5810_v7 = vpop.eup %5809  ;;  %5190 = vmatpush3.bf16.msra.mxu0 %v228_v5 }
 0x36e   :  { %v225_v9 = vmul.f32 %v5810_v7, %v5794_v23  ;;  %5201 = vmatprep.subr.bf16.mxu0 %v6074_v1 }
 0x370   :  { %v226_v10 = vpack.c.bf16 %v225_v9, %v224_v8 }
 0x372   :  { %5192 = vmatmul.mubr.msk.bf16.vlgmr.msra.gmra.mrb[4].mxu0 %vm203_vm11, %v226_v10 }
 0x373   :  { %5202 = vmatpush3.bf16.msra.mxu0 %v349_v11  ;;  %5203 = vmatprep.mubr.msk.bf16.mxu0 %vm6075_vm0, %v6074_v1  ;;  %v5812_v15 = vpop.eup %5811 }
 0x374   :  { %5213 = vmatprep.subr.bf16.mxu0 %v6074_v1  ;;  %v345_v19 = vmul.f32 %v5812_v15, %v6254_v25 }
 0x397   :  { %v342_v13 = vpop.xlane.xlu1 %341 }
 0x398   :  { %5813 = vrcp.f32 %v342_v13 }
 0x39b   :  { %v463_v12 = vpop.xlane.xlu1 %462 }
 0x39c   :  { %5815 = vrcp.f32 %v463_v12 }
 0x39d   :  { %v460_v14 = vpop.xlane.xlu0 %459 }
 0x39e   :  { %5817 = vrcp.f32 %v460_v14 }
 0x39f   :  { %v584_v16 = vpop.xlane.xlu1 %583 }
 0x3a1   :  { %v581_v17 = vpop.xlane.xlu0 %580 }
 0x3a2   :  { %v5814_v18 = vpop.eup %5813  ;;  %5819 = vrcp.f32 %v581_v17 }
 0x3a3   :  { %v346_v20 = vmul.f32 %v5814_v18, %v5798_v51  ;;  %5821 = vrcp.f32 %v584_v16  ;;  %v470_v23 = vpop.permute.xlu1 %469 }
 0x3a5   :  { %v347_v21 = vpack.c.bf16 %v346_v20, %v345_v19  ;;  %v591_v25 = vpop.permute.xlu0 %590 }
 0x3a6   :  { %v5816_v22 = vpop.eup %5815 }
 0x3a7   :  { %5204 = vmatmul.mubr.msk.bf16.vlgmr.msra.gmra.mrb[8].mxu0 %vm203_vm11, %v347_v21  ;;  %v467_v30 = vmul.f32 %v5816_v22, %v5800_v52  ;;  %v6321_v21 = vld [vmem:[%s7341_s5 + $0x8] ss:$0 sm:$0xff] }
 0x3a8   :  { %v5818_v24 = vpop.eup %5817  ;;  %5214 = vmatpush3.bf16.msra.mxu0 %v470_v23  ;;  %5215 = vmatprep.mubr.msk.bf16.mxu0 %vm6075_vm0, %v6074_v1 }
 0x3a9   :  { %v466_v26 = vmul.f32 %v5818_v24, %v5802_v53  ;;  %5225 = vmatprep.subr.bf16.mxu0 %v6074_v1 }
 0x3ab   :  { %v468_v32 = vpack.c.bf16 %v467_v30, %v466_v26 }
 0x3ac   :  { %v5820_v36 = vpop.eup %5819 }
 0x3ad   :  { %v5822_v38 = vpop.eup %5821  ;;  %v587_v39 = vmul.f32 %v5820_v36, %v5806_v57 }
 0x3ae   :  { %v588_v40 = vmul.f32 %v5822_v38, %v6264_v55 }
 0x3af   :  { %5216 = vmatmul.mubr.msk.bf16.vlgmr.msra.gmra.mrb[12].mxu0 %vm203_vm11, %v468_v32 }
 0x3b0   :  { %5226 = vmatpush3.bf16.msra.mxu0 %v591_v25  ;;  %5227 = vmatprep.mubr.msk.bf16.mxu0 %vm6075_vm0, %v6074_v1  ;;  %v589_v41 = vpack.c.bf16 %v588_v40, %v587_v39 }
 0x3b1   :  { %5239 = vmatprep.subr.bf16.mxu0 %v6074_v1 }
 0x3b7   :  { %5228 = vmatmul.mubr.msk.bf16.vlgmr.msra.gmra.mrb[16].mxu0 %vm203_vm11, %v589_v41 }
 0x3b8   :  { %5243 = vmatprep.mubr.msk.bf16.mxu0 %vm6075_vm0, %v6074_v1 }
 0x445   :  { %v267_v42 = vpop.f32.mrb[4].mxu0 }
 0x446   :  { %v5193_v43 = vpop.f32.mrb[5].mxu0 }
 0x447   :  { %v270_v44 = vpop.f32.mrb[6].mxu0 }
 0x448   :  { %v5194_v45 = vpop.f32.mrb[7].mxu0 }
 0x47a   :  { %v388_v46 = vpop.f32.mrb[8].mxu0 }
 0x47b   :  { %v5205_v47 = vpop.f32.mrb[9].mxu0 }
 0x47c   :  { %v391_v48 = vpop.f32.mrb[10].mxu0 }
 0x47d   :  { %v5675_v51 = vpack.i.bf16 %v391_v48, %v388_v46  ;;  %v5206_v49 = vpop.f32.mrb[11].mxu0 }
 0x47e   :  { %v6348_v49 = vld [vmem:[%s7340_s4 + $0x60] sm:$0xff]  }
 0x47f   :  { %5676 = vrot.lane.b32.xlu1 %v5675_v51, %s6089_s20  ;;  %v6340_v51 = vld [vmem:[%s7340_s4 + $0x48] sm:$0xff]  }
 0x482   :  { %v509_v52 = vpop.f32.mrb[12].mxu0 }
 0x483   :  { %v5217_v53 = vpop.f32.mrb[13].mxu0 }
 0x484   :  { %v512_v55 = vpop.f32.mrb[14].mxu0 }
 0x485   :  { %v5680_v56 = vpack.i.bf16 %v512_v55, %v509_v52  ;;  %v5218_v57 = vpop.f32.mrb[15].mxu0  ;;  %v6354_v52 = vld [vmem:[%s7340_s4 + $0x68] sm:$0xff]  }
 0x487   :  { %5681 = vrot.lane.b32.xlu0 %v5680_v56, %s6090_s23 }
 0x48a   :  { %v630_v58 = vpop.f32.mrb[16].mxu0 }
 0x48b   :  { %v5229_v59 = vpop.f32.mrb[17].mxu0 }
 0x48c   :  { %v633_v60 = vpop.f32.mrb[18].mxu0 }
 0x48d   :  { %v5685_v61 = vpack.i.bf16 %v633_v60, %v630_v58  ;;  %v5230_v62 = vpop.f32.mrb[19].mxu0 }
 0x48e   :  { %v6362_v62 = vld [vmem:[%s7341_s5 + $0x10] ss:$0 sm:$0xff] }
 0x48f   :  { %5686 = vrot.lane.b32.xlu1 %v5685_v61, %s6091_s24 }
 0x4f1   :  { %v5677_v63 = vpop.permute.xlu1 %5676 }
 0x4f2   :  { %v5679_v7 = vunpack.i.h.bf16 %v5677_v63  ;;  %v5678_v8 = vunpack.i.l.bf16 %v5677_v63 }
 0x4f4   :  { %v662_v13 = vsel %vm155_vm2, %v270_v44, %v5679_v7  ;;  %v661_v12 = vsel %vm155_vm2, %v267_v42, %v5678_v8  ;;  %v6368_v8 = vld [vmem:[%s7341_s5 + $0x11] ss:$0 sm:$0xff] }
 0x4f9   :  { %v5682_v5 = vpop.permute.xlu0 %5681 }
 0x4fa   :  { %v5684_v9 = vunpack.i.h.bf16 %v5682_v5  ;;  %v5683_v10 = vunpack.i.l.bf16 %v5682_v5 }
 0x4fc   :  { %v663_v16 = vsel %vm203_vm11, %v661_v12, %v5683_v10  ;;  %v664_v17 = vsel %vm203_vm11, %v662_v13, %v5684_v9  ;;  %v6383_v12 = vld [vmem:[%s7340_s4 + $0x70] sm:$0xff]  }
 0x501   :  { %v5687_v11 = vpop.permute.xlu1 %5686 }
 0x502   :  { %v5689_v14 = vunpack.i.h.bf16 %v5687_v11  ;;  %v5688_v15 = vunpack.i.l.bf16 %v5687_v11 }
 0x504   :  { %v666_v18 = vsel %vm665_vm12, %v663_v16, %v5688_v15  ;;  %v667_v19 = vsel %vm665_vm12, %v664_v17, %v5689_v14 }
 0x505   :  { %v675_v20 = vpack.c.bf16 %v667_v19, %v666_v18 }
 0x507   :  { %5236 = vmatmul.mubr.msk.bf16.vlgmr.msra.gmra.mrb[16].mxu1 %vm106_vm1, %v675_v20 }
 0x508   :  { %5255 = vmatprep.mubr.msk.bf16.mxu1 %vm6075_vm0, %v6074_v1  ;;  %5248 = vmatpush3.bf16.msra.mxu1 %v6348_v49 }
 0x509   :  { %5249 = vmatprep.subr.bf16.mxu1 %v6074_v1 }
 0x50c   :  { %5250 = vmatpush3.bf16.msra.mxu1 %v6354_v52 }
 0x50d   :  { %5251 = vmatprep.subr.bf16.mxu1 %v6074_v1 }
 0x510   :  { %5252 = vmatpush3.bf16.msra.mxu1 %v6383_v12 }
 0x511   :  { %5253 = vmatprep.subr.bf16.mxu1 %v6074_v1 }
 0x5da   :  { %v729_v22 = vpop.f32.mrb[16].mxu1 }
 0x5db   :  { %v730_v23 = vadd.f32 %v6321_v21, %v729_v22  ;;  %v5237_v24 = vpop.f32.mrb[17].mxu1 }
 0x5dc   :  { %v732_v26 = vpop.f32.mrb[18].mxu1  ;;  %v4863_v24 = vld [vmem:[%s7341_s5 + $0x20] ss:$0 sm:$0xff] }
 0x5dd   :  { %v733_v30 = vadd.f32 %v6321_v21, %v732_v26  ;;  %v5238_v32 = vpop.f32.mrb[19].mxu1  ;;  %v739_v36 = vadd.f32 %v730_v23, %v6147_v3 }
 0x5df   :  { %v741_v25 = vsel %vm106_vm1, %v739_v36, 0.0  ;;  %v740_v38 = vadd.f32 %v733_v30, %v6152_v4  ;;  %v6334_v4 = vld [vmem:[%s7340_s4 + $0x40] sm:$0xff]  }
 0x5e0   :  { %742 = vadd.xlane.f32.xlu0 %v741_v25  ;;  %5240 = vmatpush3.bf16.msra.mxu0 %v6334_v4 }
 0x5e1   :  { %v744_v39 = vsel %vm106_vm1, %v740_v38, 0.0  ;;  %5241 = vmatprep.subr.bf16.mxu0 %v6074_v1 }
 0x5e2   :  { %745 = vadd.xlane.f32.xlu1 %v744_v39 }
 0x5e4   :  { %5242 = vmatpush3.bf16.msra.mxu0 %v6340_v51 }
 0x5e5   :  { %5259 = vmatprep.subr.bf16.mxu0 %v6074_v1 }
 0x66d   :  { %v743_v40 = vpop.xlane.xlu0 %742 }
 0x66e   :  { %v748_v41 = vmul.f32 0.03125, %v743_v40 }
 0x66f   :  { %v746_v42 = vpop.xlane.xlu1 %745 }
 0x670   :  { %v750_v43 = vsub.f32 %v739_v36, %v748_v41  ;;  %v749_v44 = vmul.f32 0.03125, %v746_v42 }
 0x672   :  { %v751_v45 = vsub.f32 %v740_v38, %v749_v44  ;;  %v752_v46 = vmul.f32 %v750_v43, %v750_v43 }
 0x674   :  { %v754_v47 = vsel %vm106_vm1, %v752_v46, 0.0  ;;  %v753_v48 = vmul.f32 %v751_v45, %v751_v45 }
 0x675   :  { %755 = vadd.xlane.f32.xlu0 %v754_v47 }
 0x676   :  { %v757_v3 = vsel %vm106_vm1, %v753_v48, 0.0 }
 0x679   :  { %758 = vadd.xlane.f32.xlu0 %v757_v3 }
 0x702   :  { %v756_v53 = vpop.xlane.xlu0 %755 }
 0x703   :  { %v760_v55 = vmul.f32 0.03125, %v756_v53 }
 0x705   :  { %v762_v56 = vadd.f32 1e-05, %v760_v55 }
 0x706   :  { %v759_v57 = vpop.xlane.xlu0 %758 }
 0x707   :  { %5823 = vrsqrt.f32 %v762_v56  ;;  %v761_v58 = vmul.f32 0.03125, %v759_v57 }
 0x709   :  { %v763_v59 = vadd.f32 1e-05, %v761_v58 }
 0x70b   :  { %5825 = vrsqrt.f32 %v763_v59 }
 0x711   :  { %v5824_v60 = vpop.eup %5823 }
 0x712   :  { %v766_v61 = vmul.f32 %v5824_v60, %v750_v43 }
 0x714   :  { %v772_v5 = vmul.f32 %v6362_v62, %v766_v61 }
 0x715   :  { %v5826_v63 = vpop.eup %5825 }
 0x716   :  { %v767_v7 = vmul.f32 %v5826_v63, %v751_v45  ;;  %v778_v10 = vadd.f32 %v6368_v8, %v772_v5 }
 0x718   :  { %v773_v9 = vmul.f32 %v6362_v62, %v767_v7  ;;  %v4871_v7 = vld [vmem:[%s7341_s5 + $0x28] ss:$0 sm:$0xff] }
 0x71a   :  { %v779_v11 = vadd.f32 %v6368_v8, %v773_v9 }
 0x71c   :  { %v798_v13 = vpack.c.bf16 %v779_v11, %v778_v10 }
 0x71e   :  { %5244 = vmatmul.mubr.msk.bf16.vlgmr.msra.gmra.mrb[20].mxu0 %vm106_vm1, %v798_v13 }
 0x71f   :  { %5260 = vmatpush3.bf16.msra.mxu0 %v6132_v0  ;;  %5263 = vmatprep.mubr.msk.bf16.mxu0 %vm6075_vm0, %v6074_v1  ;;  %v6390_v0 = vld [vmem:[%s7340_s4 + $0x78] sm:$0xff]  }
 0x720   :  { %5261 = vmatprep.subr.bf16.mxu0 %v6074_v1  ;;  %5254 = vmatpush3.bf16.msra.mxu1 %v6390_v0 }
 0x721   :  { %5273 = vmatprep.subr.bf16.mxu1 %v6074_v1 }
 0x723   :  { %5262 = vmatpush3.bf16.msra.mxu0 %v6140_v2  ;;  %v6397_v2 = vld [vmem:[%s7341_s5 + $0x18] ss:$0 sm:$0xff] }
 0x724   :  { %5267 = vmatprep.subr.bf16.mxu0 %v6074_v1 }
 0x7f1   :  { %v852_v14 = vpop.f32.mrb[20].mxu0 }
 0x7f2   :  { %v853_v15 = vadd.f32 %v6397_v2, %v852_v14  ;;  %v5245_v16 = vpop.f32.mrb[21].mxu0  ;;  %v4872_v14 = vld [vmem:[%s7341_s5 + $0x29] ss:$0 sm:$0xff] }
 0x7f3   :  { %v855_v17 = vpop.f32.mrb[22].mxu0 }
 0x7f4   :  { %v856_v18 = vadd.f32 %v6397_v2, %v855_v17  ;;  %v5246_v19 = vpop.f32.mrb[23].mxu0  ;;  %v859_v20 = vmax.f32 %v853_v15, 0.0 }
 0x7f6   :  { %v860_v22 = vmax.f32 %v856_v18, 0.0 }
 0x7f8   :  { %v861_v23 = vpack.c.bf16 %v860_v22, %v859_v20 }
 0x7fa   :  { %5256 = vmatmul.mubr.msk.bf16.vlgmr.msra.gmra.mrb[20].mxu1 %vm890_vm13, %v861_v23 }
 0x7fb   :  { %5275 = vmatprep.mubr.msk.bf16.mxu1 %vm6075_vm0, %v6074_v1 }
 0x8cd   :  { %v928_v26 = vpop.f32.mrb[20].mxu1 }
 0x8ce   :  { %v929_v30 = vadd.f32 %v4863_v24, %v928_v26  ;;  %v5257_v32 = vpop.f32.mrb[21].mxu1 }
 0x8cf   :  { %v931_v36 = vpop.f32.mrb[22].mxu1 }
 0x8d0   :  { %v932_v25 = vadd.f32 %v4863_v24, %v931_v36  ;;  %v5258_v38 = vpop.f32.mrb[23].mxu1  ;;  %v938_v39 = vadd.f32 %v929_v30, %v778_v10 }
 0x8d2   :  { %v940_v40 = vsel %vm106_vm1, %v938_v39, 0.0  ;;  %v939_v41 = vadd.f32 %v932_v25, %v779_v11 }
 0x8d3   :  { %941 = vadd.xlane.f32.xlu1 %v940_v40 }
 0x8d4   :  { %v943_v42 = vsel %vm106_vm1, %v939_v41, 0.0 }
 0x8d5   :  { %944 = vadd.xlane.f32.xlu0 %v943_v42 }
 0x960   :  { %v942_v43 = vpop.xlane.xlu1 %941 }
 0x961   :  { %v946_v44 = vmul.f32 0.03125, %v942_v43 }
 0x962   :  { %v945_v45 = vpop.xlane.xlu0 %944 }
 0x963   :  { %v948_v46 = vsub.f32 %v938_v39, %v946_v44  ;;  %v947_v47 = vmul.f32 0.03125, %v945_v45 }
 0x965   :  { %v949_v48 = vsub.f32 %v939_v41, %v947_v47  ;;  %v950_v3 = vmul.f32 %v948_v46, %v948_v46 }
 0x967   :  { %v952_v53 = vsel %vm106_vm1, %v950_v3, 0.0  ;;  %v951_v55 = vmul.f32 %v949_v48, %v949_v48 }
 0x968   :  { %953 = vadd.xlane.f32.xlu1 %v952_v53 }
 0x969   :  { %v955_v56 = vsel %vm106_vm1, %v951_v55, 0.0 }
 0x96a   :  { %956 = vadd.xlane.f32.xlu0 %v955_v56 }
 0x9f5   :  { %v954_v57 = vpop.xlane.xlu1 %953 }
 0x9f6   :  { %v958_v58 = vmul.f32 0.03125, %v954_v57 }
 0x9f7   :  { %v957_v59 = vpop.xlane.xlu0 %956 }
 0x9f8   :  { %v960_v60 = vadd.f32 1e-05, %v958_v58  ;;  %v959_v61 = vmul.f32 0.03125, %v957_v59 }
 0x9fa   :  { %5827 = vrsqrt.f32 %v960_v60  ;;  %v961_v63 = vadd.f32 1e-05, %v959_v61 }
 0x9fc   :  { %5829 = vrsqrt.f32 %v961_v63 }
 0xa04   :  { %v5828_v5 = vpop.eup %5827 }
 0xa05   :  { %v964_v9 = vmul.f32 %v5828_v5, %v948_v46 }
 0xa06   :  { %v5830_v10 = vpop.eup %5829 }
 0xa07   :  { %v970_v11 = vmul.f32 %v4871_v7, %v964_v9  ;;  %v965_v13 = vmul.f32 %v5830_v10, %v949_v48 }
 0xa09   :  { %v971_v15 = vmul.f32 %v4871_v7, %v965_v13  ;;  %v6417_v16 = vadd.f32 %v4872_v14, %v970_v11 }
 0xa0b   :  { %v6419_v17 = vadd.f32 %v4872_v14, %v971_v15 }
 0xa0d   :  { %v978_v18 = vpack.c.bf16 %v6419_v17, %v6417_v16 }
 0xa0f   :  { %5264 = vmatmul.mubr.msk.bf16.vlgmr.msra.gmra.mrb[24].mxu0 %vm106_vm1, %v978_v18 }
 0xa10   :  { %5269 = vmatprep.mubr.msk.bf16.mxu0 %vm6075_vm0, %v6074_v1 }
 0xae2   :  { %v1016_v19 = vpop.f32.mrb[24].mxu0 }
 0xae3   :  { %v5265_v20 = vpop.f32.mrb[25].mxu0  ;;  %v1017_v23 = vadd.f32 %v6167_v6, %v1016_v19 }
 0xae4   :  { %v1019_v22 = vpop.f32.mrb[26].mxu0 }
 0xae5   :  { %v1020_v24 = vadd.f32 %v6167_v6, %v1019_v22  ;;  %v5266_v26 = vpop.f32.mrb[27].mxu0 }
 0xae7   :  { %v6428_v30 = vpack.c.bf16 %v1020_v24, %v1017_v23 }
 0xae9   :  { %1146 = vrot.lane.b32.xlu0 %v6428_v30, %s6079_s9  ;;  %1025 = vrot.lane.b32.xlu1 %v6428_v30, %s6077_s7 }
 0xaed   :  { %1265 = vrot.lane.b32.xlu0 %v6428_v30, %s6081_s11  ;;  %1144 = vrot.lane.b32.xlu1 %v6428_v30, %s6076_s30 }
 0xaf1   :  { %1386 = vrot.lane.b32.xlu0 %v6428_v30, %s6082_s12  ;;  %1267 = vrot.lane.b32.xlu1 %v6428_v30, %s6078_s8 }
 0xaf5   :  { %1388 = vrot.lane.b32.xlu1 %v6428_v30, %s6080_s10 }
 0xb5b   :  { %v1026_v6 = vpop.permute.xlu1 %1025  ;;  %v1147_v36 = vpop.permute.xlu0 %1146 }
 0xb5c   :  { %v1031_v32 = vsel %vm155_vm2, %v1026_v6, 0  ;;  %v1152_v38 = vsel %vm155_vm2, %v1147_v36, 0 }
 0xb5d   :  { %5268 = vmatpush3.bf16.xpose.msra.mxu0 %v1031_v32 }
 0xb5e   :  { %5279 = vmatprep.subr.bf16.mxu0 %v6074_v1 }
 0xb5f   :  { %v1145_v25 = vpop.permute.xlu1 %1144  ;;  %v1266_v42 = vpop.permute.xlu0 %1265 }
 0xb63   :  { %v1268_v39 = vpop.permute.xlu1 %1267  ;;  %v1387_v44 = vpop.permute.xlu0 %1386 }
 0xb64   :  { %5270 = vmatmul.mubr.msk.bf16.vlgmr.msra.gmra.mrb[28].mxu0 %vm155_vm2, %v6428_v30  ;;  %v1273_v40 = vsel %vm155_vm2, %v1268_v39, 0 }
 0xb65   :  { %5280 = vmatpush3.bf16.xpose.msra.mxu0 %v1152_v38  ;;  %5281 = vmatprep.mubr.msk.bf16.mxu0 %vm6075_vm0, %v6074_v1 }
 0xb66   :  { %5291 = vmatprep.subr.bf16.mxu0 %v6074_v1 }
 0xb67   :  { %v1389_v41 = vpop.permute.xlu1 %1388 }
 0xb68   :  { %v1394_v43 = vsel %vm155_vm2, %v1389_v41, 0 }
 0xb6c   :  { %5282 = vmatmul.mubr.msk.bf16.vlgmr.msra.gmra.mrb[32].mxu0 %vm155_vm2, %v1145_v25 }
 0xb6d   :  { %5292 = vmatpush3.bf16.xpose.msra.mxu0 %v1273_v40  ;;  %5293 = vmatprep.mubr.msk.bf16.mxu0 %vm6075_vm0, %v6074_v1 }
 0xb6e   :  { %5303 = vmatprep.subr.bf16.mxu0 %v6074_v1 }
 0xb74   :  { %5294 = vmatmul.mubr.msk.bf16.vlgmr.msra.gmra.mrb[36].mxu0 %vm155_vm2, %v1266_v42 }
 0xb75   :  { %5304 = vmatpush3.bf16.xpose.msra.mxu0 %v1394_v43  ;;  %5305 = vmatprep.mubr.msk.bf16.mxu0 %vm6075_vm0, %v6074_v1 }
 0xb76   :  { %5315 = vmatprep.subr.bf16.mxu0 %v6074_v1 }
 0xb7c   :  { %5306 = vmatmul.mubr.msk.bf16.vlgmr.msra.gmra.mrb[40].mxu0 %vm155_vm2, %v1387_v44 }
 0xb7d   :  { %5316 = vmatpush3.bf16.msra.mxu0 %v6295_v50  ;;  %5319 = vmatprep.mubr.msk.bf16.mxu0 %vm6075_vm0, %v6074_v1 }
 0xb7e   :  { %5317 = vmatprep.subr.bf16.mxu0 %v6074_v1 }
 0xb81   :  { %5318 = vmatpush3.bf16.msra.mxu0 %v6303_v54 }
 0xb82   :  { %5331 = vmatprep.subr.bf16.mxu0 %v6074_v1 }
 0xc37   :  { %v1067_v45 = vpop.f32.mrb[28].mxu0 }
 0xc38   :  { %v1068_v46 = vadd.f32 %v1067_v45, %v6231_v35  ;;  %v5271_v47 = vpop.f32.mrb[29].mxu0 }
 0xc39   :  { %v1070_v48 = vpop.f32.mrb[30].mxu0 }
 0xc3a   :  { %v1071_v3 = vadd.f32 %v1070_v48, %v6234_v37  ;;  %v5272_v53 = vpop.f32.mrb[31].mxu0  ;;  %v1074_v55 = vsel %vm203_vm11, %v1068_v46, -inf }
 0xc3b   :  { %1075 = vmax.xlane.f32.xlu1 %v1074_v55 }
 0xc3c   :  { %v1077_v50 = vsel %vm203_vm11, %v1071_v3, -inf }
 0xc3d   :  { %1078 = vmax.xlane.f32.xlu0 %v1077_v50 }
 0xc3f   :  { %v1188_v56 = vpop.f32.mrb[32].mxu0 }
 0xc40   :  { %v1189_v57 = vadd.f32 %v1188_v56, %v6231_v35  ;;  %v5283_v54 = vpop.f32.mrb[33].mxu0 }
 0xc41   :  { %v1191_v58 = vpop.f32.mrb[34].mxu0 }
 0xc42   :  { %v1192_v59 = vadd.f32 %v1191_v58, %v6234_v37  ;;  %v5284_v60 = vpop.f32.mrb[35].mxu0  ;;  %v1195_v61 = vsel %vm203_vm11, %v1189_v57, -inf }
 0xc43   :  { %1196 = vmax.xlane.f32.xlu0 %v1195_v61 }
 0xc44   :  { %v1198_v63 = vsel %vm203_vm11, %v1192_v59, -inf }
 0xc45   :  { %1199 = vmax.xlane.f32.xlu1 %v1198_v63 }
 0xc47   :  { %v1309_v5 = vpop.f32.mrb[36].mxu0 }
 0xc48   :  { %v1310_v7 = vadd.f32 %v1309_v5, %v6231_v35  ;;  %v5295_v9 = vpop.f32.mrb[37].mxu0 }
 0xc49   :  { %v1312_v10 = vpop.f32.mrb[38].mxu0 }
 0xc4a   :  { %v1313_v11 = vadd.f32 %v1312_v10, %v6234_v37  ;;  %v5296_v13 = vpop.f32.mrb[39].mxu0  ;;  %v1316_v14 = vsel %vm203_vm11, %v1310_v7, -inf }
 0xc4b   :  { %1317 = vmax.xlane.f32.xlu0 %v1316_v14 }
 0xc4c   :  { %v1319_v15 = vsel %vm203_vm11, %v1313_v11, -inf }
 0xc4d   :  { %1320 = vmax.xlane.f32.xlu1 %v1319_v15 }
 0xc4f   :  { %v1430_v18 = vpop.f32.mrb[40].mxu0 }
 0xc50   :  { %v1431_v19 = vadd.f32 %v1430_v18, %v6231_v35  ;;  %v5307_v20 = vpop.f32.mrb[41].mxu0 }
 0xc51   :  { %v1433_v22 = vpop.f32.mrb[42].mxu0 }
 0xc52   :  { %v1434_v23 = vadd.f32 %v1433_v22, %v6234_v37  ;;  %v5308_v24 = vpop.f32.mrb[43].mxu0  ;;  %v1437_v26 = vsel %vm203_vm11, %v1431_v19, -inf }
 0xc53   :  { %1438 = vmax.xlane.f32.xlu0 %v1437_v26 }
 0xc54   :  { %v1440_v6 = vsel %vm203_vm11, %v1434_v23, -inf }
 0xc55   :  { %1441 = vmax.xlane.f32.xlu1 %v1440_v6 }
 0xcc8   :  { %v1076_v32 = vpop.xlane.xlu1 %1075 }
 0xcc9   :  { %v1080_v36 = vsub.f32 %v1068_v46, %v1076_v32 }
 0xcca   :  { %v1079_v25 = vpop.xlane.xlu0 %1078 }
 0xccb   :  { %v1082_v38 = vmul.f32 1.442695, %v1080_v36  ;;  %v1081_v39 = vsub.f32 %v1071_v3, %v1079_v25 }
 0xccd   :  { %5831 = vpow2.f32 %v1082_v38  ;;  %v1084_v40 = vmul.f32 1.442695, %v1081_v39 }
 0xccf   :  { %5833 = vpow2.f32 %v1084_v40 }
 0xcd0   :  { %v1197_v41 = vpop.xlane.xlu0 %1196 }
 0xcd1   :  { %v1201_v42 = vsub.f32 %v1189_v57, %v1197_v41 }
 0xcd2   :  { %v1200_v3 = vpop.xlane.xlu1 %1199 }
 0xcd3   :  { %v1203_v43 = vmul.f32 1.442695, %v1201_v42  ;;  %v1202_v55 = vsub.f32 %v1192_v59, %v1200_v3 }
 0xcd5   :  { %5835 = vpow2.f32 %v1203_v43  ;;  %v1205_v57 = vmul.f32 1.442695, %v1202_v55 }
 0xcd7   :  { %v5832_v44 = vpop.eup %5831  ;;  %5837 = vpow2.f32 %v1205_v57 }
 0xcd8   :  { %v1086_v45 = vsel %vm203_vm11, %v5832_v44, 0.0  ;;  %v1318_v56 = vpop.xlane.xlu0 %1317 }
 0xcd9   :  { %v5834_v47 = vpop.eup %5833  ;;  %1087 = vadd.xlane.f32.xlu0 %v1086_v45  ;;  %v1322_v60 = vsub.f32 %v1310_v7, %v1318_v56 }
 0xcda   :  { %v1089_v48 = vsel %vm203_vm11, %v5834_v47, 0.0  ;;  %v1321_v50 = vpop.xlane.xlu1 %1320 }
 0xcdb   :  { %1090 = vadd.xlane.f32.xlu1 %v1089_v48  ;;  %v1323_v54 = vsub.f32 %v1313_v11, %v1321_v50  ;;  %v1324_v9 = vmul.f32 1.442695, %v1322_v60 }
 0xcdd   :  { %v1326_v63 = vmul.f32 1.442695, %v1323_v54 }
 0xcdf   :  { %v6487_v53 = vpop.eup %5835  ;;  %5839 = vpow2.f32 %v1326_v63 }
 0xce0   :  { %v1207_v46 = vsel %vm203_vm11, %v6487_v53, 0.0  ;;  %v1439_v61 = vpop.xlane.xlu0 %1438  ;;  %5841 = vpow2.f32 %v1324_v9 }
 0xce1   :  { %1208 = vadd.xlane.f32.xlu0 %v1207_v46  ;;  %v1443_v10 = vsub.f32 %v1431_v19, %v1439_v61  ;;  %v5838_v15 = vpop.eup %5837 }
 0xce2   :  { %v1442_v58 = vpop.xlane.xlu1 %1441  ;;  %v1210_v59 = vsel %vm203_vm11, %v5838_v15, 0.0 }
 0xce3   :  { %v1444_v5 = vsub.f32 %v1434_v23, %v1442_v58  ;;  %v1445_v14 = vmul.f32 1.442695, %v1443_v10 }
 0xce5   :  { %v1447_v13 = vmul.f32 1.442695, %v1444_v5 }
 0xce7   :  { %5843 = vpow2.f32 %v1447_v13 }
 0xce8   :  { %5845 = vpow2.f32 %v1445_v14 }
 0xce9   :  { %v5840_v18 = vpop.eup %5839 }
 0xcea   :  { %v5842_v11 = vpop.eup %5841  ;;  %v1331_v7 = vsel %vm203_vm11, %v5840_v18, 0.0 }
 0xceb   :  { %v1328_v22 = vsel %vm203_vm11, %v5842_v11, 0.0 }
 0xcec   :  { %1218 = vrot.lane.b32.xlu1 %v6428_v30, %s6085_s2 }
 0xcf1   :  { %v6497_v20 = vpop.eup %5843 }
 0xcf2   :  { %v5846_v19 = vpop.eup %5845  ;;  %v1452_v23 = vsel %vm203_vm11, %v6497_v20, 0.0 }
 0xcf3   :  { %v1449_v24 = vsel %vm203_vm11, %v5846_v19, 0.0 }
 0xcf7   :  { %1097 = vrot.lane.b32.xlu0 %v6428_v30, %s6086_s15 }
 0xd10   :  { %1211 = vadd.xlane.f32.xlu1 %v1210_v59 }
 0xd14   :  { %1332 = vadd.xlane.f32.xlu1 %v1331_v7 }
 0xd16   :  { %1329 = vadd.xlane.f32.xlu0 %v1328_v22 }
 0xd18   :  { %1453 = vadd.xlane.f32.xlu1 %v1452_v23 }
 0xd1a   :  { %1450 = vadd.xlane.f32.xlu0 %v1449_v24 }
 0xd29   :  { %1339 = vrot.lane.b32.xlu1 %v6428_v30, %s6087_s16 }
 0xd30   :  { %1460 = vrot.lane.b32.xlu0 %v6428_v30, %s6088_s17 }
 0xd66   :  { %v1088_v26 = vpop.xlane.xlu0 %1087 }
 0xd67   :  { %5847 = vrcp.f32 %v1088_v26 }
 0xd68   :  { %v1091_v6 = vpop.xlane.xlu1 %1090 }
 0xd69   :  { %5849 = vrcp.f32 %v1091_v6 }
 0xd6c   :  { %v1219_v42 = vpop.permute.xlu1 %1218 }
 0xd6e   :  { %v1209_v32 = vpop.xlane.xlu0 %1208 }
 0xd6f   :  { %5851 = vrcp.f32 %v1209_v32 }
 0xd71   :  { %v5848_v36 = vpop.eup %5847 }
 0xd72   :  { %v1098_v25 = vpop.permute.xlu0 %1097  ;;  %v1094_v39 = vmul.f32 %v5848_v36, %v5832_v44 }
 0xd73   :  { %v5850_v38 = vpop.eup %5849  ;;  %5274 = vmatpush3.bf16.msra.mxu1 %v1098_v25 }
 0xd74   :  { %v1095_v40 = vmul.f32 %v5850_v38, %v5834_v47  ;;  %5285 = vmatprep.subr.bf16.mxu1 %v6074_v1 }
 0xd76   :  { %v1096_v41 = vpack.c.bf16 %v1095_v40, %v1094_v39 }
 0xd78   :  { %5276 = vmatmul.mubr.msk.bf16.vlgmr.msra.gmra.mrb[24].mxu1 %vm203_vm11, %v1096_v41 }
 0xd79   :  { %5286 = vmatpush3.bf16.msra.mxu1 %v1219_v42  ;;  %5287 = vmatprep.mubr.msk.bf16.mxu1 %vm6075_vm0, %v6074_v1  ;;  %v5852_v44 = vpop.eup %5851 }
 0xd7a   :  { %5297 = vmatprep.subr.bf16.mxu1 %v6074_v1  ;;  %v1215_v3 = vmul.f32 %v5852_v44, %v6487_v53 }
 0xd9d   :  { %v1212_v30 = vpop.xlane.xlu1 %1211 }
 0xd9e   :  { %5853 = vrcp.f32 %v1212_v30 }
 0xda1   :  { %v1333_v43 = vpop.xlane.xlu1 %1332 }
 0xda2   :  { %5855 = vrcp.f32 %v1333_v43 }
 0xda3   :  { %v1330_v45 = vpop.xlane.xlu0 %1329 }
 0xda4   :  { %5857 = vrcp.f32 %v1330_v45 }
 0xda5   :  { %v1454_v47 = vpop.xlane.xlu1 %1453 }
 0xda7   :  { %v1451_v48 = vpop.xlane.xlu0 %1450 }
 0xda8   :  { %v5854_v46 = vpop.eup %5853  ;;  %5859 = vrcp.f32 %v1451_v48 }
 0xda9   :  { %v1216_v55 = vmul.f32 %v5854_v46, %v5838_v15  ;;  %5861 = vrcp.f32 %v1454_v47  ;;  %v1340_v57 = vpop.permute.xlu1 %1339 }
 0xdab   :  { %v1217_v50 = vpack.c.bf16 %v1216_v55, %v1215_v3  ;;  %v1461_v53 = vpop.permute.xlu0 %1460 }
 0xdac   :  { %v5856_v56 = vpop.eup %5855 }
 0xdad   :  { %5288 = vmatmul.mubr.msk.bf16.vlgmr.msra.gmra.mrb[28].mxu1 %vm203_vm11, %v1217_v50  ;;  %v1337_v60 = vmul.f32 %v5856_v56, %v5840_v18 }
 0xdae   :  { %v5858_v54 = vpop.eup %5857  ;;  %5298 = vmatpush3.bf16.msra.mxu1 %v1340_v57  ;;  %5299 = vmatprep.mubr.msk.bf16.mxu1 %vm6075_vm0, %v6074_v1 }
 0xdaf   :  { %v1336_v58 = vmul.f32 %v5858_v54, %v5842_v11  ;;  %5309 = vmatprep.subr.bf16.mxu1 %v6074_v1 }
 0xdb1   :  { %v1338_v61 = vpack.c.bf16 %v1337_v60, %v1336_v58 }
 0xdb2   :  { %v5860_v63 = vpop.eup %5859 }
 0xdb3   :  { %v5862_v5 = vpop.eup %5861  ;;  %v1457_v9 = vmul.f32 %v5860_v63, %v5846_v19 }
 0xdb4   :  { %v1458_v10 = vmul.f32 %v5862_v5, %v6497_v20 }
 0xdb5   :  { %5300 = vmatmul.mubr.msk.bf16.vlgmr.msra.gmra.mrb[32].mxu1 %vm203_vm11, %v1338_v61 }
 0xdb6   :  { %5310 = vmatpush3.bf16.msra.mxu1 %v1461_v53  ;;  %5311 = vmatprep.mubr.msk.bf16.mxu1 %vm6075_vm0, %v6074_v1  ;;  %v1459_v13 = vpack.c.bf16 %v1458_v10, %v1457_v9 }
 0xdb7   :  { %5323 = vmatprep.subr.bf16.mxu1 %v6074_v1 }
 0xdbd   :  { %5312 = vmatmul.mubr.msk.bf16.vlgmr.msra.gmra.mrb[36].mxu1 %vm203_vm11, %v1459_v13 }
 0xdbe   :  { %5324 = vmatpush3.bf16.msra.mxu1 %v6334_v4  ;;  %5327 = vmatprep.mubr.msk.bf16.mxu1 %vm6075_vm0, %v6074_v1 }
 0xdbf   :  { %5325 = vmatprep.subr.bf16.mxu1 %v6074_v1 }
 0xdc2   :  { %5326 = vmatpush3.bf16.msra.mxu1 %v6340_v51 }
 0xdc3   :  { %5343 = vmatprep.subr.bf16.mxu1 %v6074_v1 }
 0xe4b   :  { %v1137_v14 = vpop.f32.mrb[24].mxu1 }
 0xe4c   :  { %v5277_v15 = vpop.f32.mrb[25].mxu1 }
 0xe4d   :  { %v1140_v59 = vpop.f32.mrb[26].mxu1 }
 0xe4e   :  { %v5278_v18 = vpop.f32.mrb[27].mxu1 }
 0xe80   :  { %v1258_v11 = vpop.f32.mrb[28].mxu1 }
 0xe81   :  { %v5289_v7 = vpop.f32.mrb[29].mxu1 }
 0xe82   :  { %v1261_v20 = vpop.f32.mrb[30].mxu1 }
 0xe83   :  { %v5690_v22 = vpack.i.bf16 %v1261_v20, %v1258_v11  ;;  %v5290_v19 = vpop.f32.mrb[31].mxu1 }
 0xe85   :  { %5691 = vrot.lane.b32.xlu1 %v5690_v22, %s6089_s20 }
 0xe88   :  { %v1379_v4 = vpop.f32.mrb[32].mxu1 }
 0xe89   :  { %v5301_v23 = vpop.f32.mrb[33].mxu1 }
 0xe8a   :  { %v1382_v24 = vpop.f32.mrb[34].mxu1 }
 0xe8b   :  { %v5695_v26 = vpack.i.bf16 %v1382_v24, %v1379_v4  ;;  %v5302_v6 = vpop.f32.mrb[35].mxu1 }
 0xe8d   :  { %5696 = vrot.lane.b32.xlu0 %v5695_v26, %s6090_s23 }
 0xe90   :  { %v1500_v51 = vpop.f32.mrb[36].mxu1 }
 0xe91   :  { %v5313_v32 = vpop.f32.mrb[37].mxu1 }
 0xe92   :  { %v1503_v36 = vpop.f32.mrb[38].mxu1 }
 0xe93   :  { %v5700_v25 = vpack.i.bf16 %v1503_v36, %v1500_v51  ;;  %v5314_v38 = vpop.f32.mrb[39].mxu1 }
 0xe95   :  { %5701 = vrot.lane.b32.xlu1 %v5700_v25, %s6091_s24  ;;  %v5775_v25 = vld [vmem:[%s7340_s4 + $0x80] sm:$0xff]  }
 0xef7   :  { %v5692_v39 = vpop.permute.xlu1 %5691 }
 0xef8   :  { %v5694_v41 = vunpack.i.h.bf16 %v5692_v39  ;;  %v5693_v42 = vunpack.i.l.bf16 %v5692_v39  ;;  %v6584_v39 = vld [vmem:[%s7337_s1 + $0x8] sm:$0xff] }
 0xefa   :  { %v1532_v44 = vsel %vm155_vm2, %v1140_v59, %v5694_v41  ;;  %v1531_v47 = vsel %vm155_vm2, %v1137_v14, %v5693_v42 }
 0xeff   :  { %v5697_v40 = vpop.permute.xlu0 %5696 }
 0xf00   :  { %v5699_v30 = vunpack.i.h.bf16 %v5697_v40  ;;  %v5698_v43 = vunpack.i.l.bf16 %v5697_v40 }
 0xf02   :  { %v1534_v3 = vsel %vm203_vm11, %v1532_v44, %v5699_v30  ;;  %v1533_v55 = vsel %vm203_vm11, %v1531_v47, %v5698_v43 }
 0xf07   :  { %v5702_v45 = vpop.permute.xlu1 %5701 }
 0xf08   :  { %v5704_v48 = vunpack.i.h.bf16 %v5702_v45  ;;  %v5703_v46 = vunpack.i.l.bf16 %v5702_v45 }
 0xf0a   :  { %v1536_v50 = vsel %vm665_vm12, %v1534_v3, %v5704_v48  ;;  %v1535_v56 = vsel %vm665_vm12, %v1533_v55, %v5703_v46  ;;  %v4890_v3 = vld [vmem:[%s7341_s5 + $0x30] ss:$0 sm:$0xff] }
 0xf0b   :  { %v1537_v57 = vpack.c.bf16 %v1536_v50, %v1535_v56 }
 0xf0d   :  { %5320 = vmatmul.mubr.msk.bf16.vlgmr.msra.gmra.mrb[44].mxu0 %vm106_vm1, %v1537_v57 }
 0xf0e   :  { %5332 = vmatpush3.bf16.msra.mxu0 %v6348_v49  ;;  %5339 = vmatprep.mubr.msk.bf16.mxu0 %vm6075_vm0, %v6074_v1 }
 0xf0f   :  { %5333 = vmatprep.subr.bf16.mxu0 %v6074_v1 }
 0xf12   :  { %5334 = vmatpush3.bf16.msra.mxu0 %v6354_v52 }
 0xf13   :  { %5335 = vmatprep.subr.bf16.mxu0 %v6074_v1 }
 0xf16   :  { %5336 = vmatpush3.bf16.msra.mxu0 %v6383_v12 }
 0xf17   :  { %5337 = vmatprep.subr.bf16.mxu0 %v6074_v1 }
 0xf1a   :  { %5338 = vmatpush3.bf16.msra.mxu0 %v6390_v0 }
 0xf1b   :  { %5357 = vmatprep.subr.bf16.mxu0 %v6074_v1 }
 0xfe0   :  { %v1575_v54 = vpop.f32.mrb[44].mxu0 }
 0xfe1   :  { %v1576_v49 = vadd.f32 %v6321_v21, %v1575_v54  ;;  %v5321_v58 = vpop.f32.mrb[45].mxu0 }
 0xfe2   :  { %v1578_v60 = vpop.f32.mrb[46].mxu0 }
 0xfe3   :  { %v1579_v61 = vadd.f32 %v6321_v21, %v1578_v60  ;;  %v5322_v63 = vpop.f32.mrb[47].mxu0  ;;  %v1582_v52 = vadd.f32 %v1576_v49, %v6417_v16 }
 0xfe5   :  { %v1584_v53 = vsel %vm106_vm1, %v1582_v52, 0.0  ;;  %v1583_v12 = vadd.f32 %v1579_v61, %v6419_v17 }
 0xfe6   :  { %1585 = vadd.xlane.f32.xlu0 %v1584_v53 }
 0xfe7   :  { %v1587_v5 = vsel %vm106_vm1, %v1583_v12, 0.0 }
 0xfe8   :  { %1588 = vadd.xlane.f32.xlu1 %v1587_v5 }
0x1073   :  { %v1586_v0 = vpop.xlane.xlu0 %1585 }
0x1074   :  { %v1590_v9 = vmul.f32 0.03125, %v1586_v0 }
0x1075   :  { %v1589_v10 = vpop.xlane.xlu1 %1588 }
0x1076   :  { %v1592_v13 = vsub.f32 %v1582_v52, %v1590_v9  ;;  %v1591_v14 = vmul.f32 0.03125, %v1589_v10 }
0x1078   :  { %v1593_v15 = vsub.f32 %v1583_v12, %v1591_v14  ;;  %v1594_v59 = vmul.f32 %v1592_v13, %v1592_v13 }
0x107a   :  { %v1596_v21 = vsel %vm106_vm1, %v1594_v59, 0.0  ;;  %v1595_v18 = vmul.f32 %v1593_v15, %v1593_v15 }
0x107b   :  { %1597 = vadd.xlane.f32.xlu0 %v1596_v21  ;;  %v27_v21 = vld [vmem:[%s7339_s3] sm:$0x1] }
0x107c   :  { %v1599_v16 = vsel %vm106_vm1, %v1595_v18, 0.0  ;;  %vm28_vm14 = vcmp.gt.f32.partialorder %v27_v21, 0.5 }
0x107d   :  { %v72_v18 = vsel %vm28_vm14, 1, %v6083_v29 }
0x107f   :  { %1600 = vadd.xlane.f32.xlu0 %v1599_v16  ;;  %v31_v16 = vadd.s32 8, %v6211_v27 }
0x1081   :  { %vm69_vm3 = vcmp.ge.s32.totalorder %v31_v16, %v6215_v31 }
0x1082   :  { %vm71_vm7 = vmand %vm6222_vm8, %vm69_vm3 }
0x1108   :  { %v1598_v11 = vpop.xlane.xlu0 %1597 }
0x1109   :  { %v1602_v17 = vmul.f32 0.03125, %v1598_v11  ;;  %v76_v11 = vrot.slane %v72_v18, %v61_v28 }
0x110b   :  { %v1604_v7 = vadd.f32 1e-05, %v1602_v17  ;;  %vm77_vm5 = vcmp.eq.s32.totalorder %v76_v11, 1 }
0x110c   :  { %v1601_v20 = vpop.xlane.xlu0 %1600  ;;  %vm78_vm9 = vmand %vm70_vm4, %vm77_vm5 }
0x110d   :  { %5863 = vrsqrt.f32 %v1604_v7  ;;  %v1603_v22 = vmul.f32 0.03125, %v1601_v20  ;;  %vm79_vm10 = vmand %vm71_vm7, %vm77_vm5  ;;  %v6657_v29 = vsel %vm78_vm9, 0.0, %v6084_v34 }
0x110e   :  { %v6660_v28 = vsel %vm79_vm10, 0.0, %v6084_v34 }
0x110f   :  { %v1605_v19 = vadd.f32 1e-05, %v1603_v22 }
0x1111   :  { %5865 = vrsqrt.f32 %v1605_v19 }
0x1117   :  { %v5864_v4 = vpop.eup %5863 }
0x1118   :  { %v1608_v23 = vmul.f32 %v5864_v4, %v1592_v13 }
0x111a   :  { %v1610_v26 = vmul.f32 %v6362_v62, %v1608_v23 }
0x111b   :  { %v5866_v24 = vpop.eup %5865 }
0x111c   :  { %v1609_v6 = vmul.f32 %v5866_v24, %v1593_v15  ;;  %v6560_v32 = vadd.f32 %v6368_v8, %v1610_v26 }
0x111e   :  { %v1611_v51 = vmul.f32 %v6362_v62, %v1609_v6  ;;  %v5776_v62 = vld [vmem:[%s7340_s4 + $0x88] sm:$0xff]  }
0x1120   :  { %v6563_v36 = vadd.f32 %v6368_v8, %v1611_v51  ;;  %v6579_v8 = vld [vmem:[%s7337_s1] sm:$0xff] }
0x1121   :  { %v1747_v40 = vpack.c.bf16 %v6584_v39, %v6579_v8 }
0x1122   :  { %v1614_v38 = vpack.c.bf16 %v6563_v36, %v6560_v32 }
0x1124   :  { %5328 = vmatmul.mubr.msk.bf16.vlgmr.msra.gmra.mrb[40].mxu1 %vm106_vm1, %v1614_v38 }
0x1125   :  { %5344 = vmatpush3.bf16.msra.mxu1 %v5775_v25  ;;  %5347 = vmatprep.mubr.msk.bf16.mxu1 %vm6075_vm0, %v6074_v1 }
0x1126   :  { %5345 = vmatprep.subr.bf16.mxu1 %v6074_v1 }
0x1129   :  { %5346 = vmatpush3.bf16.msra.mxu1 %v5776_v62 }
0x112a   :  { %5351 = vmatprep.subr.bf16.mxu1 %v6074_v1 }
0x112c   :  { %5348 = vmatmul.mubr.msk.bf16.vlgmr.msra.gmra.mrb[44].mxu1 %vm106_vm1, %v1747_v40 }
0x112d   :  { %5353 = vmatprep.mubr.msk.bf16.mxu1 %vm6075_vm0, %v6074_v1 }
0x11f7   :  { %v1652_v41 = vpop.f32.mrb[40].mxu1 }
0x11f8   :  { %v1653_v42 = vadd.f32 %v6397_v2, %v1652_v41  ;;  %v5329_v30 = vpop.f32.mrb[41].mxu1 }
0x11f9   :  { %v1655_v43 = vpop.f32.mrb[42].mxu1 }
0x11fa   :  { %v1656_v45 = vadd.f32 %v6397_v2, %v1655_v43  ;;  %v5330_v44 = vpop.f32.mrb[43].mxu1  ;;  %v1659_v47 = vmax.f32 %v1653_v42, 0.0 }
0x11fc   :  { %v1660_v48 = vmax.f32 %v1656_v45, 0.0 }
0x11fe   :  { %v1661_v46 = vpack.c.bf16 %v1660_v48, %v1659_v47 }
0x11ff   :  { %v1801_v55 = vpop.f32.mrb[44].mxu1 }
0x1200   :  { %5340 = vmatmul.mubr.msk.bf16.vlgmr.msra.gmra.mrb[48].mxu0 %vm890_vm13, %v1661_v46  ;;  %v5349_v50 = vpop.f32.mrb[45].mxu1  ;;  %v1802_v57 = vadd.f32 %v4890_v3, %v1801_v55 }
0x1201   :  { %v1804_v56 = vpop.f32.mrb[46].mxu1  ;;  %5359 = vmatprep.mubr.msk.bf16.mxu0 %vm6075_vm0, %v6074_v1 }
0x1202   :  { %v1805_v54 = vadd.f32 %v4890_v3, %v1804_v56  ;;  %v5350_v49 = vpop.f32.mrb[47].mxu1 }
0x1204   :  { %v6601_v2 = vpack.c.bf16 %v1805_v54, %v1802_v57 }
0x1206   :  { %1931 = vrot.lane.b32.xlu0 %v6601_v2, %s6079_s9  ;;  %1810 = vrot.lane.b32.xlu1 %v6601_v2, %s6077_s7 }
0x120a   :  { %2050 = vrot.lane.b32.xlu0 %v6601_v2, %s6081_s11  ;;  %1929 = vrot.lane.b32.xlu1 %v6601_v2, %s6076_s30 }
0x120e   :  { %2171 = vrot.lane.b32.xlu0 %v6601_v2, %s6082_s12  ;;  %2052 = vrot.lane.b32.xlu1 %v6601_v2, %s6078_s8 }
0x1212   :  { %2173 = vrot.lane.b32.xlu1 %v6601_v2, %s6080_s10 }
0x1278   :  { %v1811_v58 = vpop.permute.xlu1 %1810  ;;  %v1932_v61 = vpop.permute.xlu0 %1931 }
0x1279   :  { %v1816_v60 = vsel %vm155_vm2, %v1811_v58, 0  ;;  %v1937_v52 = vsel %vm155_vm2, %v1932_v61, 0 }
0x127a   :  { %5352 = vmatpush3.bf16.xpose.msra.mxu1 %v1816_v60 }
0x127b   :  { %5363 = vmatprep.subr.bf16.mxu1 %v6074_v1 }
0x127c   :  { %v1930_v63 = vpop.permute.xlu1 %1929  ;;  %v2051_v0 = vpop.permute.xlu0 %2050 }
0x1280   :  { %v2053_v53 = vpop.permute.xlu1 %2052  ;;  %v2172_v10 = vpop.permute.xlu0 %2171 }
0x1281   :  { %5354 = vmatmul.mubr.msk.bf16.vlgmr.msra.gmra.mrb[48].mxu1 %vm155_vm2, %v6601_v2  ;;  %v2058_v12 = vsel %vm155_vm2, %v2053_v53, 0 }
0x1282   :  { %5364 = vmatpush3.bf16.xpose.msra.mxu1 %v1937_v52  ;;  %5365 = vmatprep.mubr.msk.bf16.mxu1 %vm6075_vm0, %v6074_v1 }
0x1283   :  { %5375 = vmatprep.subr.bf16.mxu1 %v6074_v1 }
0x1284   :  { %v2174_v5 = vpop.permute.xlu1 %2173 }
0x1285   :  { %v2179_v9 = vsel %vm155_vm2, %v2174_v5, 0 }
0x1289   :  { %5366 = vmatmul.mubr.msk.bf16.vlgmr.msra.gmra.mrb[52].mxu1 %vm155_vm2, %v1930_v63 }
0x128a   :  { %5376 = vmatpush3.bf16.xpose.msra.mxu1 %v2058_v12  ;;  %5377 = vmatprep.mubr.msk.bf16.mxu1 %vm6075_vm0, %v6074_v1 }
0x128b   :  { %5387 = vmatprep.subr.bf16.mxu1 %v6074_v1 }
0x1291   :  { %5378 = vmatmul.mubr.msk.bf16.vlgmr.msra.gmra.mrb[56].mxu1 %vm155_vm2, %v2051_v0 }
0x1292   :  { %5388 = vmatpush3.bf16.xpose.msra.mxu1 %v2179_v9  ;;  %5389 = vmatprep.mubr.msk.bf16.mxu1 %vm6075_vm0, %v6074_v1 }
0x1293   :  { %5399 = vmatprep.subr.bf16.mxu1 %v6074_v1 }
0x1299   :  { %5390 = vmatmul.mubr.msk.bf16.vlgmr.msra.gmra.mrb[60].mxu1 %vm155_vm2, %v2172_v10 }
0x129a   :  { %5403 = vmatprep.mubr.msk.bf16.mxu1 %vm6075_vm0, %v6074_v1 }
0x12d3   :  { %v6638_v13 = vpop.f32.mrb[48].mxu0 }
0x12d4   :  { %v5341_v14 = vpop.f32.mrb[49].mxu0 }
0x12d5   :  { %v6640_v15 = vpop.f32.mrb[50].mxu0 }
0x12d6   :  { %v5342_v59 = vpop.f32.mrb[51].mxu0 }
0x1354   :  { %v1852_v17 = vpop.f32.mrb[48].mxu1 }
0x1355   :  { %v1853_v27 = vadd.f32 %v1852_v17, %v6657_v29  ;;  %v5355_v7 = vpop.f32.mrb[49].mxu1 }
0x1356   :  { %v1855_v20 = vpop.f32.mrb[50].mxu1 }
0x1357   :  { %v1856_v31 = vadd.f32 %v1855_v20, %v6660_v28  ;;  %v5356_v22 = vpop.f32.mrb[51].mxu1  ;;  %v1859_v19 = vsel %vm203_vm11, %v1853_v27, -inf }
0x1358   :  { %1860 = vmax.xlane.f32.xlu1 %v1859_v19 }
0x1359   :  { %v1862_v33 = vsel %vm203_vm11, %v1856_v31, -inf }
0x135a   :  { %1863 = vmax.xlane.f32.xlu0 %v1862_v33 }
0x135c   :  { %v1973_v4 = vpop.f32.mrb[52].mxu1 }
0x135d   :  { %v1974_v23 = vadd.f32 %v1973_v4, %v6657_v29  ;;  %v5367_v24 = vpop.f32.mrb[53].mxu1 }
0x135e   :  { %v1976_v26 = vpop.f32.mrb[54].mxu1 }
0x135f   :  { %v1977_v34 = vadd.f32 %v1976_v26, %v6660_v28  ;;  %v5368_v6 = vpop.f32.mrb[55].mxu1  ;;  %v1980_v51 = vsel %vm203_vm11, %v1974_v23, -inf }
0x1360   :  { %1981 = vmax.xlane.f32.xlu0 %v1980_v51 }
0x1361   :  { %v1983_v25 = vsel %vm203_vm11, %v1977_v34, -inf }
0x1362   :  { %1984 = vmax.xlane.f32.xlu1 %v1983_v25 }
0x1364   :  { %v2094_v38 = vpop.f32.mrb[56].mxu1 }
0x1365   :  { %v2095_v62 = vadd.f32 %v2094_v38, %v6657_v29  ;;  %v5379_v40 = vpop.f32.mrb[57].mxu1 }
0x1366   :  { %v2097_v41 = vpop.f32.mrb[58].mxu1 }
0x1367   :  { %v2098_v42 = vadd.f32 %v2097_v41, %v6660_v28  ;;  %v5380_v30 = vpop.f32.mrb[59].mxu1  ;;  %v2101_v43 = vsel %vm203_vm11, %v2095_v62, -inf }
0x1368   :  { %2102 = vmax.xlane.f32.xlu0 %v2101_v43 }
0x1369   :  { %v2104_v45 = vsel %vm203_vm11, %v2098_v42, -inf }
0x136a   :  { %2105 = vmax.xlane.f32.xlu1 %v2104_v45 }
0x136c   :  { %v2215_v44 = vpop.f32.mrb[60].mxu1 }
0x136d   :  { %v2216_v47 = vadd.f32 %v2215_v44, %v6657_v29  ;;  %v5391_v48 = vpop.f32.mrb[61].mxu1 }
0x136e   :  { %v2218_v46 = vpop.f32.mrb[62].mxu1 }
0x136f   :  { %v2219_v3 = vadd.f32 %v2218_v46, %v6660_v28  ;;  %v5392_v55 = vpop.f32.mrb[63].mxu1  ;;  %v2222_v50 = vsel %vm203_vm11, %v2216_v47, -inf }
0x1370   :  { %2223 = vmax.xlane.f32.xlu0 %v2222_v50 }
0x1371   :  { %v2225_v56 = vsel %vm203_vm11, %v2219_v3, -inf }
0x1372   :  { %2226 = vmax.xlane.f32.xlu1 %v2225_v56 }
0x13e5   :  { %v1861_v57 = vpop.xlane.xlu1 %1860 }
0x13e6   :  { %v1865_v54 = vsub.f32 %v1853_v27, %v1861_v57 }
0x13e7   :  { %v1864_v49 = vpop.xlane.xlu0 %1863 }
0x13e8   :  { %v1867_v58 = vmul.f32 1.442695, %v1865_v54  ;;  %v1866_v60 = vsub.f32 %v1856_v31, %v1864_v49 }
0x13ea   :  { %5867 = vpow2.f32 %v1867_v58  ;;  %v1869_v61 = vmul.f32 1.442695, %v1866_v60 }
0x13ec   :  { %5869 = vpow2.f32 %v1869_v61 }
0x13ed   :  { %v1982_v63 = vpop.xlane.xlu0 %1981 }
0x13ee   :  { %v1986_v52 = vsub.f32 %v1974_v23, %v1982_v63 }
0x13ef   :  { %v1985_v59 = vpop.xlane.xlu1 %1984 }
0x13f0   :  { %v1988_v53 = vmul.f32 1.442695, %v1986_v52  ;;  %v1987_v21 = vsub.f32 %v1977_v34, %v1985_v59 }
0x13f2   :  { %5871 = vpow2.f32 %v1988_v53  ;;  %v1990_v11 = vmul.f32 1.442695, %v1987_v21 }
0x13f4   :  { %v5868_v12 = vpop.eup %5867  ;;  %5873 = vpow2.f32 %v1990_v11 }
0x13f5   :  { %v1871_v5 = vsel %vm203_vm11, %v5868_v12, 0.0  ;;  %v2103_v16 = vpop.xlane.xlu0 %2102 }
0x13f6   :  { %v5870_v0 = vpop.eup %5869  ;;  %1872 = vadd.xlane.f32.xlu0 %v1871_v5  ;;  %v2107_v7 = vsub.f32 %v2095_v62, %v2103_v16 }
0x13f7   :  { %v1874_v9 = vsel %vm203_vm11, %v5870_v0, 0.0  ;;  %v2106_v18 = vpop.xlane.xlu1 %2105 }
0x13f8   :  { %1875 = vadd.xlane.f32.xlu1 %v1874_v9  ;;  %v2108_v17 = vsub.f32 %v2098_v42, %v2106_v18  ;;  %v2109_v19 = vmul.f32 1.442695, %v2107_v7 }
0x13fa   :  { %v2111_v31 = vmul.f32 1.442695, %v2108_v17 }
0x13fc   :  { %v6680_v10 = vpop.eup %5871  ;;  %5875 = vpow2.f32 %v2111_v31 }
0x13fd   :  { %v1992_v14 = vsel %vm203_vm11, %v6680_v10, 0.0  ;;  %v2224_v20 = vpop.xlane.xlu0 %2223  ;;  %5877 = vpow2.f32 %v2109_v19  ;;  %v5777_v19 = vld [vmem:[%s7340_s4 + $0xa0] sm:$0xff]  }
0x13fe   :  { %1993 = vadd.xlane.f32.xlu0 %v1992_v14  ;;  %v2228_v33 = vsub.f32 %v2216_v47, %v2224_v20  ;;  %v5874_v24 = vpop.eup %5873  ;;  %5400 = vmatpush3.bf16.msra.mxu1 %v5777_v19 }
0x13ff   :  { %v2227_v27 = vpop.xlane.xlu1 %2226  ;;  %v1995_v26 = vsel %vm203_vm11, %v5874_v24, 0.0  ;;  %5401 = vmatprep.subr.bf16.mxu1 %v6074_v1 }
0x1400   :  { %v2229_v22 = vsub.f32 %v2219_v3, %v2227_v27  ;;  %v2230_v23 = vmul.f32 1.442695, %v2228_v33 }
0x1402   :  { %v2232_v4 = vmul.f32 1.442695, %v2229_v22 }
0x1404   :  { %5879 = vpow2.f32 %v2232_v4 }
0x1405   :  { %5881 = vpow2.f32 %v2230_v23 }
0x1406   :  { %v5876_v34 = vpop.eup %5875 }
0x1407   :  { %v5878_v6 = vpop.eup %5877  ;;  %v2116_v51 = vsel %vm203_vm11, %v5876_v34, 0.0 }
0x1408   :  { %v2113_v38 = vsel %vm203_vm11, %v5878_v6, 0.0 }
0x1409   :  { %2003 = vrot.lane.b32.xlu1 %v6601_v2, %s6085_s2 }
0x140e   :  { %v6690_v25 = vpop.eup %5879 }
0x140f   :  { %v5882_v62 = vpop.eup %5881  ;;  %v2237_v40 = vsel %vm203_vm11, %v6690_v25, 0.0 }
0x1410   :  { %v2234_v41 = vsel %vm203_vm11, %v5882_v62, 0.0 }
0x1414   :  { %1882 = vrot.lane.b32.xlu0 %v6601_v2, %s6086_s15 }
0x142d   :  { %1996 = vadd.xlane.f32.xlu1 %v1995_v26  ;;  %v5778_v26 = vld [vmem:[%s7340_s4 + $0xa8] sm:$0xff]  }
0x142e   :  { %5402 = vmatpush3.bf16.msra.mxu1 %v5778_v26 }
0x142f   :  { %5415 = vmatprep.subr.bf16.mxu1 %v6074_v1 }
0x1431   :  { %2117 = vadd.xlane.f32.xlu1 %v2116_v51 }
0x1433   :  { %2114 = vadd.xlane.f32.xlu0 %v2113_v38 }
0x1435   :  { %2238 = vadd.xlane.f32.xlu1 %v2237_v40 }
0x1437   :  { %2235 = vadd.xlane.f32.xlu0 %v2234_v41 }
0x1446   :  { %2124 = vrot.lane.b32.xlu1 %v6601_v2, %s6087_s16 }
0x144d   :  { %2245 = vrot.lane.b32.xlu0 %v6601_v2, %s6088_s17 }
0x1483   :  { %v1873_v42 = vpop.xlane.xlu0 %1872 }
0x1484   :  { %5883 = vrcp.f32 %v1873_v42  ;;  %v6023_v42 = vld [vmem:[%s7341_s5 + $0x20] ss:$0 sm:$0xff] }
0x1485   :  { %v1876_v30 = vpop.xlane.xlu1 %1875 }
0x1486   :  { %5885 = vrcp.f32 %v1876_v30  ;;  %v1700_v30 = vadd.f32 %v6023_v42, %v6638_v13 }
0x1489   :  { %v2004_v55 = vpop.permute.xlu1 %2003 }
0x148b   :  { %v1994_v43 = vpop.xlane.xlu0 %1993 }
0x148c   :  { %5887 = vrcp.f32 %v1994_v43  ;;  %v1706_v43 = vadd.f32 %v1700_v30, %v6560_v32 }
0x148e   :  { %v5884_v45 = vpop.eup %5883 }
0x148f   :  { %v1883_v44 = vpop.permute.xlu0 %1882  ;;  %v1879_v48 = vmul.f32 %v5884_v45, %v5868_v12  ;;  %v1708_v45 = vsel %vm106_vm1, %v1706_v43, 0.0 }
0x1490   :  { %v5886_v47 = vpop.eup %5885  ;;  %5358 = vmatpush3.bf16.msra.mxu0 %v1883_v44  ;;  %v1703_v44 = vadd.f32 %v6023_v42, %v6640_v15 }
0x1491   :  { %v1880_v46 = vmul.f32 %v5886_v47, %v5870_v0  ;;  %5369 = vmatprep.subr.bf16.mxu0 %v6074_v1 }
0x1492   :  { %v1707_v47 = vadd.f32 %v1703_v44, %v6563_v36 }
0x1493   :  { %v1881_v3 = vpack.c.bf16 %v1880_v46, %v1879_v48 }
0x1494   :  { %v1711_v48 = vsel %vm106_vm1, %v1707_v47, 0.0 }
0x1495   :  { %5360 = vmatmul.mubr.msk.bf16.vlgmr.msra.gmra.mrb[52].mxu0 %vm203_vm11, %v1881_v3 }
0x1496   :  { %5370 = vmatpush3.bf16.msra.mxu0 %v2004_v55  ;;  %5371 = vmatprep.mubr.msk.bf16.mxu0 %vm6075_vm0, %v6074_v1  ;;  %v5888_v57 = vpop.eup %5887 }
0x1497   :  { %5381 = vmatprep.subr.bf16.mxu0 %v6074_v1  ;;  %v2000_v60 = vmul.f32 %v5888_v57, %v6680_v10 }
0x14ba   :  { %v1997_v2 = vpop.xlane.xlu1 %1996 }
0x14bb   :  { %5889 = vrcp.f32 %v1997_v2 }
0x14be   :  { %v2118_v50 = vpop.xlane.xlu1 %2117 }
0x14bf   :  { %5891 = vrcp.f32 %v2118_v50 }
0x14c0   :  { %v2115_v56 = vpop.xlane.xlu0 %2114 }
0x14c1   :  { %5893 = vrcp.f32 %v2115_v56 }
0x14c2   :  { %v2239_v54 = vpop.xlane.xlu1 %2238 }
0x14c4   :  { %v2236_v49 = vpop.xlane.xlu0 %2235 }
0x14c5   :  { %v5890_v58 = vpop.eup %5889  ;;  %5895 = vrcp.f32 %v2236_v49 }
0x14c6   :  { %v2001_v61 = vmul.f32 %v5890_v58, %v5874_v24  ;;  %5897 = vrcp.f32 %v2239_v54  ;;  %v2125_v53 = vpop.permute.xlu1 %2124 }
0x14c8   :  { %v2002_v63 = vpack.c.bf16 %v2001_v61, %v2000_v60  ;;  %v2246_v10 = vpop.permute.xlu0 %2245 }
0x14c9   :  { %v5892_v52 = vpop.eup %5891 }
0x14ca   :  { %5372 = vmatmul.mubr.msk.bf16.vlgmr.msra.gmra.mrb[56].mxu0 %vm203_vm11, %v2002_v63  ;;  %v2122_v0 = vmul.f32 %v5892_v52, %v5876_v34 }
0x14cb   :  { %v5894_v12 = vpop.eup %5893  ;;  %5382 = vmatpush3.bf16.msra.mxu0 %v2125_v53  ;;  %5383 = vmatprep.mubr.msk.bf16.mxu0 %vm6075_vm0, %v6074_v1 }
0x14cc   :  { %v2121_v5 = vmul.f32 %v5894_v12, %v5878_v6  ;;  %5393 = vmatprep.subr.bf16.mxu0 %v6074_v1 }
0x14ce   :  { %v2123_v9 = vpack.c.bf16 %v2122_v0, %v2121_v5 }
0x14cf   :  { %v5896_v14 = vpop.eup %5895 }
0x14d0   :  { %v5898_v59 = vpop.eup %5897  ;;  %v2242_v21 = vmul.f32 %v5896_v14, %v5882_v62 }
0x14d1   :  { %v2243_v18 = vmul.f32 %v5898_v59, %v6690_v25 }
0x14d2   :  { %5384 = vmatmul.mubr.msk.bf16.vlgmr.msra.gmra.mrb[60].mxu0 %vm203_vm11, %v2123_v9  ;;  %v4907_v9 = vld [vmem:[%s7341_s5 + $0x38] ss:$0 sm:$0xff] }
0x14d3   :  { %5394 = vmatpush3.bf16.msra.mxu0 %v2246_v10  ;;  %5395 = vmatprep.mubr.msk.bf16.mxu0 %vm6075_vm0, %v6074_v1  ;;  %v2244_v16 = vpack.c.bf16 %v2243_v18, %v2242_v21 }
0x14d4   :  { %5407 = vmatprep.subr.bf16.mxu0 %v6074_v1 }
0x14da   :  { %5396 = vmatmul.mubr.msk.bf16.vlgmr.msra.gmra.mrb[64].mxu0 %vm203_vm11, %v2244_v16 }
0x14db   :  { %5411 = vmatprep.mubr.msk.bf16.mxu0 %vm6075_vm0, %v6074_v1 }
0x1568   :  { %v1922_v11 = vpop.f32.mrb[52].mxu0 }
0x1569   :  { %v5361_v17 = vpop.f32.mrb[53].mxu0 }
0x156a   :  { %v1925_v27 = vpop.f32.mrb[54].mxu0 }
0x156b   :  { %v5362_v7 = vpop.f32.mrb[55].mxu0 }
0x159d   :  { %v2043_v20 = vpop.f32.mrb[56].mxu0 }
0x159e   :  { %v5373_v31 = vpop.f32.mrb[57].mxu0 }
0x159f   :  { %v2046_v22 = vpop.f32.mrb[58].mxu0 }
0x15a0   :  { %v5705_v33 = vpack.i.bf16 %v2046_v22, %v2043_v20  ;;  %v5374_v4 = vpop.f32.mrb[59].mxu0 }
0x15a2   :  { %5706 = vrot.lane.b32.xlu1 %v5705_v33, %s6089_s20  ;;  %v5779_v33 = vld [vmem:[%s7340_s4 + $0xc0] sm:$0xff]  }
0x15a3   :  { %5408 = vmatpush3.bf16.msra.mxu0 %v5779_v33 }
0x15a4   :  { %5409 = vmatprep.subr.bf16.mxu0 %v6074_v1 }
0x15a5   :  { %v2164_v23 = vpop.f32.mrb[60].mxu0 }
0x15a6   :  { %v5385_v24 = vpop.f32.mrb[61].mxu0 }
0x15a7   :  { %v2167_v34 = vpop.f32.mrb[62].mxu0 }
0x15a8   :  { %v5710_v6 = vpack.i.bf16 %v2167_v34, %v2164_v23  ;;  %v5386_v51 = vpop.f32.mrb[63].mxu0 }
0x15aa   :  { %5711 = vrot.lane.b32.xlu0 %v5710_v6, %s6090_s23 }
0x15ad   :  { %v2285_v25 = vpop.f32.mrb[64].mxu0 }
0x15ae   :  { %v5397_v38 = vpop.f32.mrb[65].mxu0 }
0x15af   :  { %v2288_v62 = vpop.f32.mrb[66].mxu0 }
0x15b0   :  { %v5715_v40 = vpack.i.bf16 %v2288_v62, %v2285_v25  ;;  %v5398_v41 = vpop.f32.mrb[67].mxu0 }
0x15b2   :  { %5716 = vrot.lane.b32.xlu1 %v5715_v40, %s6091_s24 }
0x15c9   :  { %1709 = vadd.xlane.f32.xlu0 %v1708_v45 }
0x15d6   :  { %1712 = vadd.xlane.f32.xlu1 %v1711_v48  ;;  %v6024_v48 = vld [vmem:[%s7341_s5 + $0x28] ss:$0 sm:$0xff] }
0x1614   :  { %v5707_v46 = vpop.permute.xlu1 %5706 }
0x1615   :  { %v5709_v55 = vunpack.i.h.bf16 %v5707_v46  ;;  %v5708_v2 = vunpack.i.l.bf16 %v5707_v46 }
0x1617   :  { %v2317_v13 = vsel %vm155_vm2, %v1925_v27, %v5709_v55  ;;  %v2316_v32 = vsel %vm155_vm2, %v1922_v11, %v5708_v2  ;;  %v6025_v2 = vld [vmem:[%s7341_s5 + $0x29] ss:$0 sm:$0xff] }
0x161c   :  { %v5712_v3 = vpop.permute.xlu0 %5711 }
0x161d   :  { %v5714_v50 = vunpack.i.h.bf16 %v5712_v3  ;;  %v5713_v56 = vunpack.i.l.bf16 %v5712_v3 }
0x161f   :  { %v2318_v15 = vsel %vm203_vm11, %v2316_v32, %v5713_v56  ;;  %v2319_v36 = vsel %vm203_vm11, %v2317_v13, %v5714_v50 }
0x1624   :  { %v5717_v57 = vpop.permute.xlu1 %5716 }
0x1625   :  { %v5719_v54 = vunpack.i.h.bf16 %v5717_v57  ;;  %v5718_v49 = vunpack.i.l.bf16 %v5717_v57 }
0x1627   :  { %v2320_v58 = vsel %vm665_vm12, %v2318_v15, %v5718_v49  ;;  %v2321_v60 = vsel %vm665_vm12, %v2319_v36, %v5719_v54 }
0x1628   :  { %v2329_v61 = vpack.c.bf16 %v2321_v60, %v2320_v58 }
0x162a   :  { %5404 = vmatmul.mubr.msk.bf16.vlgmr.msra.gmra.mrb[64].mxu1 %vm106_vm1, %v2329_v61  ;;  %v4913_v61 = vld [vmem:[%s7341_s5 + $0x40] ss:$0 sm:$0xff] }
0x162b   :  { %5419 = vmatprep.mubr.msk.bf16.mxu1 %vm6075_vm0, %v6074_v1  ;;  %5416 = vmatpush3.bf16.msra.mxu1 %v5779_v33 }
0x162c   :  { %5417 = vmatprep.subr.bf16.mxu1 %v6074_v1 }
0x1656   :  { %v1710_v63 = vpop.xlane.xlu0 %1709 }
0x1657   :  { %v1714_v52 = vmul.f32 0.03125, %v1710_v63 }
0x1659   :  { %v1716_v53 = vsub.f32 %v1706_v43, %v1714_v52 }
0x165b   :  { %v1718_v12 = vmul.f32 %v1716_v53, %v1716_v53 }
0x165d   :  { %v1720_v5 = vsel %vm106_vm1, %v1718_v12, 0.0  ;;  %v4914_v12 = vld [vmem:[%s7341_s5 + $0x41] ss:$0 sm:$0xff] }
0x165e   :  { %1721 = vadd.xlane.f32.xlu1 %v1720_v5 }
0x1663   :  { %v1713_v0 = vpop.xlane.xlu1 %1712 }
0x1664   :  { %v1715_v10 = vmul.f32 0.03125, %v1713_v0 }
0x1666   :  { %v1717_v27 = vsub.f32 %v1707_v47, %v1715_v10  ;;  %v4920_v10 = vld [vmem:[%s7341_s5 + $0x48] ss:$0 sm:$0xff] }
0x1668   :  { %v1719_v22 = vmul.f32 %v1717_v27, %v1717_v27 }
0x166a   :  { %v1723_v19 = vsel %vm106_vm1, %v1719_v22, 0.0 }
0x16fd   :  { %v2383_v14 = vpop.f32.mrb[64].mxu1 }
0x16fe   :  { %v2384_v59 = vadd.f32 %v4907_v9, %v2383_v14  ;;  %v5405_v21 = vpop.f32.mrb[65].mxu1 }
0x16ff   :  { %v2386_v18 = vpop.f32.mrb[66].mxu1 }
0x1700   :  { %v2393_v16 = vadd.f32 %v2384_v59, %v6579_v8  ;;  %v2387_v11 = vadd.f32 %v4907_v9, %v2386_v18  ;;  %v5406_v17 = vpop.f32.mrb[67].mxu1  ;;  %v5780_v8 = vld [vmem:[%s7340_s4 + $0xc8] sm:$0xff]  }
0x1701   :  { %5418 = vmatpush3.bf16.msra.mxu1 %v5780_v8  ;;  %5410 = vmatpush3.bf16.msra.mxu0 %v5780_v8 }
0x1702   :  { %v2394_v7 = vadd.f32 %v2387_v11, %v6584_v39  ;;  %v2395_v20 = vsel %vm106_vm1, %v2393_v16, 0.0  ;;  %5423 = vmatprep.subr.bf16.mxu0 %v6074_v1  ;;  %5429 = vmatprep.subr.bf16.mxu1 %v6074_v1  ;;  %v1722_v39 = vpop.xlane.xlu1 %1721 }
0x1703   :  { %2396 = vadd.xlane.f32.xlu0 %v2395_v20  ;;  %v1726_v4 = vmul.f32 0.03125, %v1722_v39 }
0x1704   :  { %v2398_v31 = vsel %vm106_vm1, %v2394_v7, 0.0 }
0x1705   :  { %v1728_v26 = vadd.f32 1e-05, %v1726_v4 }
0x1707   :  { %2399 = vadd.xlane.f32.xlu0 %v2398_v31  ;;  %5899 = vrsqrt.f32 %v1728_v26 }
0x170b   :  { %1724 = vadd.xlane.f32.xlu0 %v1723_v19 }
0x1711   :  { %v5900_v45 = vpop.eup %5899 }
0x1712   :  { %v1732_v44 = vmul.f32 %v5900_v45, %v1716_v53 }
0x1714   :  { %v1734_v46 = vmul.f32 %v6024_v48, %v1732_v44 }
0x1716   :  { %v1736_v50 = vadd.f32 %v6025_v2, %v1734_v46 }
0x1790   :  { %v2397_v23 = vpop.xlane.xlu0 %2396 }
0x1791   :  { %v2401_v24 = vmul.f32 0.03125, %v2397_v23 }
0x1793   :  { %v2403_v34 = vsub.f32 %v2393_v16, %v2401_v24 }
0x1794   :  { %v2400_v6 = vpop.xlane.xlu0 %2399 }
0x1795   :  { %v2402_v51 = vmul.f32 0.03125, %v2400_v6  ;;  %v2405_v25 = vmul.f32 %v2403_v34, %v2403_v34 }
0x1797   :  { %v2404_v38 = vsub.f32 %v2394_v7, %v2402_v51  ;;  %v2407_v62 = vsel %vm106_vm1, %v2405_v25, 0.0 }
0x1798   :  { %2408 = vadd.xlane.f32.xlu1 %v2407_v62  ;;  %v1725_v40 = vpop.xlane.xlu0 %1724 }
0x1799   :  { %v1727_v41 = vmul.f32 0.03125, %v1725_v40  ;;  %v2406_v42 = vmul.f32 %v2404_v38, %v2404_v38 }
0x179b   :  { %v1729_v30 = vadd.f32 1e-05, %v1727_v41  ;;  %v2410_v43 = vsel %vm106_vm1, %v2406_v42, 0.0 }
0x179c   :  { %2411 = vadd.xlane.f32.xlu0 %v2410_v43 }
0x179d   :  { %5901 = vrsqrt.f32 %v1729_v30 }
0x17a7   :  { %v5902_v47 = vpop.eup %5901 }
0x17a8   :  { %v1733_v3 = vmul.f32 %v5902_v47, %v1717_v27 }
0x17aa   :  { %v1735_v55 = vmul.f32 %v6024_v48, %v1733_v3 }
0x17ac   :  { %v1737_v56 = vadd.f32 %v6025_v2, %v1735_v55 }
0x17ae   :  { %v2501_v57 = vpack.c.bf16 %v1737_v56, %v1736_v50 }
0x17b0   :  { %5420 = vmatmul.mubr.msk.bf16.vlgmr.msra.gmra.mrb[68].mxu1 %vm106_vm1, %v2501_v57 }
0x17b1   :  { %5431 = vmatprep.mubr.msk.bf16.mxu1 %vm6075_vm0, %v6074_v1 }
0x1825   :  { %v2409_v13 = vpop.xlane.xlu1 %2408 }
0x1826   :  { %v2413_v32 = vmul.f32 0.03125, %v2409_v13 }
0x1828   :  { %v2415_v54 = vadd.f32 1e-05, %v2413_v32 }
0x1829   :  { %v2412_v49 = vpop.xlane.xlu0 %2411 }
0x182a   :  { %5903 = vrsqrt.f32 %v2415_v54  ;;  %v2414_v15 = vmul.f32 0.03125, %v2412_v49 }
0x182c   :  { %v2416_v36 = vadd.f32 1e-05, %v2414_v15 }
0x182e   :  { %5905 = vrsqrt.f32 %v2416_v36 }
0x1834   :  { %v5904_v58 = vpop.eup %5903 }
0x1835   :  { %v2419_v60 = vmul.f32 %v5904_v58, %v2403_v34 }
0x1837   :  { %v2425_v52 = vmul.f32 %v4913_v61, %v2419_v60 }
0x1838   :  { %v5906_v63 = vpop.eup %5905 }
0x1839   :  { %v2420_v53 = vmul.f32 %v5906_v63, %v2404_v38  ;;  %v6783_v0 = vadd.f32 %v4914_v12, %v2425_v52 }
0x183b   :  { %v2426_v5 = vmul.f32 %v4913_v61, %v2420_v53 }
0x183d   :  { %v6785_v9 = vadd.f32 %v4914_v12, %v2426_v5 }
0x183f   :  { %v2440_v14 = vpack.c.bf16 %v6785_v9, %v6783_v0 }
0x1841   :  { %5412 = vmatmul.mubr.msk.bf16.vlgmr.msra.gmra.mrb[68].mxu0 %vm106_vm1, %v2440_v14 }
0x1842   :  { %5425 = vmatprep.mubr.msk.bf16.mxu0 %vm6075_vm0, %v6074_v1 }
0x1883   :  { %v2539_v59 = vpop.f32.mrb[68].mxu1 }
0x1884   :  { %v5421_v21 = vpop.f32.mrb[69].mxu1  ;;  %v2540_v16 = vadd.f32 %v4920_v10, %v2539_v59 }
0x1885   :  { %v2542_v18 = vpop.f32.mrb[70].mxu1 }
0x1886   :  { %v2543_v11 = vadd.f32 %v4920_v10, %v2542_v18  ;;  %v5422_v17 = vpop.f32.mrb[71].mxu1 }
0x1888   :  { %v6795_v27 = vpack.c.bf16 %v2543_v11, %v2540_v16 }
0x188a   :  { %2671 = vrot.lane.b32.xlu0 %v6795_v27, %s6079_s9  ;;  %2549 = vrot.lane.b32.xlu1 %v6795_v27, %s6077_s7 }
0x18fc   :  { %v2550_v7 = vpop.permute.xlu1 %2549  ;;  %v2672_v4 = vpop.permute.xlu0 %2671 }
0x18fd   :  { %v6802_v20 = vsel %vm155_vm2, %v2550_v7, 0  ;;  %v6809_v24 = vsel %vm155_vm2, %v2672_v4, 0 }
0x18fe   :  { %5424 = vmatpush3.bf16.xpose.msra.mxu0 %v6802_v20 }
0x18ff   :  { %5435 = vmatprep.subr.bf16.mxu0 %v6074_v1 }
0x1914   :  { %v2494_v31 = vpop.f32.mrb[68].mxu0 }
0x1915   :  { %v5413_v22 = vpop.f32.mrb[69].mxu0  ;;  %v2495_v33 = vadd.f32 %v4920_v10, %v2494_v31 }
0x1916   :  { %v2497_v19 = vpop.f32.mrb[70].mxu0 }
0x1917   :  { %v2498_v8 = vadd.f32 %v4920_v10, %v2497_v19  ;;  %v5414_v39 = vpop.f32.mrb[71].mxu0 }
0x1919   :  { %v2546_v23 = vpack.c.bf16 %v2498_v8, %v2495_v33 }
0x191b   :  { %2790 = vrot.lane.b32.xlu0 %v2546_v23, %s6081_s11  ;;  %2669 = vrot.lane.b32.xlu1 %v2546_v23, %s6076_s30 }
0x191c   :  { %5426 = vmatmul.mubr.msk.bf16.vlgmr.msra.gmra.mrb[72].mxu0 %vm155_vm2, %v2546_v23 }
0x191d   :  { %5436 = vmatpush3.bf16.xpose.msra.mxu0 %v6809_v24  ;;  %5437 = vmatprep.mubr.msk.bf16.mxu0 %vm6075_vm0, %v6074_v1 }
0x191e   :  { %5447 = vmatprep.subr.bf16.mxu0 %v6074_v1 }
0x191f   :  { %2911 = vrot.lane.b32.xlu0 %v2546_v23, %s6082_s12  ;;  %2792 = vrot.lane.b32.xlu1 %v6795_v27, %s6078_s8 }
0x1923   :  { %2913 = vrot.lane.b32.xlu1 %v6795_v27, %s6080_s10 }
0x198d   :  { %v2670_v26 = vpop.permute.xlu1 %2669  ;;  %v2791_v25 = vpop.permute.xlu0 %2790 }
0x198e   :  { %5438 = vmatmul.mubr.msk.bf16.vlgmr.msra.gmra.mrb[76].mxu0 %vm155_vm2, %v2670_v26 }
0x198f   :  { %5449 = vmatprep.mubr.msk.bf16.mxu0 %vm6075_vm0, %v6074_v1 }
0x1991   :  { %v2793_v34 = vpop.permute.xlu1 %2792  ;;  %v2912_v62 = vpop.permute.xlu0 %2911 }
0x1992   :  { %v6825_v6 = vsel %vm155_vm2, %v2793_v34, 0 }
0x1993   :  { %5448 = vmatpush3.bf16.xpose.msra.mxu0 %v6825_v6 }
0x1994   :  { %5459 = vmatprep.subr.bf16.mxu0 %v6074_v1 }
0x1995   :  { %v2914_v51 = vpop.permute.xlu1 %2913 }
0x1996   :  { %v6830_v38 = vsel %vm155_vm2, %v2914_v51, 0 }
0x199a   :  { %5450 = vmatmul.mubr.msk.bf16.vlgmr.msra.gmra.mrb[80].mxu0 %vm155_vm2, %v2791_v25 }
0x199b   :  { %5460 = vmatpush3.bf16.xpose.msra.mxu0 %v6830_v38  ;;  %5461 = vmatprep.mubr.msk.bf16.mxu0 %vm6075_vm0, %v6074_v1 }
0x199c   :  { %5471 = vmatprep.subr.bf16.mxu0 %v6074_v1 }
0x19a2   :  { %5462 = vmatmul.mubr.msk.bf16.vlgmr.msra.gmra.mrb[84].mxu0 %vm155_vm2, %v2912_v62 }
0x19a3   :  { %5475 = vmatprep.mubr.msk.bf16.mxu0 %vm6075_vm0, %v6074_v1 }
0x19ef   :  { %v2591_v40 = vpop.f32.mrb[72].mxu0 }
0x19f0   :  { %v2592_v41 = vadd.f32 %v2591_v40, %v6231_v35  ;;  %v5427_v42 = vpop.f32.mrb[73].mxu0 }
0x19f1   :  { %v2594_v30 = vpop.f32.mrb[74].mxu0 }
0x19f2   :  { %v2595_v43 = vadd.f32 %v2594_v30, %v6234_v37  ;;  %v5428_v45 = vpop.f32.mrb[75].mxu0  ;;  %v2598_v44 = vsel %vm203_vm11, %v2592_v41, -inf }
0x19f3   :  { %2599 = vmax.xlane.f32.xlu1 %v2598_v44 }
0x19f4   :  { %v2601_v47 = vsel %vm203_vm11, %v2595_v43, -inf }
0x19f5   :  { %2602 = vmax.xlane.f32.xlu0 %v2601_v47 }
0x1a61   :  { %v2713_v48 = vpop.f32.mrb[76].mxu0 }
0x1a62   :  { %v2714_v46 = vadd.f32 %v2713_v48, %v6231_v35  ;;  %v5439_v3 = vpop.f32.mrb[77].mxu0 }
0x1a63   :  { %v2716_v55 = vpop.f32.mrb[78].mxu0 }
0x1a64   :  { %v2717_v2 = vadd.f32 %v2716_v55, %v6234_v37  ;;  %v5440_v50 = vpop.f32.mrb[79].mxu0  ;;  %v2720_v56 = vsel %vm203_vm11, %v2714_v46, -inf }
0x1a65   :  { %2721 = vmax.xlane.f32.xlu0 %v2720_v56 }
0x1a66   :  { %v2723_v57 = vsel %vm203_vm11, %v2717_v2, -inf }
0x1a67   :  { %2724 = vmax.xlane.f32.xlu1 %v2723_v57 }
0x1a6d   :  { %v2834_v13 = vpop.f32.mrb[80].mxu0 }
0x1a6e   :  { %v6849_v32 = vadd.f32 %v2834_v13, %v6231_v35  ;;  %v5451_v54 = vpop.f32.mrb[81].mxu0 }
0x1a6f   :  { %v2837_v49 = vpop.f32.mrb[82].mxu0 }
0x1a70   :  { %v2838_v15 = vadd.f32 %v2837_v49, %v6234_v37  ;;  %v5452_v36 = vpop.f32.mrb[83].mxu0  ;;  %v2841_v58 = vsel %vm203_vm11, %v6849_v32, -inf }
0x1a71   :  { %2842 = vmax.xlane.f32.xlu0 %v2841_v58 }
0x1a72   :  { %v2844_v60 = vsel %vm203_vm11, %v2838_v15, -inf }
0x1a73   :  { %2845 = vmax.xlane.f32.xlu1 %v2844_v60 }
0x1a75   :  { %v2955_v61 = vpop.f32.mrb[84].mxu0 }
0x1a76   :  { %v2956_v63 = vadd.f32 %v2955_v61, %v6231_v35  ;;  %v5463_v52 = vpop.f32.mrb[85].mxu0 }
0x1a77   :  { %v2958_v53 = vpop.f32.mrb[86].mxu0 }
0x1a78   :  { %v2959_v12 = vadd.f32 %v2958_v53, %v6234_v37  ;;  %v5464_v5 = vpop.f32.mrb[87].mxu0  ;;  %v2962_v14 = vsel %vm203_vm11, %v2956_v63, -inf }
0x1a79   :  { %2963 = vmax.xlane.f32.xlu0 %v2962_v14 }
0x1a7a   :  { %v2965_v10 = vsel %vm203_vm11, %v2959_v12, -inf }
0x1a7b   :  { %2966 = vmax.xlane.f32.xlu1 %v2965_v10 }
0x1a80   :  { %v2600_v59 = vpop.xlane.xlu1 %2599 }
0x1a81   :  { %v2604_v21 = vsub.f32 %v2592_v41, %v2600_v59 }
0x1a82   :  { %v2603_v18 = vpop.xlane.xlu0 %2602 }
0x1a83   :  { %v2606_v16 = vmul.f32 1.442695, %v2604_v21  ;;  %v2605_v11 = vsub.f32 %v2595_v43, %v2603_v18 }
0x1a85   :  { %5907 = vpow2.f32 %v2606_v16  ;;  %v2608_v17 = vmul.f32 1.442695, %v2605_v11 }
0x1a87   :  { %5909 = vpow2.f32 %v2608_v17 }
0x1a8f   :  { %v6859_v7 = vpop.eup %5907 }
0x1a90   :  { %v2610_v31 = vsel %vm203_vm11, %v6859_v7, 0.0 }
0x1a91   :  { %v5910_v22 = vpop.eup %5909  ;;  %2611 = vadd.xlane.f32.xlu0 %v2610_v31 }
0x1a92   :  { %v2613_v19 = vsel %vm203_vm11, %v5910_v22, 0.0 }
0x1a93   :  { %2614 = vadd.xlane.f32.xlu1 %v2613_v19 }
0x1aa4   :  { %2743 = vrot.lane.b32.xlu1 %v6795_v27, %s6085_s2 }
0x1af2   :  { %v2722_v33 = vpop.xlane.xlu0 %2721 }
0x1af3   :  { %v2726_v8 = vsub.f32 %v2714_v46, %v2722_v33 }
0x1af4   :  { %v2725_v39 = vpop.xlane.xlu1 %2724 }
0x1af5   :  { %v2728_v4 = vmul.f32 1.442695, %v2726_v8  ;;  %v2727_v23 = vsub.f32 %v2717_v2, %v2725_v39 }
0x1af7   :  { %5911 = vpow2.f32 %v2728_v4  ;;  %v2730_v26 = vmul.f32 1.442695, %v2727_v23 }
0x1af9   :  { %5913 = vpow2.f32 %v2730_v26 }
0x1afe   :  { %v2843_v3 = vpop.xlane.xlu0 %2842 }
0x1aff   :  { %v2847_v55 = vsub.f32 %v6849_v32, %v2843_v3 }
0x1b00   :  { %v2846_v34 = vpop.xlane.xlu1 %2845 }
0x1b01   :  { %v5912_v51 = vpop.eup %5911  ;;  %v2848_v25 = vsub.f32 %v2838_v15, %v2846_v34  ;;  %v2849_v50 = vmul.f32 1.442695, %v2847_v55 }
0x1b02   :  { %v2732_v62 = vsel %vm203_vm11, %v5912_v51, 0.0 }
0x1b03   :  { %v5914_v40 = vpop.eup %5913  ;;  %v2851_v41 = vmul.f32 1.442695, %v2848_v25  ;;  %2733 = vadd.xlane.f32.xlu0 %v2732_v62 }
0x1b04   :  { %v2735_v42 = vsel %vm203_vm11, %v5914_v40, 0.0 }
0x1b05   :  { %5915 = vpow2.f32 %v2851_v41  ;;  %2736 = vadd.xlane.f32.xlu1 %v2735_v42 }
0x1b06   :  { %v2964_v2 = vpop.xlane.xlu0 %2963 }
0x1b07   :  { %v2968_v56 = vsub.f32 %v2956_v63, %v2964_v2  ;;  %v6927_v2 = vld [vmem:[%s7340_s4 + $0xe8] sm:$0xff]  }
0x1b08   :  { %v2967_v30 = vpop.xlane.xlu1 %2966 }
0x1b09   :  { %v2969_v43 = vsub.f32 %v2959_v12, %v2967_v30  ;;  %v2970_v57 = vmul.f32 1.442695, %v2968_v56 }
0x1b0b   :  { %v2972_v45 = vmul.f32 1.442695, %v2969_v43 }
0x1b0d   :  { %5917 = vpow2.f32 %v2972_v45 }
0x1b0e   :  { %5919 = vpow2.f32 %v2849_v50 }
0x1b0f   :  { %v6868_v44 = vpop.eup %5915  ;;  %5921 = vpow2.f32 %v2970_v57 }
0x1b10   :  { %v2856_v47 = vsel %vm203_vm11, %v6868_v44, 0.0 }
0x1b11   :  { %2857 = vadd.xlane.f32.xlu1 %v2856_v47 }
0x1b17   :  { %v6872_v48 = vpop.eup %5917 }
0x1b18   :  { %v2977_v46 = vsel %vm203_vm11, %v6872_v48, 0.0  ;;  %v5920_v13 = vpop.eup %5919 }
0x1b19   :  { %2621 = vrot.lane.b32.xlu0 %v6795_v27, %s6086_s15  ;;  %2978 = vadd.xlane.f32.xlu1 %v2977_v46  ;;  %v2853_v54 = vsel %vm203_vm11, %v5920_v13, 0.0  ;;  %v5922_v49 = vpop.eup %5921 }
0x1b1a   :  { %v2974_v15 = vsel %vm203_vm11, %v5922_v49, 0.0 }
0x1b1e   :  { %v2612_v36 = vpop.xlane.xlu0 %2611 }
0x1b20   :  { %v2615_v32 = vpop.xlane.xlu1 %2614 }
0x1b21   :  { %5923 = vrcp.f32 %v2615_v32 }
0x1b22   :  { %5925 = vrcp.f32 %v2612_v36 }
0x1b24   :  { %v6885_v58 = vpop.permute.xlu1 %2743 }
0x1b2a   :  { %2864 = vrot.lane.b32.xlu1 %v6795_v27, %s6087_s16 }
0x1b2b   :  { %v5924_v60 = vpop.eup %5923 }
0x1b2c   :  { %v5926_v63 = vpop.eup %5925  ;;  %v2619_v52 = vmul.f32 %v5924_v60, %v5910_v22 }
0x1b2d   :  { %v2618_v12 = vmul.f32 %v5926_v63, %v6859_v7 }
0x1b38   :  { %2854 = vadd.xlane.f32.xlu0 %v2853_v54 }
0x1b3c   :  { %2975 = vadd.xlane.f32.xlu0 %v2974_v15 }
0x1b52   :  { %2985 = vrot.lane.b32.xlu0 %v6795_v27, %s6088_s17  ;;  %v2620_v27 = vpack.c.bf16 %v2619_v52, %v2618_v12 }
0x1b90   :  { %v2734_v61 = vpop.xlane.xlu0 %2733 }
0x1b91   :  { %5927 = vrcp.f32 %v2734_v61 }
0x1b92   :  { %v2737_v53 = vpop.xlane.xlu1 %2736 }
0x1b93   :  { %5929 = vrcp.f32 %v2737_v53 }
0x1b94   :  { %v6888_v5 = vpop.permute.xlu0 %2621 }
0x1b95   :  { %5430 = vmatpush3.bf16.msra.mxu1 %v6888_v5 }
0x1b96   :  { %5441 = vmatprep.subr.bf16.mxu1 %v6074_v1 }
0x1b98   :  { %5432 = vmatmul.mubr.msk.bf16.vlgmr.msra.gmra.mrb[72].mxu1 %vm203_vm11, %v2620_v27 }
0x1b99   :  { %5442 = vmatpush3.bf16.msra.mxu1 %v6885_v58  ;;  %5443 = vmatprep.mubr.msk.bf16.mxu1 %vm6075_vm0, %v6074_v1 }
0x1b9a   :  { %5453 = vmatprep.subr.bf16.mxu1 %v6074_v1 }
0x1b9b   :  { %v5928_v14 = vpop.eup %5927 }
0x1b9c   :  { %v2740_v59 = vmul.f32 %v5928_v14, %v5912_v51 }
0x1b9d   :  { %v5930_v10 = vpop.eup %5929 }
0x1b9e   :  { %v2741_v21 = vmul.f32 %v5930_v10, %v5914_v40  ;;  %v2858_v16 = vpop.xlane.xlu1 %2857 }
0x1b9f   :  { %5931 = vrcp.f32 %v2858_v16 }
0x1ba0   :  { %v2742_v18 = vpack.c.bf16 %v2741_v21, %v2740_v59 }
0x1ba2   :  { %5444 = vmatmul.mubr.msk.bf16.vlgmr.msra.gmra.mrb[76].mxu1 %vm203_vm11, %v2742_v18 }
0x1ba3   :  { %5455 = vmatprep.mubr.msk.bf16.mxu1 %vm6075_vm0, %v6074_v1 }
0x1ba6   :  { %v2979_v11 = vpop.xlane.xlu1 %2978 }
0x1ba9   :  { %v5932_v22 = vpop.eup %5931 }
0x1baa   :  { %v6900_v17 = vpop.permute.xlu1 %2864  ;;  %v2862_v33 = vmul.f32 %v5932_v22, %v6868_v44 }
0x1bab   :  { %5454 = vmatpush3.bf16.msra.mxu1 %v6900_v17 }
0x1bac   :  { %5465 = vmatprep.subr.bf16.mxu1 %v6074_v1 }
0x1bc5   :  { %v2855_v7 = vpop.xlane.xlu0 %2854 }
0x1bc6   :  { %5933 = vrcp.f32 %v2855_v7  ;;  %v4938_v7 = vld [vmem:[%s7341_s5 + $0x50] ss:$0 sm:$0xff] }
0x1bc9   :  { %v2976_v31 = vpop.xlane.xlu0 %2975 }
0x1bca   :  { %5935 = vrcp.f32 %v2976_v31 }
0x1bcb   :  { %5937 = vrcp.f32 %v2979_v11 }
0x1bcd   :  { %v6905_v23 = vpop.permute.xlu0 %2985 }
0x1bd0   :  { %v5934_v19 = vpop.eup %5933 }
0x1bd1   :  { %v2861_v8 = vmul.f32 %v5934_v19, %v5920_v13 }
0x1bd3   :  { %v2863_v39 = vpack.c.bf16 %v2862_v33, %v2861_v8 }
0x1bd4   :  { %v5936_v4 = vpop.eup %5935 }
0x1bd5   :  { %5456 = vmatmul.mubr.msk.bf16.vlgmr.msra.gmra.mrb[80].mxu1 %vm203_vm11, %v2863_v39  ;;  %v5938_v26 = vpop.eup %5937  ;;  %v2982_v34 = vmul.f32 %v5936_v4, %v5922_v49 }
0x1bd6   :  { %5466 = vmatpush3.bf16.msra.mxu1 %v6905_v23  ;;  %5467 = vmatprep.mubr.msk.bf16.mxu1 %vm6075_vm0, %v6074_v1  ;;  %v2983_v51 = vmul.f32 %v5938_v26, %v6872_v48  ;;  %v6920_v48 = vld [vmem:[%s7340_s4 + $0xe0] sm:$0xff]  }
0x1bd7   :  { %5479 = vmatprep.subr.bf16.mxu1 %v6074_v1  ;;  %5472 = vmatpush3.bf16.msra.mxu0 %v6920_v48 }
0x1bd8   :  { %v2984_v25 = vpack.c.bf16 %v2983_v51, %v2982_v34  ;;  %5473 = vmatprep.subr.bf16.mxu0 %v6074_v1 }
0x1bdb   :  { %5474 = vmatpush3.bf16.msra.mxu0 %v6927_v2 }
0x1bdc   :  { %5487 = vmatprep.subr.bf16.mxu0 %v6074_v1 }
0x1bdd   :  { %5468 = vmatmul.mubr.msk.bf16.vlgmr.msra.gmra.mrb[84].mxu1 %vm203_vm11, %v2984_v25 }
0x1bde   :  { %5483 = vmatprep.mubr.msk.bf16.mxu1 %vm6075_vm0, %v6074_v1 }
0x1c6b   :  { %v2661_v62 = vpop.f32.mrb[72].mxu1 }
0x1c6c   :  { %v5433_v40 = vpop.f32.mrb[73].mxu1 }
0x1c6d   :  { %v2664_v41 = vpop.f32.mrb[74].mxu1 }
0x1c6e   :  { %v5434_v42 = vpop.f32.mrb[75].mxu1 }
0x1c75   :  { %v2783_v30 = vpop.f32.mrb[76].mxu1 }
0x1c76   :  { %v5445_v43 = vpop.f32.mrb[77].mxu1 }
0x1c77   :  { %v2786_v45 = vpop.f32.mrb[78].mxu1 }
0x1c78   :  { %v5720_v44 = vpack.i.bf16 %v2786_v45, %v2783_v30  ;;  %v5446_v47 = vpop.f32.mrb[79].mxu1 }
0x1c79   :  { %v5784_v47 = vld [vmem:[%s7340_s4 + $0x108] sm:$0xff]  }
0x1c7a   :  { %5721 = vrot.lane.b32.xlu1 %v5720_v44, %s6089_s20 }
0x1ca8   :  { %v2904_v46 = vpop.f32.mrb[80].mxu1 }
0x1ca9   :  { %v5457_v3 = vpop.f32.mrb[81].mxu1 }
0x1caa   :  { %v2907_v55 = vpop.f32.mrb[82].mxu1  ;;  %v5786_v3 = vld [vmem:[%s7340_s4 + $0x128] sm:$0xff]  }
0x1cab   :  { %v5725_v50 = vpack.i.bf16 %v2907_v55, %v2904_v46  ;;  %v5458_v56 = vpop.f32.mrb[83].mxu1  ;;  %v5785_v46 = vld [vmem:[%s7340_s4 + $0x120] sm:$0xff]  }
0x1cad   :  { %5726 = vrot.lane.b32.xlu0 %v5725_v50, %s6090_s23 }
0x1cb0   :  { %v3025_v57 = vpop.f32.mrb[84].mxu1 }
0x1cb1   :  { %v5469_v13 = vpop.f32.mrb[85].mxu1 }
0x1cb2   :  { %v3028_v54 = vpop.f32.mrb[86].mxu1 }
0x1cb3   :  { %v5730_v49 = vpack.i.bf16 %v3028_v54, %v3025_v57  ;;  %v5470_v15 = vpop.f32.mrb[87].mxu1 }
0x1cb5   :  { %5731 = vrot.lane.b32.xlu1 %v5730_v49, %s6091_s24 }
0x1cec   :  { %v5722_v32 = vpop.permute.xlu1 %5721 }
0x1ced   :  { %v5724_v60 = vunpack.i.h.bf16 %v5722_v32  ;;  %v5723_v61 = vunpack.i.l.bf16 %v5722_v32  ;;  %v4944_v32 = vld [vmem:[%s7341_s5 + $0x58] ss:$0 sm:$0xff] }
0x1cef   :  { %v3057_v12 = vsel %vm155_vm2, %v2664_v41, %v5724_v60  ;;  %v3056_v27 = vsel %vm155_vm2, %v2661_v62, %v5723_v61 }
0x1d1f   :  { %v5727_v36 = vpop.permute.xlu0 %5726 }
0x1d20   :  { %v5729_v63 = vunpack.i.h.bf16 %v5727_v36  ;;  %v5728_v52 = vunpack.i.l.bf16 %v5727_v36 }
0x1d22   :  { %v3059_v59 = vsel %vm203_vm11, %v3057_v12, %v5729_v63  ;;  %v3058_v21 = vsel %vm203_vm11, %v3056_v27, %v5728_v52  ;;  %v4945_v63 = vld [vmem:[%s7341_s5 + $0x59] ss:$0 sm:$0xff] }
0x1d27   :  { %v5732_v53 = vpop.permute.xlu1 %5731 }
0x1d28   :  { %v5734_v14 = vunpack.i.h.bf16 %v5732_v53  ;;  %v5733_v10 = vunpack.i.l.bf16 %v5732_v53 }
0x1d2a   :  { %v3061_v18 = vsel %vm665_vm12, %v3059_v59, %v5734_v14  ;;  %v3060_v16 = vsel %vm665_vm12, %v3058_v21, %v5733_v10  ;;  %v6026_v14 = vld [vmem:[%s7340_s4 + $0x80] sm:$0xff]   ;;  %v6027_v10 = vld [vmem:[%s7340_s4 + $0x88] sm:$0xff]   ;;  %v5787_v59 = vld [vmem:[%s7340_s4 + $0x130] sm:$0xff]  }
0x1d2b   :  { %v3069_v11 = vpack.c.bf16 %v3061_v18, %v3060_v16  ;;  %v5788_v21 = vld [vmem:[%s7340_s4 + $0x138] sm:$0xff]   ;;  %v4960_v18 = vld [vmem:[%s7341_s5 + $0x60] ss:$0 sm:$0xff] }
0x1d2d   :  { %5476 = vmatmul.mubr.msk.bf16.vlgmr.msra.gmra.mrb[88].mxu0 %vm106_vm1, %v3069_v11 }
0x1d2e   :  { %5495 = vmatprep.mubr.msk.bf16.mxu0 %vm6075_vm0, %v6074_v1  ;;  %5488 = vmatpush3.bf16.msra.mxu0 %v5785_v46 }
0x1d2f   :  { %5489 = vmatprep.subr.bf16.mxu0 %v6074_v1 }
0x1d32   :  { %5490 = vmatpush3.bf16.msra.mxu0 %v5786_v3 }
0x1d33   :  { %5491 = vmatprep.subr.bf16.mxu0 %v6074_v1 }
0x1d36   :  { %5492 = vmatpush3.bf16.msra.mxu0 %v5787_v59 }
0x1d37   :  { %5493 = vmatprep.subr.bf16.mxu0 %v6074_v1 }
0x1d3a   :  { %5494 = vmatpush3.bf16.msra.mxu0 %v5788_v21 }
0x1d3b   :  { %5513 = vmatprep.subr.bf16.mxu0 %v6074_v1 }
0x1e00   :  { %v3123_v31 = vpop.f32.mrb[88].mxu0 }
0x1e01   :  { %v3124_v22 = vadd.f32 %v4938_v7, %v3123_v31  ;;  %v5477_v19 = vpop.f32.mrb[89].mxu0 }
0x1e02   :  { %v3126_v33 = vpop.f32.mrb[90].mxu0 }
0x1e03   :  { %v3133_v8 = vadd.f32 %v3124_v22, %v6783_v0  ;;  %v3127_v39 = vadd.f32 %v4938_v7, %v3126_v33  ;;  %v5478_v4 = vpop.f32.mrb[91].mxu0 }
0x1e04   :  { %v4964_v4 = vld [vmem:[%s7341_s5 + $0x68] ss:$0 sm:$0xff] }
0x1e05   :  { %v3134_v26 = vadd.f32 %v3127_v39, %v6785_v9  ;;  %v3135_v34 = vsel %vm106_vm1, %v3133_v8, 0.0  ;;  %v5783_v9 = vld [vmem:[%s7340_s4 + $0x100] sm:$0xff]  }
0x1e06   :  { %3136 = vadd.xlane.f32.xlu0 %v3135_v34  ;;  %5480 = vmatpush3.bf16.msra.mxu1 %v5783_v9 }
0x1e07   :  { %v3138_v51 = vsel %vm106_vm1, %v3134_v26, 0.0  ;;  %5481 = vmatprep.subr.bf16.mxu1 %v6074_v1 }
0x1e08   :  { %3139 = vadd.xlane.f32.xlu1 %v3138_v51 }
0x1e0a   :  { %5482 = vmatpush3.bf16.msra.mxu1 %v5784_v47 }
0x1e0b   :  { %5499 = vmatprep.subr.bf16.mxu1 %v6074_v1 }
0x1e93   :  { %v3137_v25 = vpop.xlane.xlu0 %3136 }
0x1e94   :  { %v3141_v62 = vmul.f32 0.03125, %v3137_v25 }
0x1e95   :  { %v3140_v40 = vpop.xlane.xlu1 %3139 }
0x1e96   :  { %v3143_v41 = vsub.f32 %v3133_v8, %v3141_v62  ;;  %v3142_v42 = vmul.f32 0.03125, %v3140_v40 }
0x1e98   :  { %v3144_v30 = vsub.f32 %v3134_v26, %v3142_v42  ;;  %v3145_v43 = vmul.f32 %v3143_v41, %v3143_v41 }
0x1e9a   :  { %v3147_v45 = vsel %vm106_vm1, %v3145_v43, 0.0  ;;  %v3146_v0 = vmul.f32 %v3144_v30, %v3144_v30 }
0x1e9b   :  { %3148 = vadd.xlane.f32.xlu0 %v3147_v45 }
0x1e9c   :  { %v3150_v44 = vsel %vm106_vm1, %v3146_v0, 0.0 }
0x1e9f   :  { %3151 = vadd.xlane.f32.xlu0 %v3150_v44 }
0x1f28   :  { %v3149_v55 = vpop.xlane.xlu0 %3148 }
0x1f29   :  { %v3153_v50 = vmul.f32 0.03125, %v3149_v55 }
0x1f2b   :  { %v3155_v56 = vadd.f32 1e-05, %v3153_v50 }
0x1f2c   :  { %v3152_v57 = vpop.xlane.xlu0 %3151 }
0x1f2d   :  { %5939 = vrsqrt.f32 %v3155_v56  ;;  %v3154_v13 = vmul.f32 0.03125, %v3152_v57 }
0x1f2f   :  { %v3156_v54 = vadd.f32 1e-05, %v3154_v13 }
0x1f31   :  { %5941 = vrsqrt.f32 %v3156_v54 }
0x1f37   :  { %v5940_v49 = vpop.eup %5939 }
0x1f38   :  { %v3159_v15 = vmul.f32 %v5940_v49, %v3143_v41 }
0x1f3a   :  { %v3165_v60 = vmul.f32 %v4944_v32, %v3159_v15 }
0x1f3b   :  { %v5942_v36 = vpop.eup %5941 }
0x1f3c   :  { %v3160_v61 = vmul.f32 %v5942_v36, %v3144_v30  ;;  %v3171_v53 = vadd.f32 %v4945_v63, %v3165_v60  ;;  %v4972_v60 = vld [vmem:[%s7341_s5 + $0x70] ss:$0 sm:$0xff] }
0x1f3e   :  { %v3166_v52 = vmul.f32 %v4944_v32, %v3160_v61 }
0x1f40   :  { %v3172_v12 = vadd.f32 %v4945_v63, %v3166_v52 }
0x1f42   :  { %v3191_v27 = vpack.c.bf16 %v3172_v12, %v3171_v53 }
0x1f44   :  { %5484 = vmatmul.mubr.msk.bf16.vlgmr.msra.gmra.mrb[88].mxu1 %vm106_vm1, %v3191_v27 }
0x1f45   :  { %5500 = vmatpush3.bf16.msra.mxu1 %v6026_v14  ;;  %5503 = vmatprep.mubr.msk.bf16.mxu1 %vm6075_vm0, %v6074_v1 }
0x1f46   :  { %5501 = vmatprep.subr.bf16.mxu1 %v6074_v1 }
0x1f49   :  { %5502 = vmatpush3.bf16.msra.mxu1 %v6027_v10 }
0x1f4a   :  { %5507 = vmatprep.subr.bf16.mxu1 %v6074_v1 }
0x2017   :  { %v3245_v16 = vpop.f32.mrb[88].mxu1 }
0x2018   :  { %v3246_v11 = vadd.f32 %v4960_v18, %v3245_v16  ;;  %v5485_v7 = vpop.f32.mrb[89].mxu1 }
0x2019   :  { %v3248_v31 = vpop.f32.mrb[90].mxu1 }
0x201a   :  { %v3249_v22 = vadd.f32 %v4960_v18, %v3248_v31  ;;  %v5486_v19 = vpop.f32.mrb[91].mxu1  ;;  %v3252_v33 = vmax.f32 %v3246_v11, 0.0  ;;  %v6028_v11 = vld [vmem:[%s7341_s5 + $0x30] ss:$0 sm:$0xff] }
0x201c   :  { %v3253_v8 = vmax.f32 %v3249_v22, 0.0 }
0x201e   :  { %v3254_v39 = vpack.c.bf16 %v3253_v8, %v3252_v33 }
0x2020   :  { %5496 = vmatmul.mubr.msk.bf16.vlgmr.msra.gmra.mrb[92].mxu0 %vm890_vm13, %v3254_v39 }
0x2021   :  { %5515 = vmatprep.mubr.msk.bf16.mxu0 %vm6075_vm0, %v6074_v1 }
0x20f3   :  { %v3320_v26 = vpop.f32.mrb[92].mxu0 }
0x20f4   :  { %v3321_v34 = vadd.f32 %v4964_v4, %v3320_v26  ;;  %v5497_v51 = vpop.f32.mrb[93].mxu0 }
0x20f5   :  { %v3323_v25 = vpop.f32.mrb[94].mxu0 }
0x20f6   :  { %v3330_v62 = vadd.f32 %v3321_v34, %v3171_v53  ;;  %v3324_v40 = vadd.f32 %v4964_v4, %v3323_v25  ;;  %v5498_v41 = vpop.f32.mrb[95].mxu0 }
0x20f8   :  { %v3331_v42 = vadd.f32 %v3324_v40, %v3172_v12  ;;  %v3332_v30 = vsel %vm106_vm1, %v3330_v62, 0.0  ;;  %v4973_v12 = vld [vmem:[%s7341_s5 + $0x71] ss:$0 sm:$0xff] }
0x20f9   :  { %3333 = vadd.xlane.f32.xlu1 %v3332_v30  ;;  %v6030_v30 = vld [vmem:[%s7340_s4 + $0xa8] sm:$0xff]  }
0x20fa   :  { %v3335_v43 = vsel %vm106_vm1, %v3331_v42, 0.0 }
0x20fb   :  { %3336 = vadd.xlane.f32.xlu0 %v3335_v43 }
0x2186   :  { %v3334_v45 = vpop.xlane.xlu1 %3333 }
0x2187   :  { %v3338_v0 = vmul.f32 0.03125, %v3334_v45 }
0x2188   :  { %v3337_v44 = vpop.xlane.xlu0 %3336 }
0x2189   :  { %v3340_v9 = vsub.f32 %v3330_v62, %v3338_v0  ;;  %v3339_v47 = vmul.f32 0.03125, %v3337_v44 }
0x218b   :  { %v3341_v46 = vsub.f32 %v3331_v42, %v3339_v47  ;;  %v3342_v3 = vmul.f32 %v3340_v9, %v3340_v9  ;;  %v6029_v42 = vld [vmem:[%s7340_s4 + $0xa0] sm:$0xff]  }
0x218d   :  { %v3344_v55 = vsel %vm106_vm1, %v3342_v3, 0.0  ;;  %v3343_v50 = vmul.f32 %v3341_v46, %v3341_v46 }
0x218e   :  { %3345 = vadd.xlane.f32.xlu1 %v3344_v55 }
0x218f   :  { %v3347_v56 = vsel %vm106_vm1, %v3343_v50, 0.0 }
0x2190   :  { %3348 = vadd.xlane.f32.xlu0 %v3347_v56 }
0x221b   :  { %v3346_v57 = vpop.xlane.xlu1 %3345 }
0x221c   :  { %v3350_v13 = vmul.f32 0.03125, %v3346_v57 }
0x221d   :  { %v3349_v54 = vpop.xlane.xlu0 %3348 }
0x221e   :  { %v3352_v49 = vadd.f32 1e-05, %v3350_v13  ;;  %v3351_v15 = vmul.f32 0.03125, %v3349_v54 }
0x2220   :  { %5943 = vrsqrt.f32 %v3352_v49  ;;  %v3353_v32 = vadd.f32 1e-05, %v3351_v15 }
0x2222   :  { %5945 = vrsqrt.f32 %v3353_v32 }
0x222a   :  { %v5944_v36 = vpop.eup %5943 }
0x222b   :  { %v3356_v61 = vmul.f32 %v5944_v36, %v3340_v9 }
0x222c   :  { %v5946_v63 = vpop.eup %5945 }
0x222d   :  { %v3362_v52 = vmul.f32 %v4972_v60, %v3356_v61  ;;  %v3357_v53 = vmul.f32 %v5946_v63, %v3341_v46 }
0x222f   :  { %v3363_v27 = vmul.f32 %v4972_v60, %v3357_v53  ;;  %v7011_v14 = vadd.f32 %v4973_v12, %v3362_v52 }
0x2231   :  { %v7013_v10 = vadd.f32 %v4973_v12, %v3363_v27 }
0x2233   :  { %v3370_v59 = vpack.c.bf16 %v7013_v10, %v7011_v14 }
0x2235   :  { %5504 = vmatmul.mubr.msk.bf16.vlgmr.msra.gmra.mrb[92].mxu1 %vm106_vm1, %v3370_v59 }
0x2236   :  { %5509 = vmatprep.mubr.msk.bf16.mxu1 %vm6075_vm0, %v6074_v1 }
0x2308   :  { %v3408_v21 = vpop.f32.mrb[92].mxu1 }
0x2309   :  { %v5505_v18 = vpop.f32.mrb[93].mxu1  ;;  %v3409_v7 = vadd.f32 %v6028_v11, %v3408_v21 }
0x230a   :  { %v3411_v16 = vpop.f32.mrb[94].mxu1 }
0x230b   :  { %v3412_v31 = vadd.f32 %v6028_v11, %v3411_v16  ;;  %v5506_v22 = vpop.f32.mrb[95].mxu1 }
0x230d   :  { %v7023_v19 = vpack.c.bf16 %v3412_v31, %v3409_v7 }
0x230f   :  { %3538 = vrot.lane.b32.xlu0 %v7023_v19, %s6079_s9  ;;  %3417 = vrot.lane.b32.xlu1 %v7023_v19, %s6077_s7 }
0x2313   :  { %3657 = vrot.lane.b32.xlu0 %v7023_v19, %s6081_s11  ;;  %3536 = vrot.lane.b32.xlu1 %v7023_v19, %s6076_s30 }
0x2317   :  { %3778 = vrot.lane.b32.xlu0 %v7023_v19, %s6082_s12  ;;  %3659 = vrot.lane.b32.xlu1 %v7023_v19, %s6078_s8 }
0x231b   :  { %3780 = vrot.lane.b32.xlu1 %v7023_v19, %s6080_s10 }
0x2381   :  { %v3418_v33 = vpop.permute.xlu1 %3417  ;;  %v3539_v39 = vpop.permute.xlu0 %3538 }
0x2382   :  { %v3423_v8 = vsel %vm155_vm2, %v3418_v33, 0  ;;  %v3544_v26 = vsel %vm155_vm2, %v3539_v39, 0 }
0x2383   :  { %5508 = vmatpush3.bf16.xpose.msra.mxu1 %v3423_v8 }
0x2384   :  { %5519 = vmatprep.subr.bf16.mxu1 %v6074_v1 }
0x2385   :  { %v3537_v4 = vpop.permute.xlu1 %3536  ;;  %v3658_v62 = vpop.permute.xlu0 %3657 }
0x2389   :  { %v3660_v34 = vpop.permute.xlu1 %3659  ;;  %v3779_v41 = vpop.permute.xlu0 %3778 }
0x238a   :  { %5510 = vmatmul.mubr.msk.bf16.vlgmr.msra.gmra.mrb[96].mxu1 %vm155_vm2, %v7023_v19  ;;  %v3665_v51 = vsel %vm155_vm2, %v3660_v34, 0 }
0x238b   :  { %5520 = vmatpush3.bf16.xpose.msra.mxu1 %v3544_v26  ;;  %5521 = vmatprep.mubr.msk.bf16.mxu1 %vm6075_vm0, %v6074_v1 }
0x238c   :  { %5531 = vmatprep.subr.bf16.mxu1 %v6074_v1 }
0x238d   :  { %v3781_v25 = vpop.permute.xlu1 %3780 }
0x238e   :  { %v3786_v40 = vsel %vm155_vm2, %v3781_v25, 0 }
0x2392   :  { %5522 = vmatmul.mubr.msk.bf16.vlgmr.msra.gmra.mrb[100].mxu1 %vm155_vm2, %v3537_v4 }
0x2393   :  { %5532 = vmatpush3.bf16.xpose.msra.mxu1 %v3665_v51  ;;  %5533 = vmatprep.mubr.msk.bf16.mxu1 %vm6075_vm0, %v6074_v1 }
0x2394   :  { %5543 = vmatprep.subr.bf16.mxu1 %v6074_v1 }
0x239a   :  { %5534 = vmatmul.mubr.msk.bf16.vlgmr.msra.gmra.mrb[104].mxu1 %vm155_vm2, %v3658_v62 }
0x239b   :  { %5544 = vmatpush3.bf16.xpose.msra.mxu1 %v3786_v40  ;;  %5545 = vmatprep.mubr.msk.bf16.mxu1 %vm6075_vm0, %v6074_v1 }
0x239c   :  { %5555 = vmatprep.subr.bf16.mxu1 %v6074_v1 }
0x23a2   :  { %5546 = vmatmul.mubr.msk.bf16.vlgmr.msra.gmra.mrb[108].mxu1 %vm155_vm2, %v3779_v41 }
0x23a3   :  { %5556 = vmatpush3.bf16.msra.mxu1 %v6029_v42  ;;  %5559 = vmatprep.mubr.msk.bf16.mxu1 %vm6075_vm0, %v6074_v1 }
0x23a4   :  { %5557 = vmatprep.subr.bf16.mxu1 %v6074_v1 }
0x23a7   :  { %5558 = vmatpush3.bf16.msra.mxu1 %v6030_v30 }
0x23a8   :  { %5571 = vmatprep.subr.bf16.mxu1 %v6074_v1 }
0x245d   :  { %v3459_v43 = vpop.f32.mrb[96].mxu1 }
0x245e   :  { %v3460_v45 = vadd.f32 %v3459_v43, %v6657_v29  ;;  %v5511_v0 = vpop.f32.mrb[97].mxu1 }
0x245f   :  { %v3462_v44 = vpop.f32.mrb[98].mxu1 }
0x2460   :  { %v3463_v9 = vadd.f32 %v3462_v44, %v6660_v28  ;;  %v5512_v47 = vpop.f32.mrb[99].mxu1  ;;  %v3466_v46 = vsel %vm203_vm11, %v3460_v45, -inf }
0x2461   :  { %3467 = vmax.xlane.f32.xlu1 %v3466_v46 }
0x2462   :  { %v3469_v3 = vsel %vm203_vm11, %v3463_v9, -inf }
0x2463   :  { %3470 = vmax.xlane.f32.xlu0 %v3469_v3 }
0x2465   :  { %v3580_v55 = vpop.f32.mrb[100].mxu1 }
0x2466   :  { %v3581_v50 = vadd.f32 %v3580_v55, %v6657_v29  ;;  %v5523_v56 = vpop.f32.mrb[101].mxu1 }
0x2467   :  { %v3583_v57 = vpop.f32.mrb[102].mxu1 }
0x2468   :  { %v3584_v13 = vadd.f32 %v3583_v57, %v6660_v28  ;;  %v5524_v54 = vpop.f32.mrb[103].mxu1  ;;  %v3587_v49 = vsel %vm203_vm11, %v3581_v50, -inf }
0x2469   :  { %3588 = vmax.xlane.f32.xlu0 %v3587_v49 }
0x246a   :  { %v3590_v15 = vsel %vm203_vm11, %v3584_v13, -inf }
0x246b   :  { %3591 = vmax.xlane.f32.xlu1 %v3590_v15 }
0x246d   :  { %v3701_v32 = vpop.f32.mrb[104].mxu1 }
0x246e   :  { %v3702_v36 = vadd.f32 %v3701_v32, %v6657_v29  ;;  %v5535_v60 = vpop.f32.mrb[105].mxu1 }
0x246f   :  { %v3704_v61 = vpop.f32.mrb[106].mxu1 }
0x2470   :  { %v3705_v63 = vadd.f32 %v3704_v61, %v6660_v28  ;;  %v5536_v52 = vpop.f32.mrb[107].mxu1  ;;  %v3708_v53 = vsel %vm203_vm11, %v3702_v36, -inf }
0x2471   :  { %3709 = vmax.xlane.f32.xlu0 %v3708_v53 }
0x2472   :  { %v3711_v12 = vsel %vm203_vm11, %v3705_v63, -inf }
0x2473   :  { %3712 = vmax.xlane.f32.xlu1 %v3711_v12 }
0x2475   :  { %v3822_v27 = vpop.f32.mrb[108].mxu1 }
0x2476   :  { %v3823_v59 = vadd.f32 %v3822_v27, %v6657_v29  ;;  %v5547_v21 = vpop.f32.mrb[109].mxu1 }
0x2477   :  { %v3825_v18 = vpop.f32.mrb[110].mxu1 }
0x2478   :  { %v3826_v16 = vadd.f32 %v3825_v18, %v6660_v28  ;;  %v5548_v11 = vpop.f32.mrb[111].mxu1  ;;  %v3829_v7 = vsel %vm203_vm11, %v3823_v59, -inf }
0x2479   :  { %3830 = vmax.xlane.f32.xlu0 %v3829_v7 }
0x247a   :  { %v3832_v31 = vsel %vm203_vm11, %v3826_v16, -inf }
0x247b   :  { %3833 = vmax.xlane.f32.xlu1 %v3832_v31 }
0x24ee   :  { %v3468_v22 = vpop.xlane.xlu1 %3467 }
0x24ef   :  { %v3472_v33 = vsub.f32 %v3460_v45, %v3468_v22 }
0x24f0   :  { %v3471_v8 = vpop.xlane.xlu0 %3470 }
0x24f1   :  { %v3474_v39 = vmul.f32 1.442695, %v3472_v33  ;;  %v3473_v4 = vsub.f32 %v3463_v9, %v3471_v8 }
0x24f3   :  { %5947 = vpow2.f32 %v3474_v39  ;;  %v3476_v26 = vmul.f32 1.442695, %v3473_v4 }
0x24f5   :  { %5949 = vpow2.f32 %v3476_v26 }
0x24f6   :  { %v3589_v29 = vpop.xlane.xlu0 %3588 }
0x24f7   :  { %v3593_v34 = vsub.f32 %v3581_v50, %v3589_v29 }
0x24f8   :  { %v3592_v30 = vpop.xlane.xlu1 %3591 }
0x24f9   :  { %v3595_v51 = vmul.f32 1.442695, %v3593_v34  ;;  %v3594_v43 = vsub.f32 %v3584_v13, %v3592_v30 }
0x24fb   :  { %5951 = vpow2.f32 %v3595_v51  ;;  %v3597_v44 = vmul.f32 1.442695, %v3594_v43 }
0x24fd   :  { %v5948_v28 = vpop.eup %5947  ;;  %5953 = vpow2.f32 %v3597_v44 }
0x24fe   :  { %v3478_v25 = vsel %vm203_vm11, %v5948_v28, 0.0  ;;  %v3710_v0 = vpop.xlane.xlu0 %3709 }
0x24ff   :  { %v5950_v62 = vpop.eup %5949  ;;  %3479 = vadd.xlane.f32.xlu0 %v3478_v25  ;;  %v3714_v46 = vsub.f32 %v3702_v36, %v3710_v0 }
0x2500   :  { %v3481_v40 = vsel %vm203_vm11, %v5950_v62, 0.0  ;;  %v3713_v45 = vpop.xlane.xlu1 %3712 }
0x2501   :  { %3482 = vadd.xlane.f32.xlu1 %v3481_v40  ;;  %v3715_v9 = vsub.f32 %v3705_v63, %v3713_v45  ;;  %v3716_v56 = vmul.f32 1.442695, %v3714_v46 }
0x2503   :  { %v3718_v55 = vmul.f32 1.442695, %v3715_v9 }
0x2505   :  { %v7086_v41 = vpop.eup %5951  ;;  %5955 = vpow2.f32 %v3718_v55  ;;  %v6032_v55 = vld [vmem:[%s7340_s4 + $0xc8] sm:$0xff]  }
0x2506   :  { %v3599_v42 = vsel %vm203_vm11, %v7086_v41, 0.0  ;;  %v3831_v3 = vpop.xlane.xlu0 %3830  ;;  %5957 = vpow2.f32 %v3716_v56 }
0x2507   :  { %3600 = vadd.xlane.f32.xlu0 %v3599_v42  ;;  %v3835_v57 = vsub.f32 %v3823_v59, %v3831_v3  ;;  %v5954_v15 = vpop.eup %5953  ;;  %v6031_v3 = vld [vmem:[%s7340_s4 + $0xc0] sm:$0xff]  }
0x2508   :  { %v3834_v47 = vpop.xlane.xlu1 %3833  ;;  %v3602_v13 = vsel %vm203_vm11, %v5954_v15, 0.0 }
0x2509   :  { %v3836_v50 = vsub.f32 %v3826_v16, %v3834_v47  ;;  %v3837_v49 = vmul.f32 1.442695, %v3835_v57 }
0x250b   :  { %v3839_v54 = vmul.f32 1.442695, %v3836_v50 }
0x250d   :  { %5959 = vpow2.f32 %v3839_v54 }
0x250e   :  { %5961 = vpow2.f32 %v3837_v49 }
0x250f   :  { %v5956_v32 = vpop.eup %5955 }
0x2510   :  { %v5958_v60 = vpop.eup %5957  ;;  %v3723_v36 = vsel %vm203_vm11, %v5956_v32, 0.0 }
0x2511   :  { %v3720_v63 = vsel %vm203_vm11, %v5958_v60, 0.0 }
0x2512   :  { %3610 = vrot.lane.b32.xlu1 %v7023_v19, %s6085_s2 }
0x2517   :  { %v7096_v61 = vpop.eup %5959 }
0x2518   :  { %v5962_v52 = vpop.eup %5961  ;;  %v3844_v53 = vsel %vm203_vm11, %v7096_v61, 0.0 }
0x2519   :  { %v3841_v12 = vsel %vm203_vm11, %v5962_v52, 0.0 }
0x251d   :  { %3489 = vrot.lane.b32.xlu0 %v7023_v19, %s6086_s15 }
0x2536   :  { %3603 = vadd.xlane.f32.xlu1 %v3602_v13 }
0x253a   :  { %3724 = vadd.xlane.f32.xlu1 %v3723_v36 }
0x253c   :  { %3721 = vadd.xlane.f32.xlu0 %v3720_v63 }
0x253e   :  { %3845 = vadd.xlane.f32.xlu1 %v3844_v53 }
0x2540   :  { %3842 = vadd.xlane.f32.xlu0 %v3841_v12 }
0x254f   :  { %3731 = vrot.lane.b32.xlu1 %v7023_v19, %s6087_s16 }
0x2556   :  { %3852 = vrot.lane.b32.xlu0 %v7023_v19, %s6088_s17 }
0x258c   :  { %v3480_v27 = vpop.xlane.xlu0 %3479 }
0x258d   :  { %5963 = vrcp.f32 %v3480_v27 }
0x258e   :  { %v3483_v59 = vpop.xlane.xlu1 %3482 }
0x258f   :  { %5965 = vrcp.f32 %v3483_v59 }
0x2592   :  { %v3611_v33 = vpop.permute.xlu1 %3610 }
0x2594   :  { %v3601_v21 = vpop.xlane.xlu0 %3600 }
0x2595   :  { %5967 = vrcp.f32 %v3601_v21 }
0x2597   :  { %v5964_v18 = vpop.eup %5963 }
0x2598   :  { %v3490_v16 = vpop.permute.xlu0 %3489  ;;  %v3486_v7 = vmul.f32 %v5964_v18, %v5948_v28 }
0x2599   :  { %v5966_v11 = vpop.eup %5965  ;;  %5514 = vmatpush3.bf16.msra.mxu0 %v3490_v16 }
0x259a   :  { %v3487_v31 = vmul.f32 %v5966_v11, %v5950_v62  ;;  %5525 = vmatprep.subr.bf16.mxu0 %v6074_v1 }
0x259c   :  { %v3488_v22 = vpack.c.bf16 %v3487_v31, %v3486_v7 }
0x259e   :  { %5516 = vmatmul.mubr.msk.bf16.vlgmr.msra.gmra.mrb[96].mxu0 %vm203_vm11, %v3488_v22 }
0x259f   :  { %5526 = vmatpush3.bf16.msra.mxu0 %v3611_v33  ;;  %5527 = vmatprep.mubr.msk.bf16.mxu0 %vm6075_vm0, %v6074_v1  ;;  %v5968_v4 = vpop.eup %5967 }
0x25a0   :  { %5537 = vmatprep.subr.bf16.mxu0 %v6074_v1  ;;  %v3607_v51 = vmul.f32 %v5968_v4, %v7086_v41 }
0x25c3   :  { %v3604_v19 = vpop.xlane.xlu1 %3603 }
0x25c4   :  { %5969 = vrcp.f32 %v3604_v19 }
0x25c7   :  { %v3725_v8 = vpop.xlane.xlu1 %3724 }
0x25c8   :  { %5971 = vrcp.f32 %v3725_v8 }
0x25c9   :  { %v3722_v39 = vpop.xlane.xlu0 %3721 }
0x25ca   :  { %5973 = vrcp.f32 %v3722_v39 }
0x25cb   :  { %v3846_v26 = vpop.xlane.xlu1 %3845 }
0x25cd   :  { %v3843_v29 = vpop.xlane.xlu0 %3842 }
0x25ce   :  { %v5970_v34 = vpop.eup %5969  ;;  %5975 = vrcp.f32 %v3843_v29 }
0x25cf   :  { %v3608_v28 = vmul.f32 %v5970_v34, %v5954_v15  ;;  %5977 = vrcp.f32 %v3846_v26  ;;  %v3732_v40 = vpop.permute.xlu1 %3731 }
0x25d1   :  { %v3609_v25 = vpack.c.bf16 %v3608_v28, %v3607_v51  ;;  %v3853_v41 = vpop.permute.xlu0 %3852 }
0x25d2   :  { %v5972_v62 = vpop.eup %5971 }
0x25d3   :  { %5528 = vmatmul.mubr.msk.bf16.vlgmr.msra.gmra.mrb[100].mxu0 %vm203_vm11, %v3609_v25  ;;  %v3729_v43 = vmul.f32 %v5972_v62, %v5956_v32 }
0x25d4   :  { %v5974_v42 = vpop.eup %5973  ;;  %5538 = vmatpush3.bf16.msra.mxu0 %v3732_v40  ;;  %5539 = vmatprep.mubr.msk.bf16.mxu0 %vm6075_vm0, %v6074_v1  ;;  %v6033_v40 = vld [vmem:[%s7341_s5 + $0x38] ss:$0 sm:$0xff] }
0x25d5   :  { %v3728_v30 = vmul.f32 %v5974_v42, %v5958_v60  ;;  %5549 = vmatprep.subr.bf16.mxu0 %v6074_v1 }
0x25d7   :  { %v3730_v45 = vpack.c.bf16 %v3729_v43, %v3728_v30 }
0x25d8   :  { %v5976_v0 = vpop.eup %5975 }
0x25d9   :  { %v5978_v44 = vpop.eup %5977  ;;  %v3849_v9 = vmul.f32 %v5976_v0, %v5962_v52 }
0x25da   :  { %v3850_v47 = vmul.f32 %v5978_v44, %v7096_v61 }
0x25db   :  { %5540 = vmatmul.mubr.msk.bf16.vlgmr.msra.gmra.mrb[104].mxu0 %vm203_vm11, %v3730_v45 }
0x25dc   :  { %5550 = vmatpush3.bf16.msra.mxu0 %v3853_v41  ;;  %5551 = vmatprep.mubr.msk.bf16.mxu0 %vm6075_vm0, %v6074_v1  ;;  %v3851_v46 = vpack.c.bf16 %v3850_v47, %v3849_v9 }
0x25dd   :  { %5563 = vmatprep.subr.bf16.mxu0 %v6074_v1 }
0x25e3   :  { %5552 = vmatmul.mubr.msk.bf16.vlgmr.msra.gmra.mrb[108].mxu0 %vm203_vm11, %v3851_v46 }
0x25e4   :  { %5564 = vmatpush3.bf16.msra.mxu0 %v6031_v3  ;;  %5567 = vmatprep.mubr.msk.bf16.mxu0 %vm6075_vm0, %v6074_v1 }
0x25e5   :  { %5565 = vmatprep.subr.bf16.mxu0 %v6074_v1 }
0x25e8   :  { %5566 = vmatpush3.bf16.msra.mxu0 %v6032_v55 }
0x25e9   :  { %5577 = vmatprep.subr.bf16.mxu0 %v6074_v1 }
0x2671   :  { %v3529_v50 = vpop.f32.mrb[96].mxu0 }
0x2672   :  { %v5517_v56 = vpop.f32.mrb[97].mxu0 }
0x2673   :  { %v3532_v57 = vpop.f32.mrb[98].mxu0 }
0x2674   :  { %v5518_v54 = vpop.f32.mrb[99].mxu0 }
0x26a6   :  { %v3650_v49 = vpop.f32.mrb[100].mxu0 }
0x26a7   :  { %v5529_v15 = vpop.f32.mrb[101].mxu0 }
0x26a8   :  { %v3653_v13 = vpop.f32.mrb[102].mxu0 }
0x26a9   :  { %v5735_v32 = vpack.i.bf16 %v3653_v13, %v3650_v49  ;;  %v5530_v60 = vpop.f32.mrb[103].mxu0 }
0x26ab   :  { %5736 = vrot.lane.b32.xlu1 %v5735_v32, %s6089_s20 }
0x26ae   :  { %v3771_v36 = vpop.f32.mrb[104].mxu0 }
0x26af   :  { %v5541_v61 = vpop.f32.mrb[105].mxu0 }
0x26b0   :  { %v3774_v63 = vpop.f32.mrb[106].mxu0 }
0x26b1   :  { %v5740_v52 = vpack.i.bf16 %v3774_v63, %v3771_v36  ;;  %v5542_v53 = vpop.f32.mrb[107].mxu0 }
0x26b2   :  { %v6034_v53 = vld [vmem:[%s7341_s5 + $0x40] ss:$0 sm:$0xff] }
0x26b3   :  { %5741 = vrot.lane.b32.xlu0 %v5740_v52, %s6090_s23 }
0x26b6   :  { %v3892_v12 = vpop.f32.mrb[108].mxu0 }
0x26b7   :  { %v5553_v27 = vpop.f32.mrb[109].mxu0 }
0x26b8   :  { %v3895_v59 = vpop.f32.mrb[110].mxu0 }
0x26b9   :  { %v5745_v21 = vpack.i.bf16 %v3895_v59, %v3892_v12  ;;  %v5554_v18 = vpop.f32.mrb[111].mxu0 }
0x26bb   :  { %5746 = vrot.lane.b32.xlu1 %v5745_v21, %s6091_s24  ;;  %v6035_v21 = vld [vmem:[%s7341_s5 + $0x41] ss:$0 sm:$0xff] }
0x271d   :  { %v5737_v16 = vpop.permute.xlu1 %5736 }
0x271e   :  { %v5739_v7 = vunpack.i.h.bf16 %v5737_v16  ;;  %v5738_v31 = vunpack.i.l.bf16 %v5737_v16 }
0x2720   :  { %v3924_v8 = vsel %vm155_vm2, %v3532_v57, %v5739_v7  ;;  %v3923_v39 = vsel %vm155_vm2, %v3529_v50, %v5738_v31 }
0x2725   :  { %v5742_v11 = vpop.permute.xlu0 %5741 }
0x2726   :  { %v5744_v22 = vunpack.i.h.bf16 %v5742_v11  ;;  %v5743_v33 = vunpack.i.l.bf16 %v5742_v11 }
0x2728   :  { %v3925_v29 = vsel %vm203_vm11, %v3923_v39, %v5743_v33  ;;  %v3926_v34 = vsel %vm203_vm11, %v3924_v8, %v5744_v22  ;;  %v6036_v33 = vld [vmem:[%s7341_s5 + $0x48] ss:$0 sm:$0xff] }
0x272d   :  { %v5747_v19 = vpop.permute.xlu1 %5746 }
0x272e   :  { %v5749_v4 = vunpack.i.h.bf16 %v5747_v19  ;;  %v5748_v26 = vunpack.i.l.bf16 %v5747_v19 }
0x2730   :  { %v3927_v51 = vsel %vm665_vm12, %v3925_v29, %v5748_v26  ;;  %v3928_v28 = vsel %vm665_vm12, %v3926_v34, %v5749_v4 }
0x2731   :  { %v3929_v25 = vpack.c.bf16 %v3928_v28, %v3927_v51 }
0x2733   :  { %5560 = vmatmul.mubr.msk.bf16.vlgmr.msra.gmra.mrb[112].mxu1 %vm106_vm1, %v3929_v25 }
0x2734   :  { %5572 = vmatpush3.bf16.xpose.msra.mxu1 %v6802_v20  ;;  %5573 = vmatprep.mubr.msk.bf16.mxu1 %vm6075_vm0, %v6074_v1 }
0x2735   :  { %5583 = vmatprep.subr.bf16.mxu1 %v6074_v1 }
0x2806   :  { %v3967_v62 = vpop.f32.mrb[112].mxu1 }
0x2807   :  { %v3968_v42 = vadd.f32 %v6033_v40, %v3967_v62  ;;  %v5561_v30 = vpop.f32.mrb[113].mxu1 }
0x2808   :  { %v3970_v43 = vpop.f32.mrb[114].mxu1 }
0x2809   :  { %v3974_v45 = vadd.f32 %v3968_v42, %v7011_v14  ;;  %v3971_v0 = vadd.f32 %v6033_v40, %v3970_v43  ;;  %v5562_v41 = vpop.f32.mrb[115].mxu1 }
0x280b   :  { %v3975_v44 = vadd.f32 %v3971_v0, %v7013_v10  ;;  %v3976_v20 = vsel %vm106_vm1, %v3974_v45, 0.0 }
0x280c   :  { %3977 = vadd.xlane.f32.xlu0 %v3976_v20 }
0x280d   :  { %v3979_v9 = vsel %vm106_vm1, %v3975_v44, 0.0 }
0x280e   :  { %3980 = vadd.xlane.f32.xlu1 %v3979_v9 }
0x2899   :  { %v3978_v47 = vpop.xlane.xlu0 %3977 }
0x289a   :  { %v3982_v46 = vmul.f32 0.03125, %v3978_v47 }
0x289b   :  { %v3981_v3 = vpop.xlane.xlu1 %3980 }
0x289c   :  { %v3984_v55 = vsub.f32 %v3974_v45, %v3982_v46  ;;  %v3983_v50 = vmul.f32 0.03125, %v3981_v3 }
0x289e   :  { %v3985_v56 = vsub.f32 %v3975_v44, %v3983_v50  ;;  %v3986_v57 = vmul.f32 %v3984_v55, %v3984_v55 }
0x28a0   :  { %v3988_v54 = vsel %vm106_vm1, %v3986_v57, 0.0  ;;  %v3987_v14 = vmul.f32 %v3985_v56, %v3985_v56 }
0x28a1   :  { %3989 = vadd.xlane.f32.xlu0 %v3988_v54 }
0x28a2   :  { %v3991_v49 = vsel %vm106_vm1, %v3987_v14, 0.0 }
0x28a5   :  { %3992 = vadd.xlane.f32.xlu0 %v3991_v49 }
0x292e   :  { %v3990_v10 = vpop.xlane.xlu0 %3989 }
0x292f   :  { %v3994_v15 = vmul.f32 0.03125, %v3990_v10 }
0x2931   :  { %v3996_v13 = vadd.f32 1e-05, %v3994_v15 }
0x2932   :  { %v3993_v32 = vpop.xlane.xlu0 %3992 }
0x2933   :  { %5979 = vrsqrt.f32 %v3996_v13  ;;  %v3995_v60 = vmul.f32 0.03125, %v3993_v32 }
0x2935   :  { %v3997_v36 = vadd.f32 1e-05, %v3995_v60 }
0x2937   :  { %5981 = vrsqrt.f32 %v3997_v36 }
0x293d   :  { %v5980_v61 = vpop.eup %5979 }
0x293e   :  { %v4000_v63 = vmul.f32 %v5980_v61, %v3984_v55 }
0x2940   :  { %v4002_v12 = vmul.f32 %v6034_v53, %v4000_v63 }
0x2941   :  { %v5982_v52 = vpop.eup %5981 }
0x2942   :  { %v4001_v27 = vmul.f32 %v5982_v52, %v3985_v56  ;;  %v7161_v18 = vadd.f32 %v6035_v21, %v4002_v12 }
0x2944   :  { %v4003_v59 = vmul.f32 %v6034_v53, %v4001_v27 }
0x2946   :  { %v7163_v16 = vadd.f32 %v6035_v21, %v4003_v59 }
0x2948   :  { %v4006_v11 = vpack.c.bf16 %v7163_v16, %v7161_v18 }
0x294a   :  { %5568 = vmatmul.mubr.msk.bf16.vlgmr.msra.gmra.mrb[112].mxu0 %vm106_vm1, %v4006_v11 }
0x294b   :  { %5578 = vmatpush3.bf16.msra.mxu0 %v6888_v5  ;;  %5579 = vmatprep.mubr.msk.bf16.mxu0 %vm6075_vm0, %v6074_v1 }
0x294c   :  { %5589 = vmatprep.subr.bf16.mxu0 %v6074_v1 }
0x2a1d   :  { %v4044_v7 = vpop.f32.mrb[112].mxu0 }
0x2a1e   :  { %v5569_v31 = vpop.f32.mrb[113].mxu0  ;;  %v4045_v19 = vadd.f32 %v6036_v33, %v4044_v7 }
0x2a1f   :  { %v4047_v22 = vpop.f32.mrb[114].mxu0 }
0x2a20   :  { %v4048_v8 = vadd.f32 %v6036_v33, %v4047_v22  ;;  %v5570_v39 = vpop.f32.mrb[115].mxu0 }
0x2a22   :  { %v4051_v4 = vpack.c.bf16 %v4048_v8, %v4045_v19 }
0x2a24   :  { %4277 = vrot.lane.b32.xlu0 %v4051_v4, %s6081_s11  ;;  %4164 = vrot.lane.b32.xlu1 %v4051_v4, %s6076_s30 }
0x2a25   :  { %5574 = vmatmul.mubr.msk.bf16.vlgmr.msra.gmra.mrb[116].mxu1 %vm155_vm2, %v4051_v4 }
0x2a26   :  { %5584 = vmatpush3.bf16.xpose.msra.mxu1 %v6809_v24  ;;  %5585 = vmatprep.mubr.msk.bf16.mxu1 %vm6075_vm0, %v6074_v1 }
0x2a27   :  { %5595 = vmatprep.subr.bf16.mxu1 %v6074_v1 }
0x2a28   :  { %4390 = vrot.lane.b32.xlu1 %v4051_v4, %s6082_s12 }
0x2a96   :  { %v4165_v5 = vpop.permute.xlu1 %4164  ;;  %v4278_v26 = vpop.permute.xlu0 %4277 }
0x2a97   :  { %5586 = vmatmul.mubr.msk.bf16.vlgmr.msra.gmra.mrb[120].mxu1 %vm155_vm2, %v4165_v5 }
0x2a98   :  { %5596 = vmatpush3.bf16.xpose.msra.mxu1 %v6825_v6  ;;  %5597 = vmatprep.mubr.msk.bf16.mxu1 %vm6075_vm0, %v6074_v1 }
0x2a99   :  { %5607 = vmatprep.subr.bf16.mxu1 %v6074_v1 }
0x2a9a   :  { %v4391_v24 = vpop.permute.xlu1 %4390 }
0x2a9f   :  { %5598 = vmatmul.mubr.msk.bf16.vlgmr.msra.gmra.mrb[124].mxu1 %vm155_vm2, %v4278_v26 }
0x2aa0   :  { %5608 = vmatpush3.bf16.xpose.msra.mxu1 %v6830_v38  ;;  %5609 = vmatprep.mubr.msk.bf16.mxu1 %vm6075_vm0, %v6074_v1 }
0x2aa1   :  { %5619 = vmatprep.subr.bf16.mxu1 %v6074_v1 }
0x2aa7   :  { %5610 = vmatmul.mubr.msk.bf16.vlgmr.msra.gmra.mrb[128].mxu1 %vm155_vm2, %v4391_v24 }
0x2aa8   :  { %5620 = vmatpush3.bf16.msra.mxu1 %v6920_v48  ;;  %5623 = vmatprep.mubr.msk.bf16.mxu1 %vm6075_vm0, %v6074_v1 }
0x2aa9   :  { %5621 = vmatprep.subr.bf16.mxu1 %v6074_v1 }
0x2aac   :  { %5622 = vmatpush3.bf16.msra.mxu1 %v6927_v2 }
0x2aad   :  { %5635 = vmatprep.subr.bf16.mxu1 %v6074_v1 }
0x2af8   :  { %v4089_v6 = vpop.f32.mrb[116].mxu1 }
0x2af9   :  { %v4090_v38 = vadd.f32 %v4089_v6, %v6231_v35  ;;  %v5575_v29 = vpop.f32.mrb[117].mxu1 }
0x2afa   :  { %v4092_v34 = vpop.f32.mrb[118].mxu1 }
0x2afb   :  { %v4093_v51 = vadd.f32 %v4092_v34, %v6234_v37  ;;  %v5576_v28 = vpop.f32.mrb[119].mxu1  ;;  %v4096_v25 = vsel %vm203_vm11, %v4090_v38, -inf }
0x2afc   :  { %4097 = vmax.xlane.f32.xlu1 %v4096_v25 }
0x2afd   :  { %v4099_v48 = vsel %vm203_vm11, %v4093_v51, -inf }
0x2afe   :  { %4100 = vmax.xlane.f32.xlu0 %v4099_v48 }
0x2b6a   :  { %v4203_v62 = vpop.f32.mrb[120].mxu1 }
0x2b6b   :  { %v4204_v40 = vadd.f32 %v4203_v62, %v6231_v35  ;;  %v5587_v2 = vpop.f32.mrb[121].mxu1 }
0x2b6c   :  { %v4206_v42 = vpop.f32.mrb[122].mxu1 }
0x2b6d   :  { %v4207_v30 = vadd.f32 %v4206_v42, %v6234_v37  ;;  %v5588_v43 = vpop.f32.mrb[123].mxu1  ;;  %v4210_v45 = vsel %vm203_vm11, %v4204_v40, -inf }
0x2b6e   :  { %4211 = vmax.xlane.f32.xlu0 %v4210_v45 }
0x2b6f   :  { %v4213_v0 = vsel %vm203_vm11, %v4207_v30, -inf }
0x2b70   :  { %4214 = vmax.xlane.f32.xlu1 %v4213_v0 }
0x2b72   :  { %v4316_v41 = vpop.f32.mrb[124].mxu1 }
0x2b73   :  { %v4317_v44 = vadd.f32 %v4316_v41, %v6231_v35  ;;  %v5599_v20 = vpop.f32.mrb[125].mxu1 }
0x2b74   :  { %v4319_v9 = vpop.f32.mrb[126].mxu1 }
0x2b75   :  { %v4320_v47 = vadd.f32 %v4319_v9, %v6234_v37  ;;  %v5600_v46 = vpop.f32.mrb[127].mxu1  ;;  %v4323_v3 = vsel %vm203_vm11, %v4317_v44, -inf }
0x2b76   :  { %4324 = vmax.xlane.f32.xlu0 %v4323_v3 }
0x2b77   :  { %v4326_v55 = vsel %vm203_vm11, %v4320_v47, -inf }
0x2b78   :  { %4327 = vmax.xlane.f32.xlu1 %v4326_v55 }
0x2b7a   :  { %v4429_v50 = vpop.f32.mrb[128].mxu1 }
0x2b7b   :  { %v4430_v56 = vadd.f32 %v4429_v50, %v6231_v35  ;;  %v5611_v57 = vpop.f32.mrb[129].mxu1 }
0x2b7c   :  { %v4432_v54 = vpop.f32.mrb[130].mxu1 }
0x2b7d   :  { %v4433_v14 = vadd.f32 %v4432_v54, %v6234_v37  ;;  %v5612_v49 = vpop.f32.mrb[131].mxu1  ;;  %v4436_v10 = vsel %vm203_vm11, %v4430_v56, -inf }
0x2b7e   :  { %4437 = vmax.xlane.f32.xlu0 %v4436_v10 }
0x2b7f   :  { %v4439_v15 = vsel %vm203_vm11, %v4433_v14, -inf }
0x2b80   :  { %4440 = vmax.xlane.f32.xlu1 %v4439_v15 }
0x2b89   :  { %v4098_v13 = vpop.xlane.xlu1 %4097 }
0x2b8a   :  { %v4102_v32 = vsub.f32 %v4090_v38, %v4098_v13 }
0x2b8b   :  { %v4101_v60 = vpop.xlane.xlu0 %4100 }
0x2b8c   :  { %v4104_v36 = vmul.f32 1.442695, %v4102_v32  ;;  %v4103_v61 = vsub.f32 %v4093_v51, %v4101_v60 }
0x2b8e   :  { %5983 = vpow2.f32 %v4104_v36  ;;  %v4106_v63 = vmul.f32 1.442695, %v4103_v61 }
0x2b90   :  { %5985 = vpow2.f32 %v4106_v63 }
0x2b98   :  { %v5984_v35 = vpop.eup %5983 }
0x2b99   :  { %v4108_v52 = vsel %vm203_vm11, %v5984_v35, 0.0 }
0x2b9a   :  { %v5986_v53 = vpop.eup %5985  ;;  %4109 = vadd.xlane.f32.xlu0 %v4108_v52 }
0x2b9b   :  { %v4111_v37 = vsel %vm203_vm11, %v5986_v53, 0.0 }
0x2b9c   :  { %4112 = vadd.xlane.f32.xlu1 %v4111_v37 }
0x2bfb   :  { %v4212_v12 = vpop.xlane.xlu0 %4211 }
0x2bfc   :  { %v4216_v27 = vsub.f32 %v4204_v40, %v4212_v12 }
0x2bfd   :  { %v4215_v59 = vpop.xlane.xlu1 %4214 }
0x2bfe   :  { %v4218_v21 = vmul.f32 1.442695, %v4216_v27  ;;  %v4217_v11 = vsub.f32 %v4207_v30, %v4215_v59 }
0x2c00   :  { %5987 = vpow2.f32 %v4218_v21  ;;  %v4220_v7 = vmul.f32 1.442695, %v4217_v11 }
0x2c02   :  { %5989 = vpow2.f32 %v4220_v7 }
0x2c03   :  { %v4325_v31 = vpop.xlane.xlu0 %4324 }
0x2c04   :  { %v4329_v22 = vsub.f32 %v4317_v44, %v4325_v31 }
0x2c05   :  { %v4328_v33 = vpop.xlane.xlu1 %4327 }
0x2c06   :  { %v4331_v19 = vmul.f32 1.442695, %v4329_v22  ;;  %v4330_v8 = vsub.f32 %v4320_v47, %v4328_v33 }
0x2c08   :  { %5991 = vpow2.f32 %v4331_v19  ;;  %v4333_v39 = vmul.f32 1.442695, %v4330_v8 }
0x2c0a   :  { %v5988_v4 = vpop.eup %5987  ;;  %5993 = vpow2.f32 %v4333_v39 }
0x2c0b   :  { %v4438_v5 = vpop.xlane.xlu0 %4437  ;;  %v4222_v26 = vsel %vm203_vm11, %v5988_v4, 0.0 }
0x2c0c   :  { %v5990_v24 = vpop.eup %5989  ;;  %v4442_v6 = vsub.f32 %v4430_v56, %v4438_v5  ;;  %4223 = vadd.xlane.f32.xlu0 %v4222_v26 }
0x2c0d   :  { %v4441_v38 = vpop.xlane.xlu1 %4440  ;;  %v4225_v29 = vsel %vm203_vm11, %v5990_v24, 0.0 }
0x2c0e   :  { %v4444_v34 = vmul.f32 1.442695, %v4442_v6  ;;  %v4443_v51 = vsub.f32 %v4433_v14, %v4441_v38  ;;  %4226 = vadd.xlane.f32.xlu1 %v4225_v29 }
0x2c10   :  { %5995 = vpow2.f32 %v4444_v34  ;;  %v4446_v28 = vmul.f32 1.442695, %v4443_v51 }
0x2c12   :  { %v5992_v25 = vpop.eup %5991  ;;  %5997 = vpow2.f32 %v4446_v28 }
0x2c13   :  { %v4335_v48 = vsel %vm203_vm11, %v5992_v25, 0.0 }
0x2c14   :  { %v5994_v62 = vpop.eup %5993  ;;  %4336 = vadd.xlane.f32.xlu0 %v4335_v48 }
0x2c15   :  { %v4338_v40 = vsel %vm203_vm11, %v5994_v62, 0.0 }
0x2c16   :  { %4339 = vadd.xlane.f32.xlu1 %v4338_v40 }
0x2c1a   :  { %v5996_v2 = vpop.eup %5995 }
0x2c1b   :  { %v4448_v42 = vsel %vm203_vm11, %v5996_v2, 0.0 }
0x2c1c   :  { %v5998_v30 = vpop.eup %5997  ;;  %4449 = vadd.xlane.f32.xlu0 %v4448_v42 }
0x2c1d   :  { %v4451_v43 = vsel %vm203_vm11, %v5998_v30, 0.0 }
0x2c1e   :  { %4452 = vadd.xlane.f32.xlu1 %v4451_v43 }
0x2c27   :  { %v4110_v45 = vpop.xlane.xlu0 %4109 }
0x2c28   :  { %5999 = vrcp.f32 %v4110_v45 }
0x2c29   :  { %v4113_v0 = vpop.xlane.xlu1 %4112 }
0x2c2a   :  { %6001 = vrcp.f32 %v4113_v0 }
0x2c32   :  { %v6000_v41 = vpop.eup %5999 }
0x2c33   :  { %v4116_v20 = vmul.f32 %v6000_v41, %v5984_v35 }
0x2c34   :  { %v6002_v44 = vpop.eup %6001 }
0x2c35   :  { %v4117_v9 = vmul.f32 %v6002_v44, %v5986_v53  ;;  %v6037_v53 = vld [vmem:[%s7340_s4 + $0x100] sm:$0xff]  }
0x2c37   :  { %v4118_v47 = vpack.c.bf16 %v4117_v9, %v4116_v20  ;;  %v6039_v20 = vld [vmem:[%s7340_s4 + $0x120] sm:$0xff]   ;;  %v6040_v9 = vld [vmem:[%s7340_s4 + $0x128] sm:$0xff]  }
0x2c39   :  { %5580 = vmatmul.mubr.msk.bf16.vlgmr.msra.gmra.mrb[116].mxu0 %vm203_vm11, %v4118_v47  ;;  %v6041_v47 = vld [vmem:[%s7340_s4 + $0x130] sm:$0xff]  }
0x2c3a   :  { %5590 = vmatpush3.bf16.msra.mxu0 %v6885_v58  ;;  %5591 = vmatprep.mubr.msk.bf16.mxu0 %vm6075_vm0, %v6074_v1 }
0x2c3b   :  { %5601 = vmatprep.subr.bf16.mxu0 %v6074_v1 }
0x2c99   :  { %v4224_v46 = vpop.xlane.xlu0 %4223 }
0x2c9a   :  { %6003 = vrcp.f32 %v4224_v46  ;;  %v6042_v46 = vld [vmem:[%s7340_s4 + $0x138] sm:$0xff]  }
0x2c9b   :  { %v4227_v3 = vpop.xlane.xlu1 %4226 }
0x2c9c   :  { %6005 = vrcp.f32 %v4227_v3 }
0x2ca1   :  { %v4337_v55 = vpop.xlane.xlu0 %4336 }
0x2ca2   :  { %6007 = vrcp.f32 %v4337_v55  ;;  %v6043_v55 = vld [vmem:[%s7341_s5 + $0x50] ss:$0 sm:$0xff] }
0x2ca3   :  { %v4340_v50 = vpop.xlane.xlu1 %4339 }
0x2ca4   :  { %v6004_v56 = vpop.eup %6003  ;;  %6009 = vrcp.f32 %v4340_v50 }
0x2ca5   :  { %v4230_v54 = vmul.f32 %v6004_v56, %v5988_v4 }
0x2ca6   :  { %v6006_v57 = vpop.eup %6005 }
0x2ca7   :  { %v4231_v14 = vmul.f32 %v6006_v57, %v5990_v24 }
0x2ca9   :  { %v4450_v49 = vpop.xlane.xlu0 %4449  ;;  %v4232_v10 = vpack.c.bf16 %v4231_v14, %v4230_v54 }
0x2caa   :  { %6011 = vrcp.f32 %v4450_v49 }
0x2cab   :  { %5592 = vmatmul.mubr.msk.bf16.vlgmr.msra.gmra.mrb[120].mxu0 %vm203_vm11, %v4232_v10  ;;  %v4453_v58 = vpop.xlane.xlu1 %4452 }
0x2cac   :  { %v6008_v15 = vpop.eup %6007  ;;  %5602 = vmatpush3.bf16.msra.mxu0 %v6900_v17  ;;  %6013 = vrcp.f32 %v4453_v58  ;;  %5603 = vmatprep.mubr.msk.bf16.mxu0 %vm6075_vm0, %v6074_v1 }
0x2cad   :  { %5613 = vmatprep.subr.bf16.mxu0 %v6074_v1  ;;  %v4343_v32 = vmul.f32 %v6008_v15, %v5992_v25 }
0x2cae   :  { %v6010_v13 = vpop.eup %6009 }
0x2caf   :  { %v4344_v60 = vmul.f32 %v6010_v13, %v5994_v62 }
0x2cb1   :  { %v4345_v36 = vpack.c.bf16 %v4344_v60, %v4343_v32 }
0x2cb3   :  { %5604 = vmatmul.mubr.msk.bf16.vlgmr.msra.gmra.mrb[124].mxu0 %vm203_vm11, %v4345_v36 }
0x2cb4   :  { %v6012_v61 = vpop.eup %6011  ;;  %5614 = vmatpush3.bf16.msra.mxu0 %v6905_v23  ;;  %5615 = vmatprep.mubr.msk.bf16.mxu0 %vm6075_vm0, %v6074_v1  ;;  %v6038_v23 = vld [vmem:[%s7340_s4 + $0x108] sm:$0xff]  }
0x2cb5   :  { %5627 = vmatprep.subr.bf16.mxu0 %v6074_v1  ;;  %v4456_v63 = vmul.f32 %v6012_v61, %v5996_v2 }
0x2cb6   :  { %v6014_v17 = vpop.eup %6013 }
0x2cb7   :  { %v4457_v35 = vmul.f32 %v6014_v17, %v5998_v30 }
0x2cb9   :  { %v4458_v52 = vpack.c.bf16 %v4457_v35, %v4456_v63 }
0x2cbb   :  { %5616 = vmatmul.mubr.msk.bf16.vlgmr.msra.gmra.mrb[128].mxu0 %vm203_vm11, %v4458_v52 }
0x2cbc   :  { %5628 = vmatpush3.bf16.msra.mxu0 %v6037_v53  ;;  %5631 = vmatprep.mubr.msk.bf16.mxu0 %vm6075_vm0, %v6074_v1 }
0x2cbd   :  { %5629 = vmatprep.subr.bf16.mxu0 %v6074_v1 }
0x2cc0   :  { %5630 = vmatpush3.bf16.msra.mxu0 %v6038_v23 }
0x2cc1   :  { %5647 = vmatprep.subr.bf16.mxu0 %v6074_v1 }
0x2d0c   :  { %v4156_v37 = vpop.f32.mrb[116].mxu0 }
0x2d0d   :  { %v5581_v12 = vpop.f32.mrb[117].mxu0 }
0x2d0e   :  { %v4159_v27 = vpop.f32.mrb[118].mxu0 }
0x2d0f   :  { %v5582_v59 = vpop.f32.mrb[119].mxu0 }
0x2d7e   :  { %v4270_v21 = vpop.f32.mrb[120].mxu0 }
0x2d7f   :  { %v5593_v11 = vpop.f32.mrb[121].mxu0 }
0x2d80   :  { %v4273_v7 = vpop.f32.mrb[122].mxu0 }
0x2d81   :  { %v5750_v31 = vpack.i.bf16 %v4273_v7, %v4270_v21  ;;  %v5594_v22 = vpop.f32.mrb[123].mxu0  ;;  %v6044_v7 = vld [vmem:[%s7341_s5 + $0x58] ss:$0 sm:$0xff] }
0x2d83   :  { %5751 = vrot.lane.b32.xlu0 %v5750_v31, %s6089_s20 }
0x2d86   :  { %v4383_v33 = vpop.f32.mrb[124].mxu0 }
0x2d87   :  { %v5605_v19 = vpop.f32.mrb[125].mxu0 }
0x2d88   :  { %v4386_v8 = vpop.f32.mrb[126].mxu0  ;;  %v6045_v19 = vld [vmem:[%s7341_s5 + $0x59] ss:$0 sm:$0xff] }
0x2d89   :  { %v5755_v39 = vpack.i.bf16 %v4386_v8, %v4383_v33  ;;  %v5606_v4 = vpop.f32.mrb[127].mxu0 }
0x2d8b   :  { %5756 = vrot.lane.b32.xlu1 %v5755_v39, %s6090_s23  ;;  %s6092_s23 = smov [#allocation2]  }
0x2d8e   :  { %v4496_v5 = vpop.f32.mrb[128].mxu0 }
0x2d8f   :  { %v5617_v26 = vpop.f32.mrb[129].mxu0 }
0x2d90   :  { %v4499_v24 = vpop.f32.mrb[130].mxu0  ;;  %v6046_v26 = vld [vmem:[%s7341_s5 + $0x60] ss:$0 sm:$0xff] }
0x2d91   :  { %v5760_v6 = vpack.i.bf16 %v4499_v24, %v4496_v5  ;;  %v5618_v38 = vpop.f32.mrb[131].mxu0 }
0x2d93   :  { %5761 = vrot.lane.b32.xlu1 %v5760_v6, %s6091_s24  ;;  %s4809_s24 = sshll.u32 %s6092_s23, 4  ;;  %s4810_s24 = int_to_ptr.vmem [resolvable:$true] %s4809_s24 }
0x2d94   :  { %s6050_s21 = scalar_lea.vmem %s4810_s24, 256  ;;  %p6055_p1 = scmp.lt.s32.totalorder %s4810_s24, %s4810_s24 }
0x2d95   :  { %p6051_p0 = scmp.ne.s32.totalorder %s4810_s24, %s6050_s21  ;;  %p6056_p2 = scmp.lt.s32.totalorder %s6050_s21, %s6050_s21 }
0x2d97   :  { %p6057_p3 = por %p6056_p2, %p6055_p1 }
0x2d99   :  { %p6058_p4 = pnand %p6057_p3, %p6051_p0 }
0x2df5   :  { %v5752_v29 = vpop.permute.xlu0 %5751 }
0x2df6   :  { %v5754_v51 = vunpack.i.h.bf16 %v5752_v29  ;;  %v5753_v28 = vunpack.i.l.bf16 %v5752_v29 }
0x2df8   :  { %v4528_v40 = vsel %vm155_vm2, %v4159_v27, %v5754_v51  ;;  %v4527_v2 = vsel %vm155_vm2, %v4156_v37, %v5753_v28 }
0x2dfd   :  { %v5757_v34 = vpop.permute.xlu1 %5756 }
0x2dfe   :  { %v5759_v25 = vunpack.i.h.bf16 %v5757_v34  ;;  %v5758_v48 = vunpack.i.l.bf16 %v5757_v34 }
0x2e00   :  { %v4530_v43 = vsel %vm203_vm11, %v4528_v40, %v5759_v25  ;;  %v4529_v45 = vsel %vm203_vm11, %v4527_v2, %v5758_v48 }
0x2e05   :  { %v5762_v62 = vpop.permute.xlu1 %5761 }
0x2e06   :  { %v5764_v42 = vunpack.i.h.bf16 %v5762_v62  ;;  %v5763_v30 = vunpack.i.l.bf16 %v5762_v62  ;;  %v6047_v62 = vld [vmem:[%s7341_s5 + $0x68] ss:$0 sm:$0xff] }
0x2e08   :  { %v4531_v0 = vsel %vm665_vm12, %v4529_v45, %v5763_v30  ;;  %v4532_v41 = vsel %vm665_vm12, %v4530_v43, %v5764_v42 }
0x2e09   :  { %v4533_v44 = vpack.c.bf16 %v4532_v41, %v4531_v0 }
0x2e0b   :  { %5624 = vmatmul.mubr.msk.bf16.vlgmr.msra.gmra.mrb[132].mxu1 %vm106_vm1, %v4533_v44 }
0x2e0c   :  { %5636 = vmatpush3.bf16.msra.mxu1 %v6039_v20  ;;  %5643 = vmatprep.mubr.msk.bf16.mxu1 %vm6075_vm0, %v6074_v1 }
0x2e0d   :  { %5637 = vmatprep.subr.bf16.mxu1 %v6074_v1 }
0x2e10   :  { %5638 = vmatpush3.bf16.msra.mxu1 %v6040_v9 }
0x2e11   :  { %5639 = vmatprep.subr.bf16.mxu1 %v6074_v1 }
0x2e14   :  { %5640 = vmatpush3.bf16.msra.mxu1 %v6041_v47 }
0x2e15   :  { %5641 = vmatprep.subr.bf16.mxu1 %v6074_v1 }
0x2e18   :  { %5642 = vmatpush3.bf16.msra.mxu1 %v6042_v46 }
0x2ede   :  { %v4571_v3 = vpop.f32.mrb[132].mxu1 }
0x2edf   :  { %v4572_v50 = vadd.f32 %v6043_v55, %v4571_v3  ;;  %v5625_v56 = vpop.f32.mrb[133].mxu1 }
0x2ee0   :  { %v4574_v57 = vpop.f32.mrb[134].mxu1 }
0x2ee1   :  { %v4578_v54 = vadd.f32 %v4572_v50, %v7161_v18  ;;  %v4575_v14 = vadd.f32 %v6043_v55, %v4574_v57  ;;  %v5626_v49 = vpop.f32.mrb[135].mxu1 }
0x2ee2   :  { %v5790_v49 = vld [vmem:[%s7340_s4 + $0x148] sm:$0xff]  }
0x2ee3   :  { %v4579_v10 = vadd.f32 %v4575_v14, %v7163_v16  ;;  %v4580_v58 = vsel %vm106_vm1, %v4578_v54, 0.0  ;;  %v5789_v14 = vld [vmem:[%s7340_s4 + $0x140] sm:$0xff]  }
0x2ee4   :  { %4581 = vadd.xlane.f32.xlu0 %v4580_v58 }
0x2ee5   :  { %v4583_v15 = vsel %vm106_vm1, %v4579_v10, 0.0 }
0x2ee6   :  { %4584 = vadd.xlane.f32.xlu1 %v4583_v15 }
0x2f71   :  { %v4582_v13 = vpop.xlane.xlu0 %4581 }
0x2f72   :  { %v4586_v32 = vmul.f32 0.03125, %v4582_v13 }
0x2f73   :  { %v4585_v60 = vpop.xlane.xlu1 %4584 }
0x2f74   :  { %v4588_v36 = vsub.f32 %v4578_v54, %v4586_v32  ;;  %v4587_v61 = vmul.f32 0.03125, %v4585_v60 }
0x2f76   :  { %v4589_v17 = vsub.f32 %v4579_v10, %v4587_v61  ;;  %v4590_v63 = vmul.f32 %v4588_v36, %v4588_v36 }
0x2f78   :  { %v4592_v35 = vsel %vm106_vm1, %v4590_v63, 0.0  ;;  %v4591_v18 = vmul.f32 %v4589_v17, %v4589_v17  ;;  %v6048_v63 = vld [vmem:[%s7341_s5 + $0x70] ss:$0 sm:$0xff] }
0x2f79   :  { %4593 = vadd.xlane.f32.xlu0 %v4592_v35 }
0x2f7a   :  { %v4595_v52 = vsel %vm106_vm1, %v4591_v18, 0.0 }
0x2f7d   :  { %4596 = vadd.xlane.f32.xlu0 %v4595_v52 }
0x3006   :  { %v4594_v16 = vpop.xlane.xlu0 %4593 }
0x3007   :  { %v4598_v53 = vmul.f32 0.03125, %v4594_v16 }
0x3009   :  { %v4600_v23 = vadd.f32 1e-05, %v4598_v53 }
0x300a   :  { %v4597_v37 = vpop.xlane.xlu0 %4596 }
0x300b   :  { %6015 = vrsqrt.f32 %v4600_v23  ;;  %v4599_v12 = vmul.f32 0.03125, %v4597_v37  ;;  %v5001_v37 = vld [vmem:[%s7341_s5 + $0x78] ss:$0 sm:$0xff] }
0x300d   :  { %v4601_v27 = vadd.f32 1e-05, %v4599_v12 }
0x300f   :  { %6017 = vrsqrt.f32 %v4601_v27 }
0x3015   :  { %v6016_v59 = vpop.eup %6015 }
0x3016   :  { %v4604_v21 = vmul.f32 %v6016_v59, %v4588_v36 }
0x3018   :  { %v4606_v31 = vmul.f32 %v6044_v7, %v4604_v21 }
0x3019   :  { %v6018_v11 = vpop.eup %6017 }
0x301a   :  { %v4605_v22 = vmul.f32 %v6018_v11, %v4589_v17  ;;  %v4608_v8 = vadd.f32 %v6045_v19, %v4606_v31 }
0x301c   :  { %v4607_v33 = vmul.f32 %v6044_v7, %v4605_v22 }
0x301e   :  { %v4609_v39 = vadd.f32 %v6045_v19, %v4607_v33 }
0x3020   :  { %v4610_v4 = vpack.c.bf16 %v4609_v39, %v4608_v8 }
0x3022   :  { %5632 = vmatmul.mubr.msk.bf16.vlgmr.msra.gmra.mrb[132].mxu0 %vm106_vm1, %v4610_v4 }
0x3023   :  { %5651 = vmatprep.mubr.msk.bf16.mxu0 %vm6075_vm0, %v6074_v1  ;;  %5648 = vmatpush3.bf16.msra.mxu0 %v5789_v14 }
0x3024   :  { %5649 = vmatprep.subr.bf16.mxu0 %v6074_v1  ;;  %v6049_v1 = vld [vmem:[%s7341_s5 + $0x71] ss:$0 sm:$0xff] }
0x3027   :  { %5650 = vmatpush3.bf16.msra.mxu0 %v5790_v49 }
0x30f5   :  { %v4648_v5 = vpop.f32.mrb[132].mxu0 }
0x30f6   :  { %v4649_v24 = vadd.f32 %v6046_v26, %v4648_v5  ;;  %v5633_v6 = vpop.f32.mrb[133].mxu0 }
0x30f7   :  { %v4651_v38 = vpop.f32.mrb[134].mxu0 }
0x30f8   :  { %v4652_v29 = vadd.f32 %v6046_v26, %v4651_v38  ;;  %v5634_v34 = vpop.f32.mrb[135].mxu0  ;;  %v4655_v51 = vmax.f32 %v4649_v24, 0.0 }
0x30fa   :  { %v4656_v28 = vmax.f32 %v4652_v29, 0.0 }
0x30fc   :  { %v4657_v25 = vpack.c.bf16 %v4656_v28, %v4655_v51 }
0x30fe   :  { %5644 = vmatmul.mubr.msk.bf16.vlgmr.msra.gmra.mrb[136].mxu1 %vm890_vm13, %v4657_v25 }
0x31d1   :  { %v4695_v48 = vpop.f32.mrb[136].mxu1 }
0x31d2   :  { %v4696_v40 = vadd.f32 %v6047_v62, %v4695_v48  ;;  %v5645_v2 = vpop.f32.mrb[137].mxu1 }
0x31d3   :  { %v4698_v42 = vpop.f32.mrb[138].mxu1 }
0x31d4   :  { %v4702_v30 = vadd.f32 %v4696_v40, %v4608_v8  ;;  %v4699_v43 = vadd.f32 %v6047_v62, %v4698_v42  ;;  %v5646_v45 = vpop.f32.mrb[139].mxu1 }
0x31d6   :  { %v4703_v0 = vadd.f32 %v4699_v43, %v4609_v39  ;;  %v4704_v41 = vsel %vm106_vm1, %v4702_v30, 0.0 }
0x31d7   :  { %4705 = vadd.xlane.f32.xlu1 %v4704_v41 }
0x31d8   :  { %v4707_v44 = vsel %vm106_vm1, %v4703_v0, 0.0 }
0x31d9   :  { %4708 = vadd.xlane.f32.xlu0 %v4707_v44 }
0x3264   :  { %v4706_v20 = vpop.xlane.xlu1 %4705 }
0x3265   :  { %v4710_v9 = vmul.f32 0.03125, %v4706_v20 }
0x3266   :  { %v4709_v47 = vpop.xlane.xlu0 %4708 }
0x3267   :  { %v4712_v46 = vsub.f32 %v4702_v30, %v4710_v9  ;;  %v4711_v3 = vmul.f32 0.03125, %v4709_v47 }
0x3269   :  { %v4713_v55 = vsub.f32 %v4703_v0, %v4711_v3  ;;  %v4714_v50 = vmul.f32 %v4712_v46, %v4712_v46 }
0x326b   :  { %v4716_v56 = vsel %vm106_vm1, %v4714_v50, 0.0  ;;  %v4715_v57 = vmul.f32 %v4713_v55, %v4713_v55 }
0x326c   :  { %4717 = vadd.xlane.f32.xlu1 %v4716_v56 }
0x326d   :  { %v4719_v54 = vsel %vm106_vm1, %v4715_v57, 0.0 }
0x326e   :  { %4720 = vadd.xlane.f32.xlu0 %v4719_v54 }
0x32f9   :  { %v4718_v10 = vpop.xlane.xlu1 %4717 }
0x32fa   :  { %v4722_v58 = vmul.f32 0.03125, %v4718_v10 }
0x32fb   :  { %v4721_v15 = vpop.xlane.xlu0 %4720 }
0x32fc   :  { %v4724_v13 = vadd.f32 1e-05, %v4722_v58  ;;  %v4723_v32 = vmul.f32 0.03125, %v4721_v15 }
0x32fe   :  { %6019 = vrsqrt.f32 %v4724_v13  ;;  %v4725_v60 = vadd.f32 1e-05, %v4723_v32 }
0x3300   :  { %6021 = vrsqrt.f32 %v4725_v60 }
0x3308   :  { %v6020_v36 = vpop.eup %6019 }
0x3309   :  { %v4728_v61 = vmul.f32 %v6020_v36, %v4712_v46 }
0x330a   :  { %v6022_v17 = vpop.eup %6021 }
0x330b   :  { %v4730_v35 = vmul.f32 %v6048_v63, %v4728_v61  ;;  %v4729_v18 = vmul.f32 %v6022_v17, %v4713_v55 }
0x330d   :  { %v4731_v52 = vmul.f32 %v6048_v63, %v4729_v18  ;;  %v4732_v16 = vadd.f32 %v6049_v1, %v4730_v35 }
0x330f   :  { %v4733_v53 = vadd.f32 %v6049_v1, %v4731_v52 }
0x3311   :  { %v4734_v23 = vpack.c.bf16 %v4733_v53, %v4732_v16 }
0x3313   :  { %5652 = vmatmul.mubr.msk.bf16.vlgmr.msra.gmra.mrb[136].mxu0 %vm106_vm1, %v4734_v23 }
0x33e6   :  { %v4795_v12 = vpop.f32.mrb[136].mxu0 }
0x33e7   :  { %v4796_v27 = vadd.f32 %v5001_v37, %v4795_v12  ;;  %v5653_v59 = vpop.f32.mrb[137].mxu0 }
0x33e8   :  { %v4798_v21 = vpop.f32.mrb[138].mxu0 }
0x33e9   :  { %4802 = vst [vmem:[#allocation2] sm:$0xff] %v4796_v27  ;;  %v4799_v11 = vadd.f32 %v5001_v37, %v4798_v21  ;;  %v5654_v7 = vpop.f32.mrb[139].mxu0 }
0x33eb   :  { %4803 = vst [vmem:[#allocation2 + $0x8] sm:$0xff] %v4799_v11 }
0x33ec   :  { %6061 = shalt.err (!%p6058_p4)
}
0x33ed   :  { %s6062_s25 = scalar_lea.hbm %s7342_s6, 256 }
0x33ee   :  { %p6063_p5 = scmp.ne.s32.totalorder %s7342_s6, %s6062_s25  ;;  %p6066_p6 = scmp.lt.u32.totalorder %s6062_s25, %s7342_s6 }
0x33f0   :  { %p6068_p7 = pnand %p6066_p6, %p6063_p5 }
0x33f2   :  { %6071 = shalt.err (!%p6068_p7)
}
0x33f3   :  { %s6093_s9 = smov 128  }
0x33f4   :  { %4815 = dma.vmem_to_hbm [thread:$0]  %s4810_s24, 256, %s7342_s6, [#allocation3], %s6093_s9, %s6093_s9, %s6089_s20  }
0x33f5   :  { %6072 = dma.done.wait [#allocation3], 256  }
0x33f6   :  { %6073 = vsyncadd [#allocation3], 4294967040 }
0x33f7   :  { %4819 = vsyncpa [#allocation3], 1 }

</bundles_post_ra>
